<compile_context>
chip_gen: v7x
topology: tpu7x:2x2x1
jax: 0.10.0
libtpu: 0.0.40
codegen_flags: <defaults>
</compile_context>

<pallas_src>
import jax
import jax.numpy as jnp
from jax.experimental import pallas as pl
from jax.experimental.pallas import tpu as pltpu

IN_DIM = 28 * 28           # 784
IN_PAD = 896               # 7 * 128: lane/K-aligned contraction dim for fc1
H1, H2, H3 = 1024, 512, 256
OUT = 1
OUT_PAD = 128              # lane-dense output block; real logit is column 0
MAX_BATCH_TILE = 256       # rows per grid step (sublane-aligned, VMEM-friendly)


def _leaky_relu(x, slope=0.2):
    # max-form: one vmul + one vmax (cheaper than compare+select on the VPU).
    return jnp.maximum(x, slope * x)


def _round_up(n, m):
    return (n + m - 1) // m * m


def _choose_batch_tile(batch):
    """Batch tile: multiple of 8, capped at MAX_BATCH_TILE, and >=2 grid steps
    whenever the batch allows (keeps both v7x TensorCores busy and lets the
    x-tile DMA pipeline against compute)."""
    if batch <= 8:
        return 8
    return min(MAX_BATCH_TILE, _round_up((batch + 1) // 2, 8))


def discriminator_kernel(
    x_ref,
    w1_ref, b1_ref,
    w2_ref, b2_ref,
    w3_ref, b3_ref,
    w4_ref, b4_ref,
    o_ref,
):
    # x_ref: (Bt, IN_PAD) bf16.  Weights: bf16 (in, out).  Biases: f32 (1, out).
    x = x_ref[...]                                                        # bf16

    h = jnp.dot(x, w1_ref[...], preferred_element_type=jnp.float32)      # (Bt, 1024) f32
    h = _leaky_relu(h + b1_ref[...]).astype(jnp.bfloat16)

    h = jnp.dot(h, w2_ref[...], preferred_element_type=jnp.float32)      # (Bt, 512) f32
    h = _leaky_relu(h + b2_ref[...]).astype(jnp.bfloat16)

    h = jnp.dot(h, w3_ref[...], preferred_element_type=jnp.float32)      # (Bt, 256) f32
    h = _leaky_relu(h + b3_ref[...]).astype(jnp.bfloat16)

    logits = jnp.dot(h, w4_ref[...], preferred_element_type=jnp.float32) # (Bt, 128) f32
    logits = logits + b4_ref[...]

    # Sigmoid: exp goes to the EUP; approx reciprocal avoids the VPU divide.
    o_ref[...] = pl.reciprocal(1.0 + jnp.exp(-logits), approx=True).astype(o_ref.dtype)


def prepare_params(params):
    """(in, out)-layout f32 params -> kernel layout:
    bf16 weights with fc1 K-padded to 896 and fc4 N-padded to 128;
    f32 biases (1, out) with fc4 bias padded to 128."""
    w1, b1, w2, b2, w3, b3, w4, b4 = params
    w1p = jnp.zeros((IN_PAD, H1), jnp.float32).at[:IN_DIM, :].set(w1)
    w4p = jnp.zeros((H3, OUT_PAD), jnp.float32).at[:, :OUT].set(w4)
    b4p = jnp.zeros((1, OUT_PAD), jnp.float32).at[:, :OUT].set(b4)
    bf16 = lambda w: w.astype(jnp.bfloat16)
    return (bf16(w1p), b1, bf16(w2), b2, bf16(w3), b3, bf16(w4p), b4p)


@jax.jit
def discriminator_forward(x_nchw, kernel_params):
    """x_nchw: (B, 1, 28, 28) float32 -> (B, 1) float32 probabilities."""
    w1, b1, w2, b2, w3, b3, w4, b4 = kernel_params
    B = x_nchw.shape[0]
    x = x_nchw.reshape(B, -1).astype(jnp.bfloat16)       # == torch x.view(B, -1)

    bt = _choose_batch_tile(B)
    Bp = _round_up(B, bt)
    # Pad batch to a tile multiple and K from 784 -> 896 (zeros are exact).
    x = jnp.pad(x, ((0, Bp - B), (0, IN_PAD - IN_DIM)))

    grid = (Bp // bt,)
    tile_map = lambda i: (i, 0)   # batch-tiled operands
    const_map = lambda i: (0, 0)  # grid-invariant weights/biases (no re-DMA)

    weight_bytes = 2 * (IN_PAD * H1 + H1 * H2 + H2 * H3 + H3 * OUT_PAD)
    bias_bytes = 4 * (H1 + H2 + H3 + OUT_PAD)
    cost = pl.CostEstimate(
        flops=2 * Bp * (IN_DIM * H1 + H1 * H2 + H2 * H3 + H3 * OUT),
        transcendentals=Bp * OUT_PAD,
        bytes_accessed=Bp * IN_PAD * 2 + weight_bytes + bias_bytes
        + Bp * OUT_PAD * 4,
    )

    out = pl.pallas_call(
        discriminator_kernel,
        out_shape=jax.ShapeDtypeStruct((Bp, OUT_PAD), jnp.float32),
        grid_spec=pltpu.PrefetchScalarGridSpec(
            num_scalar_prefetch=0,
            grid=grid,
            in_specs=[
                pl.BlockSpec((bt, IN_PAD), tile_map),    # x tile (bf16)
                pl.BlockSpec((IN_PAD, H1), const_map),   # w1
                pl.BlockSpec((1, H1), const_map),        # b1
                pl.BlockSpec((H1, H2), const_map),       # w2
                pl.BlockSpec((1, H2), const_map),        # b2
                pl.BlockSpec((H2, H3), const_map),       # w3
                pl.BlockSpec((1, H3), const_map),        # b3
                pl.BlockSpec((H3, OUT_PAD), const_map),  # w4 (padded to 128 cols)
                pl.BlockSpec((1, OUT_PAD), const_map),   # b4 (padded)
            ],
            out_specs=pl.BlockSpec((bt, OUT_PAD), tile_map),  # lane-dense output
        ),
        compiler_params=pltpu.CompilerParams(
            dimension_semantics=("parallel",),
            vmem_limit_bytes=32 << 20,
        ),
        cost_estimate=cost,
    )(x, w1, b1, w2, b2, w3, b3, w4, b4)

    return out[:B, :OUT]


def init_params(key):
    """Deterministic init mirroring PyTorch nn.Linear default
    (U[-1/sqrt(in), 1/sqrt(in)]).  Weights stored as (in_features, out_features)."""
    dims = [(IN_DIM, H1), (H1, H2), (H2, H3), (H3, OUT)]
    params = []
    for (fan_in, fan_out) in dims:
        key, kw, kb = jax.random.split(key, 3)
        bound = 1.0 / (fan_in ** 0.5)
        w = jax.random.uniform(kw, (fan_in, fan_out), jnp.float32, -bound, bound)
        b = jax.random.uniform(kb, (1, fan_out), jnp.float32, -bound, bound)
        params += [w, b]
    return tuple(params)


def reference_forward(x_nchw, params):
    """Pure-JAX f32 reference matching the PyTorch module."""
    w1, b1, w2, b2, w3, b3, w4, b4 = params
    x = x_nchw.reshape(x_nchw.shape[0], -1)
    h = _leaky_relu(x @ w1 + b1)
    h = _leaky_relu(h @ w2 + b2)
    h = _leaky_relu(h @ w3 + b3)
    return jax.nn.sigmoid(h @ w4 + b4)


if __name__ == "__main__":
    key = jax.random.PRNGKey(0)
    kx, kp = jax.random.split(key)

    params = init_params(kp)
    kernel_params = prepare_params(params)

    # B=16 exercises a 2-step batch-tiled grid; B=3 exercises batch padding.
    for B in (16, 3):
        x = jax.random.normal(kx, (B, 1, 28, 28), dtype=jnp.float32)
        y = jax.block_until_ready(discriminator_forward(x, kernel_params))
        y_ref = reference_forward(x, params)
        assert y.shape == (B, 1), y.shape
        # bf16 matmuls + approx-reciprocal sigmoid vs. the f32 reference.
        err = float(jnp.max(jnp.abs(y - y_ref)))
        assert err < 2e-2, f"B={B}: max abs err {err}"

    print("KERNEL_OK")
</pallas_src>

<mosaic_0001>
module attributes {stable_mosaic.version = 11 : i64} {
  func.func @discriminator_kernel(%arg0: i32, %arg1: memref<8x896xbf16, #tpu.memory_space<vmem>>, %arg2: memref<896x1024xbf16, #tpu.memory_space<vmem>>, %arg3: memref<1x1024xf32, #tpu.memory_space<vmem>>, %arg4: memref<1024x512xbf16, #tpu.memory_space<vmem>>, %arg5: memref<1x512xf32, #tpu.memory_space<vmem>>, %arg6: memref<512x256xbf16, #tpu.memory_space<vmem>>, %arg7: memref<1x256xf32, #tpu.memory_space<vmem>>, %arg8: memref<256x128xbf16, #tpu.memory_space<vmem>>, %arg9: memref<1x128xf32, #tpu.memory_space<vmem>>, %arg10: memref<8x128xf32, #tpu.memory_space<vmem>>) attributes {dimension_semantics = [#tpu.dimension_semantics<parallel>], iteration_bounds = array<i64: 2>, scalar_prefetch = 0 : i64, scratch_operands = 0 : i64, tpu.core_type = #tpu.core_type<tc>, window_params = [{transform_indices = @transform_0, window_bounds = array<i64: 8, 896>}, {pipeline_mode = #tpu.pipeline_mode<synchronous>, transform_indices = @transform_1, window_bounds = array<i64: 896, 1024>}, {pipeline_mode = #tpu.pipeline_mode<synchronous>, transform_indices = @transform_2, window_bounds = array<i64: 1, 1024>}, {pipeline_mode = #tpu.pipeline_mode<synchronous>, transform_indices = @transform_3, window_bounds = array<i64: 1024, 512>}, {pipeline_mode = #tpu.pipeline_mode<synchronous>, transform_indices = @transform_4, window_bounds = array<i64: 1, 512>}, {pipeline_mode = #tpu.pipeline_mode<synchronous>, transform_indices = @transform_5, window_bounds = array<i64: 512, 256>}, {pipeline_mode = #tpu.pipeline_mode<synchronous>, transform_indices = @transform_6, window_bounds = array<i64: 1, 256>}, {pipeline_mode = #tpu.pipeline_mode<synchronous>, transform_indices = @transform_7, window_bounds = array<i64: 256, 128>}, {pipeline_mode = #tpu.pipeline_mode<synchronous>, transform_indices = @transform_8, window_bounds = array<i64: 1, 128>}, {transform_indices = @transform_9, window_bounds = array<i64: 8, 128>}]} {
    %c0 = arith.constant 0 : index
    %c0_0 = arith.constant 0 : index
    %0 = vector.load %arg1[%c0, %c0_0] : memref<8x896xbf16, #tpu.memory_space<vmem>>, vector<8x896xbf16>
    %c0_1 = arith.constant 0 : index
    %c0_2 = arith.constant 0 : index
    %1 = vector.load %arg2[%c0_1, %c0_2] : memref<896x1024xbf16, #tpu.memory_space<vmem>>, vector<896x1024xbf16>
    %cst = arith.constant dense<0.000000e+00> : vector<8x1024xf32>
    %2 = tpu.matmul %0, %1, %cst {dimension_numbers = #tpu.dot_dimension_numbers<[1], [0], [0], [1], [0, 0, 1, 1], [], []>} : vector<8x896xbf16>, vector<896x1024xbf16>, vector<8x1024xf32> -> vector<8x1024xf32>
    %c0_3 = arith.constant 0 : index
    %c0_4 = arith.constant 0 : index
    %3 = vector.load %arg3[%c0_3, %c0_4] : memref<1x1024xf32, #tpu.memory_space<vmem>>, vector<1x1024xf32>
    %4 = vector.broadcast %3 : vector<1x1024xf32> to vector<8x1024xf32>
    %5 = arith.addf %2, %4 : vector<8x1024xf32>
    %cst_5 = arith.constant 2.000000e-01 : f32
    %6 = vector.broadcast %cst_5 : f32 to vector<8x1024xf32>
    %7 = arith.mulf %6, %5 : vector<8x1024xf32>
    %8 = arith.maximumf %5, %7 : vector<8x1024xf32>
    %9 = arith.truncf %8 : vector<8x1024xf32> to vector<8x1024xbf16>
    %c0_6 = arith.constant 0 : index
    %c0_7 = arith.constant 0 : index
    %10 = vector.load %arg4[%c0_6, %c0_7] : memref<1024x512xbf16, #tpu.memory_space<vmem>>, vector<1024x512xbf16>
    %cst_8 = arith.constant dense<0.000000e+00> : vector<8x512xf32>
    %11 = tpu.matmul %9, %10, %cst_8 {dimension_numbers = #tpu.dot_dimension_numbers<[1], [0], [0], [1], [0, 0, 1, 1], [], []>} : vector<8x1024xbf16>, vector<1024x512xbf16>, vector<8x512xf32> -> vector<8x512xf32>
    %c0_9 = arith.constant 0 : index
    %c0_10 = arith.constant 0 : index
    %12 = vector.load %arg5[%c0_9, %c0_10] : memref<1x512xf32, #tpu.memory_space<vmem>>, vector<1x512xf32>
    %13 = vector.broadcast %12 : vector<1x512xf32> to vector<8x512xf32>
    %14 = arith.addf %11, %13 : vector<8x512xf32>
    %cst_11 = arith.constant 2.000000e-01 : f32
    %15 = vector.broadcast %cst_11 : f32 to vector<8x512xf32>
    %16 = arith.mulf %15, %14 : vector<8x512xf32>
    %17 = arith.maximumf %14, %16 : vector<8x512xf32>
    %18 = arith.truncf %17 : vector<8x512xf32> to vector<8x512xbf16>
    %c0_12 = arith.constant 0 : index
    %c0_13 = arith.constant 0 : index
    %19 = vector.load %arg6[%c0_12, %c0_13] : memref<512x256xbf16, #tpu.memory_space<vmem>>, vector<512x256xbf16>
    %cst_14 = arith.constant dense<0.000000e+00> : vector<8x256xf32>
    %20 = tpu.matmul %18, %19, %cst_14 {dimension_numbers = #tpu.dot_dimension_numbers<[1], [0], [0], [1], [0, 0, 1, 1], [], []>} : vector<8x512xbf16>, vector<512x256xbf16>, vector<8x256xf32> -> vector<8x256xf32>
    %c0_15 = arith.constant 0 : index
    %c0_16 = arith.constant 0 : index
    %21 = vector.load %arg7[%c0_15, %c0_16] : memref<1x256xf32, #tpu.memory_space<vmem>>, vector<1x256xf32>
    %22 = vector.broadcast %21 : vector<1x256xf32> to vector<8x256xf32>
    %23 = arith.addf %20, %22 : vector<8x256xf32>
    %cst_17 = arith.constant 2.000000e-01 : f32
    %24 = vector.broadcast %cst_17 : f32 to vector<8x256xf32>
    %25 = arith.mulf %24, %23 : vector<8x256xf32>
    %26 = arith.maximumf %23, %25 : vector<8x256xf32>
    %27 = arith.truncf %26 : vector<8x256xf32> to vector<8x256xbf16>
    %c0_18 = arith.constant 0 : index
    %c0_19 = arith.constant 0 : index
    %28 = vector.load %arg8[%c0_18, %c0_19] : memref<256x128xbf16, #tpu.memory_space<vmem>>, vector<256x128xbf16>
    %cst_20 = arith.constant dense<0.000000e+00> : vector<8x128xf32>
    %29 = tpu.matmul %27, %28, %cst_20 {dimension_numbers = #tpu.dot_dimension_numbers<[1], [0], [0], [1], [0, 0, 1, 1], [], []>} : vector<8x256xbf16>, vector<256x128xbf16>, vector<8x128xf32> -> vector<8x128xf32>
    %c0_21 = arith.constant 0 : index
    %c0_22 = arith.constant 0 : index
    %30 = vector.load %arg9[%c0_21, %c0_22] : memref<1x128xf32, #tpu.memory_space<vmem>>, vector<1x128xf32>
    %31 = vector.broadcast %30 : vector<1x128xf32> to vector<8x128xf32>
    %32 = arith.addf %29, %31 : vector<8x128xf32>
    %cst_23 = arith.constant 0.000000e+00 : f32
    %33 = vector.broadcast %cst_23 : f32 to vector<8x128xf32>
    %34 = arith.subf %33, %32 : vector<8x128xf32>
    %35 = math.exp %34 : vector<8x128xf32>
    %cst_24 = arith.constant 1.000000e+00 : f32
    %36 = vector.broadcast %cst_24 : f32 to vector<8x128xf32>
    %37 = arith.addf %36, %35 : vector<8x128xf32>
    %38 = tpu.reciprocal %37 {approx = true} : vector<8x128xf32> -> vector<8x128xf32>
    %c0_25 = arith.constant 0 : index
    %c0_26 = arith.constant 0 : index
    %39 = vector.load %arg10[%c0_25, %c0_26] : memref<8x128xf32, #tpu.memory_space<vmem>>, vector<8x128xf32>
    tpu.vector_store %arg10[%c0_25, %c0_26], %38 {strides = array<i32>} : memref<8x128xf32, #tpu.memory_space<vmem>>, vector<8x128xf32>,
    return
  }
  func.func @transform_0(%arg0: i32) -> (i32, i32) {
    %c0_i32 = arith.constant 0 : i32
    %c0_i32_0 = arith.constant 0 : i32
    return %arg0, %c0_i32 : i32, i32
  }
  func.func @transform_1(%arg0: i32) -> (i32, i32) {
    %c0_i32 = arith.constant 0 : i32
    %c0_i32_0 = arith.constant 0 : i32
    %c0_i32_1 = arith.constant 0 : i32
    return %c0_i32, %c0_i32_0 : i32, i32
  }
  func.func @transform_2(%arg0: i32) -> (i32, i32) {
    %c0_i32 = arith.constant 0 : i32
    %c0_i32_0 = arith.constant 0 : i32
    %c0_i32_1 = arith.constant 0 : i32
    return %c0_i32, %c0_i32_0 : i32, i32
  }
  func.func @transform_3(%arg0: i32) -> (i32, i32) {
    %c0_i32 = arith.constant 0 : i32
    %c0_i32_0 = arith.constant 0 : i32
    %c0_i32_1 = arith.constant 0 : i32
    return %c0_i32, %c0_i32_0 : i32, i32
  }
  func.func @transform_4(%arg0: i32) -> (i32, i32) {
    %c0_i32 = arith.constant 0 : i32
    %c0_i32_0 = arith.constant 0 : i32
    %c0_i32_1 = arith.constant 0 : i32
    return %c0_i32, %c0_i32_0 : i32, i32
  }
  func.func @transform_5(%arg0: i32) -> (i32, i32) {
    %c0_i32 = arith.constant 0 : i32
    %c0_i32_0 = arith.constant 0 : i32
    %c0_i32_1 = arith.constant 0 : i32
    return %c0_i32, %c0_i32_0 : i32, i32
  }
  func.func @transform_6(%arg0: i32) -> (i32, i32) {
    %c0_i32 = arith.constant 0 : i32
    %c0_i32_0 = arith.constant 0 : i32
    %c0_i32_1 = arith.constant 0 : i32
    return %c0_i32, %c0_i32_0 : i32, i32
  }
  func.func @transform_7(%arg0: i32) -> (i32, i32) {
    %c0_i32 = arith.constant 0 : i32
    %c0_i32_0 = arith.constant 0 : i32
    %c0_i32_1 = arith.constant 0 : i32
    return %c0_i32, %c0_i32_0 : i32, i32
  }
  func.func @transform_8(%arg0: i32) -> (i32, i32) {
    %c0_i32 = arith.constant 0 : i32
    %c0_i32_0 = arith.constant 0 : i32
    %c0_i32_1 = arith.constant 0 : i32
    return %c0_i32, %c0_i32_0 : i32, i32
  }
  func.func @transform_9(%arg0: i32) -> (i32, i32) {
    %c0_i32 = arith.constant 0 : i32
    %c0_i32_0 = arith.constant 0 : i32
    return %arg0, %c0_i32 : i32, i32
  }
}

</mosaic_0001>

<bundles_post_ra>
// kernel: discriminator_forward.1
= control target key start
LH: loop header
LB: loop body
LE: loop exit
PB: predicated region body
PF: predicated region fallthrough
CT: control target
= control target key end

     0   :  { %14 = vsyncpa [#allocation3], 0  ;;  %s8822_s0 = inlined_call_operand.vmem [shape: bf16[16,896], index: 0, kind: input, shape index: {}]   ;;  %s8823_s1 = inlined_call_operand.hbm [shape: bf16[896,1024], index: 1, kind: input, shape index: {}]   ;;  %s8824_s2 = inlined_call_operand.hbm [shape: f32[1,1024], index: 2, kind: input, shape index: {}]   ;;  %s8825_s3 = inlined_call_operand.hbm [shape: bf16[1024,512], index: 3, kind: input, shape index: {}]   ;;  %s8826_s4 = inlined_call_operand.hbm [shape: f32[1,512], index: 4, kind: input, shape index: {}]   ;;  %s8827_s5 = inlined_call_operand.hbm [shape: bf16[512,256], index: 5, kind: input, shape index: {}]   ;;  %s8828_s6 = inlined_call_operand.hbm [shape: f32[1,256], index: 6, kind: input, shape index: {}]   ;;  %s8829_s7 = inlined_call_operand.hbm [shape: bf16[256,128], index: 7, kind: input, shape index: {}]   ;;  %s8830_s8 = inlined_call_operand.hbm [shape: f32[1,128], index: 8, kind: input, shape index: {}]   ;;  %s8831_s9 = inlined_call_operand.vmem [shape: f32[16,128], index: 9, kind: output, shape index: {}]  }
   0x1   :  { %15 = vsyncpa [#allocation5], 0 }
   0x2   :  { %16 = vsyncpa [#allocation8], 0 }
   0x3   :  { %17 = vsyncpa [#allocation11], 0 }
   0x4   :  { %18 = vsyncpa [#allocation14], 0  ;;  %s8430_s30 = smov 0  }
   0x5 LB: > { %s8363_s10 = smov [#allocation4]   ;;  %s8436_s12 = sadd.s32 4294967295, %s8361_s30   ;;  %s8361_s30 = sphi %s8430_s30, %s24_s30  }
   0x6   : > { %s275_s11 = sshll.u32 %s8363_s10, 4  ;;  %p6577_p0 = scmp.ge.s32.totalorder %s8361_s30, 1  ;;  %s8441_s11 = int_to_ptr.vmem [resolvable:$true] %s275_s11 }
   0x7   : > { %p249_p1 = scmp.lt.s32.totalorder %s8361_s30, 3  ;;  %p8832_p2 = scmp.eq.s32.totalorder %s8436_s12, 0 }
   0x8   : > { %s8364_s14 = smov [#allocation7]   ;;  %s8365_s16 = smov [#allocation10]  }
   0x9   : > { %p8443_p3 = pnand %p6577_p0, %p249_p1  ;;  %s299_s15 = sshll.u32 %s8364_s14, 4  ;;  %s8449_s15 = int_to_ptr.vmem [resolvable:$true] %s299_s15 }
   0xa   : > { %s323_s17 = sshll.u32 %s8365_s16, 4  ;;  %s8366_s19 = smov [#allocation2]   ;;  %s8457_s17 = int_to_ptr.vmem [resolvable:$true] %s323_s17 }
   0xb   : > { %s8834_s13 = scalar_select %p8443_p3, 1, 0 }
   0xc   : > { %p7535_p4 = pneg %p8443_p3  ;;  %s261_s20 = sshll.u32 %s8366_s19, 4  ;;  %s8459_s20 = int_to_ptr.vmem [resolvable:$true] %s261_s20 }
   0xd   : > { %s8111_s23 = scalar_lea.hbm %s8824_s2, 128 }
   0xe   : > { %p8453_p5 = pnand %p8832_p2, %p7535_p4  ;;  %p8112_p6 = scmp.ne.s32.totalorder %s8824_s2, %s8111_s23 }
   0xf   : > { %p8118_p10 = scmp.lt.u32.totalorder %s8111_s23, %s8824_s2 }
  0x10   : > { %p8469_p7 = pneg %p8453_p5 }
  0x12   : > { %p8114_p8 = pnand %p8469_p7, %p8112_p6 }
  0x14   : > { %p8115_p9 = pneg %p8114_p8 }
  0x16   : > { %p8120_p11 = pnand %p8118_p10, %p8115_p9 }
  0x18   : > { %8123 = shalt.err (!%p8120_p11)
}
  0x19   : > { %s8124_s29 = scalar_lea.vmem %s8441_s11, 128  ;;  %p8132_p1 = scmp.lt.s32.totalorder %s8441_s11, %s8441_s11 }
  0x1a   : > { %p8125_p12 = scmp.ne.s32.totalorder %s8441_s11, %s8124_s29  ;;  %p8133_p4 = scmp.lt.s32.totalorder %s8124_s29, %s8124_s29 }
  0x1c   : > { %p8127_p13 = pnand %p8125_p12, %p8469_p7  ;;  %p8134_p6 = por %p8133_p4, %p8132_p1 }
  0x1e   : > { %p8128_p0 = pneg %p8127_p13 }
  0x20   : > { %p8135_p8 = pnand %p8134_p6, %p8128_p0 }
  0x22   : > { %8138 = shalt.err (!%p8135_p8)
}
  0x23   : > { %7541 = dma.hbm_to_vmem [thread:$0]  (!%p8453_p5), %s8824_s2, 128, %s8441_s11, [#allocation5]  }
  0x24   : > { %s8139_s21 = scalar_lea.hbm %s8826_s4, 64 }
  0x25   : > { %p8140_p9 = scmp.ne.s32.totalorder %s8826_s4, %s8139_s21  ;;  %p8146_p12 = scmp.lt.u32.totalorder %s8139_s21, %s8826_s4 }
  0x27   : > { %p8142_p10 = pnand %p8140_p9, %p8469_p7 }
  0x29   : > { %p8143_p11 = pneg %p8142_p10 }
  0x2b   : > { %p8148_p13 = pnand %p8146_p12, %p8143_p11 }
  0x2d   : > { %8151 = shalt.err (!%p8148_p13)
}
  0x2e   : > { %s8152_s11 = scalar_lea.vmem %s8449_s15, 64  ;;  %p8160_p6 = scmp.lt.s32.totalorder %s8449_s15, %s8449_s15 }
  0x2f   : > { %p8153_p0 = scmp.ne.s32.totalorder %s8449_s15, %s8152_s11  ;;  %p8161_p8 = scmp.lt.s32.totalorder %s8152_s11, %s8152_s11 }
  0x31   : > { %p8155_p1 = pnand %p8153_p0, %p8469_p7  ;;  %p8162_p9 = por %p8161_p8, %p8160_p6 }
  0x33   : > { %p8156_p4 = pneg %p8155_p1 }
  0x35   : > { %p8163_p10 = pnand %p8162_p9, %p8156_p4 }
  0x37   : > { %8166 = shalt.err (!%p8163_p10)
}
  0x38   : > { %7547 = dma.hbm_to_vmem [thread:$0]  (!%p8453_p5), %s8826_s4, 64, %s8449_s15, [#allocation8]  }
  0x39   : > { %s8167_s14 = scalar_lea.hbm %s8828_s6, 32 }
  0x3a   : > { %p8168_p11 = scmp.ne.s32.totalorder %s8828_s6, %s8167_s14  ;;  %p8174_p0 = scmp.lt.u32.totalorder %s8167_s14, %s8828_s6 }
  0x3c   : > { %p8170_p12 = pnand %p8168_p11, %p8469_p7 }
  0x3e   : > { %p8171_p13 = pneg %p8170_p12 }
  0x40   : > { %p8176_p1 = pnand %p8174_p0, %p8171_p13 }
  0x42   : > { %8179 = shalt.err (!%p8176_p1)
}
  0x43   : > { %s8180_s15 = scalar_lea.vmem %s8457_s17, 32  ;;  %p8188_p9 = scmp.lt.s32.totalorder %s8457_s17, %s8457_s17 }
  0x44   : > { %p8181_p4 = scmp.ne.s32.totalorder %s8457_s17, %s8180_s15  ;;  %p8189_p10 = scmp.lt.s32.totalorder %s8180_s15, %s8180_s15 }
  0x46   : > { %p8183_p6 = pnand %p8181_p4, %p8469_p7  ;;  %p8190_p11 = por %p8189_p10, %p8188_p9 }
  0x48   : > { %p8184_p8 = pneg %p8183_p6 }
  0x4a   : > { %p8191_p12 = pnand %p8190_p11, %p8184_p8 }
  0x4c   : > { %8194 = shalt.err (!%p8191_p12)
}
  0x4d   : > { %7553 = dma.hbm_to_vmem [thread:$0]  (!%p8453_p5), %s8828_s6, 32, %s8457_s17, [#allocation11]  }
  0x4e   : > { %s8195_s27 = scalar_lea.hbm %s8823_s1, 57344 }
  0x4f   : > { %p8196_p13 = scmp.ne.s32.totalorder %s8823_s1, %s8195_s27  ;;  %p8202_p4 = scmp.lt.u32.totalorder %s8195_s27, %s8823_s1 }
  0x51   : > { %p8198_p0 = pnand %p8196_p13, %p8469_p7 }
  0x53   : > { %p8199_p1 = pneg %p8198_p0 }
  0x55   : > { %p8204_p6 = pnand %p8202_p4, %p8199_p1 }
  0x57   : > { %8207 = shalt.err (!%p8204_p6)
}
  0x58   : > { %s8208_s17 = scalar_lea.vmem %s8459_s20, 57344  ;;  %p8216_p11 = scmp.lt.s32.totalorder %s8459_s20, %s8459_s20 }
  0x59   : > { %p8209_p8 = scmp.ne.s32.totalorder %s8459_s20, %s8208_s17  ;;  %p8217_p12 = scmp.lt.s32.totalorder %s8208_s17, %s8208_s17 }
  0x5b   : > { %p8211_p9 = pnand %p8209_p8, %p8469_p7  ;;  %p8218_p13 = por %p8217_p12, %p8216_p11 }
  0x5d   : > { %p8212_p10 = pneg %p8211_p9 }
  0x5f   : > { %p8219_p0 = pnand %p8218_p13, %p8212_p10 }
  0x61   : > { %8222 = shalt.err (!%p8219_p0)
}
  0x62   : > { %s8367_s16 = smov 512   ;;  %s8368_s19 = smov 32  }
  0x63   : > { %7538 = dma.hbm_to_vmem [thread:$0]  (!%p8453_p5), %s8823_s1, 57344, %s8459_s20, [#allocation3], %s8367_s16, %s8367_s16, %s8368_s19  }
  0x64   : > { %s8369_s15 = smov [#allocation6]   ;;  %s8223_s11 = scalar_lea.hbm %s8825_s3, 32768 }
  0x65   : > { %s285_s23 = sshll.u32 %s8369_s15, 4  ;;  %p8224_p1 = scmp.ne.s32.totalorder %s8825_s3, %s8223_s11  ;;  %s286_s23 = int_to_ptr.vmem [resolvable:$true] %s285_s23 }
  0x66   : > { %p8230_p8 = scmp.lt.u32.totalorder %s8223_s11, %s8825_s3 }
  0x67   : > { %p8226_p4 = pnand %p8224_p1, %p8469_p7 }
  0x69   : > { %p8227_p6 = pneg %p8226_p4 }
  0x6b   : > { %p8232_p9 = pnand %p8230_p8, %p8227_p6 }
  0x6d   : > { %8235 = shalt.err (!%p8232_p9)
}
  0x6e   : > { %s8236_s20 = scalar_lea.vmem %s286_s23, 32768  ;;  %p8244_p13 = scmp.lt.s32.totalorder %s286_s23, %s286_s23 }
  0x6f   : > { %p8237_p10 = scmp.ne.s32.totalorder %s286_s23, %s8236_s20  ;;  %p8245_p0 = scmp.lt.s32.totalorder %s8236_s20, %s8236_s20 }
  0x71   : > { %p8239_p11 = pnand %p8237_p10, %p8469_p7  ;;  %p8246_p2 = por %p8245_p0, %p8244_p13 }
  0x73   : > { %p8240_p12 = pneg %p8239_p11 }
  0x75   : > { %p8247_p3 = pnand %p8246_p2, %p8240_p12 }
  0x77   : > { %8250 = shalt.err (!%p8247_p3)
}
  0x78   : > { %s8370_s14 = smov 256   ;;  %s8371_s17 = smov 16  }
  0x79   : > { %7544 = dma.hbm_to_vmem [thread:$0]  (!%p8453_p5), %s8825_s3, 32768, %s286_s23, [#allocation5], %s8370_s14, %s8370_s14, %s8371_s17  }
  0x7a   : > { %s8372_s21 = smov [#allocation9]   ;;  %s8251_s25 = scalar_lea.hbm %s8827_s5, 8192 }
  0x7b   : > { %s309_s22 = sshll.u32 %s8372_s21, 4  ;;  %p8252_p2 = scmp.ne.s32.totalorder %s8827_s5, %s8251_s25  ;;  %s310_s22 = int_to_ptr.vmem [resolvable:$true] %s309_s22 }
  0x7c   : > { %p8258_p4 = scmp.lt.u32.totalorder %s8251_s25, %s8827_s5 }
  0x7d   : > { %p8254_p3 = pnand %p8252_p2, %p8469_p7 }
  0x7f   : > { %p8255_p1 = pneg %p8254_p3 }
  0x81   : > { %p8260_p6 = pnand %p8258_p4, %p8255_p1 }
  0x83   : > { %8263 = shalt.err (!%p8260_p6)
}
  0x84   : > { %s8264_s23 = scalar_lea.vmem %s310_s22, 8192  ;;  %p8272_p11 = scmp.lt.s32.totalorder %s310_s22, %s310_s22 }
  0x85   : > { %p8265_p8 = scmp.ne.s32.totalorder %s310_s22, %s8264_s23  ;;  %p8273_p12 = scmp.lt.s32.totalorder %s8264_s23, %s8264_s23 }
  0x87   : > { %p8267_p9 = pnand %p8265_p8, %p8469_p7  ;;  %p8274_p13 = por %p8273_p12, %p8272_p11 }
  0x89   : > { %p8268_p10 = pneg %p8267_p9 }
  0x8b   : > { %p8275_p0 = pnand %p8274_p13, %p8268_p10 }
  0x8d   : > { %8278 = shalt.err (!%p8275_p0)
}
  0x8e   : > { %s8373_s10 = smov 128   ;;  %s8374_s20 = smov 8  }
  0x8f   : > { %7550 = dma.hbm_to_vmem [thread:$0]  (!%p8453_p5), %s8827_s5, 8192, %s310_s22, [#allocation8], %s8373_s10, %s8373_s10, %s8374_s20  }
  0x90   : > { %s8375_s16 = smov [#allocation12]   ;;  %s8279_s24 = scalar_lea.hbm %s8829_s7, 2048 }
  0x91   : > { %s333_s19 = sshll.u32 %s8375_s16, 4  ;;  %p8280_p2 = scmp.ne.s32.totalorder %s8829_s7, %s8279_s24  ;;  %s334_s19 = int_to_ptr.vmem [resolvable:$true] %s333_s19 }
  0x92   : > { %p8286_p4 = scmp.lt.u32.totalorder %s8279_s24, %s8829_s7 }
  0x93   : > { %p8282_p3 = pnand %p8280_p2, %p8469_p7 }
  0x95   : > { %p8283_p1 = pneg %p8282_p3 }
  0x97   : > { %p8288_p6 = pnand %p8286_p4, %p8283_p1 }
  0x99   : > { %8291 = shalt.err (!%p8288_p6)
}
  0x9a   : > { %s8292_s22 = scalar_lea.vmem %s334_s19, 2048  ;;  %p8300_p11 = scmp.lt.s32.totalorder %s334_s19, %s334_s19 }
  0x9b   : > { %p8293_p8 = scmp.ne.s32.totalorder %s334_s19, %s8292_s22  ;;  %p8301_p12 = scmp.lt.s32.totalorder %s8292_s22, %s8292_s22 }
  0x9d   : > { %p8295_p9 = pnand %p8293_p8, %p8469_p7  ;;  %p8302_p13 = por %p8301_p12, %p8300_p11 }
  0x9f   : > { %p8296_p10 = pneg %p8295_p9 }
  0xa1   : > { %p8303_p0 = pnand %p8302_p13, %p8296_p10 }
  0xa3   : > { %8306 = shalt.err (!%p8303_p0)
}
  0xa4   : > { %s8376_s29 = smov 64   ;;  %s8377_s23 = smov 4  }
  0xa5   : > { %7556 = dma.hbm_to_vmem [thread:$0]  (!%p8453_p5), %s8829_s7, 2048, %s334_s19, [#allocation11], %s8376_s29, %s8376_s29, %s8377_s23  }
  0xa6   : > { %s8378_s14 = smov [#allocation13]   ;;  %s8307_s15 = scalar_lea.hbm %s8830_s8, 16 }
  0xa7   : > { %s347_s17 = sshll.u32 %s8378_s14, 4  ;;  %p8308_p2 = scmp.ne.s32.totalorder %s8830_s8, %s8307_s15  ;;  %s348_s17 = int_to_ptr.vmem [resolvable:$true] %s347_s17 }
  0xa8   : > { %p8314_p4 = scmp.lt.u32.totalorder %s8307_s15, %s8830_s8 }
  0xa9   : > { %p8310_p3 = pnand %p8308_p2, %p8469_p7 }
  0xab   : > { %p8311_p1 = pneg %p8310_p3 }
  0xad   : > { %p8316_p6 = pnand %p8314_p4, %p8311_p1 }
  0xaf   : > { %8319 = shalt.err (!%p8316_p6)
}
  0xb0   : > { %s8320_s19 = scalar_lea.vmem %s348_s17, 16  ;;  %s8327_s28 = scalar_lea.vmem %s348_s17, 32 }
  0xb1   : > { %p8321_p8 = scmp.ne.s32.totalorder %s348_s17, %s8320_s19  ;;  %p8328_p11 = scmp.lt.s32.totalorder %s348_s17, %s348_s17 }
  0xb2   : > { %p8329_p12 = scmp.lt.s32.totalorder %s8327_s28, %s8320_s19 }
  0xb3   : > { %p8323_p9 = pnand %p8321_p8, %p8469_p7 }
  0xb4   : > { %p8330_p13 = por %p8329_p12, %p8328_p11 }
  0xb5   : > { %p8324_p10 = pneg %p8323_p9 }
  0xb7   : > { %p8331_p0 = pnand %p8330_p13, %p8324_p10 }
  0xb9   : > { %8334 = shalt.err (!%p8331_p0)
}
  0xba   : > { %7559 = dma.hbm_to_vmem [thread:$0]  (!%p8453_p5), %s8830_s8, 16, %s348_s17, [#allocation14]  }
  0xbb   : > { %p8837_p2 = scmp.ne.s32.totalorder %s8834_s13, 0 }
  0xbc   : > { %p8838_p3 = scmp.eq.s32.totalorder (!%p8837_p2), %s8436_s12, 0 }
  0xbd   : > { %368 = sbr.rel (%p8837_p2) target bundleno = 1702 (0x6a6), region = 56 }
  0xc4   : > { %8340 = dma.done.wait (%p8838_p3), [#allocation3], 57344   ;;  %p8839_p7 = pmov %p8838_p3 }
  0xc5   : > { %p8840_p1 = pmov %p8838_p3 }
  0xc6   : > { %8342 = vsyncadd (%p8839_p7), [#allocation3], 4294909952 }
  0xc7   : > { %8344 = dma.done.wait (%p8840_p1), [#allocation5], 32896   ;;  %p8841_p4 = pmov %p8840_p1 }
  0xc8   : > { %p8842_p6 = pmov %p8840_p1 }
  0xc9   : > { %8346 = vsyncadd (%p8841_p4), [#allocation5], 4294934400 }
  0xca   : > { %8348 = dma.done.wait (%p8842_p6), [#allocation8], 8256   ;;  %p8843_p5 = pmov %p8840_p1 }
  0xcb   : > { %p8844_p8 = pmov %p8840_p1 }
  0xcc   : > { %8350 = vsyncadd (%p8843_p5), [#allocation8], 4294959040 }
  0xcd   : > { %8352 = dma.done.wait (%p8844_p8), [#allocation11], 2080   ;;  %p8845_p9 = pmov %p8840_p1 }
  0xce   : > { %p8846_p10 = pmov %p8840_p1 }
  0xcf   : > { %8354 = vsyncadd (%p8845_p9), [#allocation11], 4294965216 }
  0xd0   : > { %8356 = dma.done.wait (%p8846_p10), [#allocation14], 16   ;;  %p8847_p11 = pmov %p8840_p1 }
  0xd1   : > { %v445_v0 = vld [vmem:[#allocation2] sm:$0xff]  ;;  %p431_p12 = scmp.lt.s32.totalorder %s8436_s12, 1 }
  0xd2   : > { %8358 = vsyncadd (%p8847_p11), [#allocation14], 4294967280  ;;  %v449_v1 = vld [vmem:[#allocation2 + $0x20] sm:$0xff] }
  0xd3   : > { %v573_v2 = vld [vmem:[#allocation2 + $0x400] sm:$0xff]  ;;  %v6606_v3 = vcombine.high %v445_v0, %v449_v1  ;;  %v6605_v5 = vcombine.low %v445_v0, %v449_v1  ;;  %s8849_s12 = smov (!%p431_p12, %s8436_s12), 1 }
  0xd4   : > { %v577_v4 = vld [vmem:[#allocation2 + $0x420] sm:$0xff]  ;;  %s7502_s13 = smul.u32 28, %s8849_s12  ;;  %s6597_s10 = sshll.u32 %s8849_s12, 3 }
  0xd5   : > { %v453_v6 = vld [vmem:[#allocation2 + $0x40] sm:$0xff]  ;;  %v6734_v8 = vcombine.high %v573_v2, %v577_v4  ;;  %v6733_v9 = vcombine.low %v573_v2, %v577_v4  ;;  %3200 = vmatprep.subr.bf16.mxu1 %v6606_v3  ;;  %s439_s17 = scalar_lea.vmem %s8831_s9, %s6597_s10 }
  0xd6   : > { %v457_v7 = vld [vmem:[#allocation2 + $0x60] sm:$0xff]  ;;  %3201 = vmatpush1.bf16.msra.mxu1 %v6605_v5  ;;  %s8661_s23 = scalar_lea.vmem %s8822_s0, %s7502_s13 }
  0xd7   : > { %v6614_v10 = vcombine.high %v453_v6, %v457_v7  ;;  %v581_v11 = vld [vmem:[#allocation2 + $0x440] sm:$0xff]  ;;  %3241 = vmatprep.subr.bf16.mxu0 %v6734_v8  ;;  %v6613_v18 = vcombine.low %v453_v6, %v457_v7  ;;  %v8667_v54 = vld [vmem:[%s8661_s23 + $0x8] sm:$0xff] }
  0xd8   : > { %v585_v12 = vld [vmem:[#allocation2 + $0x460] sm:$0xff]  ;;  %3242 = vmatpush1.bf16.msra.mxu0 %v6733_v9  ;;  %v8675_v61 = vcombine.high %v8667_v54, %v8667_v54 }
  0xd9   : > { %v461_v13 = vld [vmem:[#allocation2 + $0x80] sm:$0xff]  ;;  %v6742_v14 = vcombine.high %v581_v11, %v585_v12  ;;  %3202 = vmatprep.subr.bf16.mxu1 %v6614_v10  ;;  %v6741_v19 = vcombine.low %v581_v11, %v585_v12 }
  0xda   : > { %v465_v15 = vld [vmem:[#allocation2 + $0xa0] sm:$0xff]  ;;  %3203 = vmatpush1.bf16.msra.mxu1 %v6613_v18  ;;  %3273 = vmatprep.mubr.bf16.mxu0 %v8675_v61 }
  0xdb   : > { %v589_v16 = vld [vmem:[#allocation2 + $0x480] sm:$0xff]  ;;  %v6622_v20 = vcombine.high %v461_v13, %v465_v15  ;;  %3243 = vmatprep.subr.bf16.mxu0 %v6742_v14  ;;  %v6621_v26 = vcombine.low %v461_v13, %v465_v15 }
  0xdc   : > { %v593_v17 = vld [vmem:[#allocation2 + $0x4a0] sm:$0xff]  ;;  %3244 = vmatpush1.bf16.msra.mxu0 %v6741_v19 }
  0xdd   : > { %v6750_v21 = vcombine.high %v589_v16, %v593_v17  ;;  %v469_v22 = vld [vmem:[#allocation2 + $0xc0] sm:$0xff]  ;;  %3204 = vmatprep.subr.bf16.mxu1 %v6622_v20  ;;  %v6749_v27 = vcombine.low %v589_v16, %v593_v17 }
  0xde   : > { %v473_v23 = vld [vmem:[#allocation2 + $0xe0] sm:$0xff]  ;;  %3205 = vmatpush1.bf16.msra.mxu1 %v6621_v26 }
  0xdf   : > { %v597_v24 = vld [vmem:[#allocation2 + $0x4c0] sm:$0xff]  ;;  %v6630_v28 = vcombine.high %v469_v22, %v473_v23  ;;  %3245 = vmatprep.subr.bf16.mxu0 %v6750_v21  ;;  %v6629_v34 = vcombine.low %v469_v22, %v473_v23 }
  0xe0   : > { %v601_v25 = vld [vmem:[#allocation2 + $0x4e0] sm:$0xff]  ;;  %3246 = vmatpush1.bf16.msra.mxu0 %v6749_v27 }
  0xe1   : > { %v6758_v29 = vcombine.high %v597_v24, %v601_v25  ;;  %v477_v30 = vld [vmem:[#allocation2 + $0x100] sm:$0xff]  ;;  %3206 = vmatprep.subr.bf16.mxu1 %v6630_v28  ;;  %v6757_v35 = vcombine.low %v597_v24, %v601_v25 }
  0xe2   : > { %v481_v31 = vld [vmem:[#allocation2 + $0x120] sm:$0xff]  ;;  %3207 = vmatpush1.bf16.msra.mxu1 %v6629_v34 }
  0xe3   : > { %v605_v32 = vld [vmem:[#allocation2 + $0x500] sm:$0xff]  ;;  %v6638_v36 = vcombine.high %v477_v30, %v481_v31  ;;  %3247 = vmatprep.subr.bf16.mxu0 %v6758_v29  ;;  %v6637_v42 = vcombine.low %v477_v30, %v481_v31 }
  0xe4   : > { %v609_v33 = vld [vmem:[#allocation2 + $0x520] sm:$0xff]  ;;  %3248 = vmatpush1.bf16.msra.mxu0 %v6757_v35 }
  0xe5   : > { %v6766_v37 = vcombine.high %v605_v32, %v609_v33  ;;  %v485_v38 = vld [vmem:[#allocation2 + $0x140] sm:$0xff]  ;;  %3208 = vmatprep.subr.bf16.mxu1 %v6638_v36  ;;  %v6765_v43 = vcombine.low %v605_v32, %v609_v33 }
  0xe6   : > { %v489_v39 = vld [vmem:[#allocation2 + $0x160] sm:$0xff]  ;;  %3209 = vmatpush1.bf16.msra.mxu1 %v6637_v42 }
  0xe7   : > { %v613_v40 = vld [vmem:[#allocation2 + $0x540] sm:$0xff]  ;;  %v6646_v44 = vcombine.high %v485_v38, %v489_v39  ;;  %3249 = vmatprep.subr.bf16.mxu0 %v6766_v37  ;;  %v6645_v50 = vcombine.low %v485_v38, %v489_v39 }
  0xe8   : > { %v617_v41 = vld [vmem:[#allocation2 + $0x560] sm:$0xff]  ;;  %3250 = vmatpush1.bf16.msra.mxu0 %v6765_v43 }
  0xe9   : > { %v6774_v45 = vcombine.high %v613_v40, %v617_v41  ;;  %v493_v46 = vld [vmem:[#allocation2 + $0x180] sm:$0xff]  ;;  %3210 = vmatprep.subr.bf16.mxu1 %v6646_v44  ;;  %v6773_v51 = vcombine.low %v613_v40, %v617_v41 }
  0xea   : > { %v497_v47 = vld [vmem:[#allocation2 + $0x1a0] sm:$0xff]  ;;  %3211 = vmatpush1.bf16.msra.mxu1 %v6645_v50 }
  0xeb   : > { %v621_v48 = vld [vmem:[#allocation2 + $0x580] sm:$0xff]  ;;  %v6654_v52 = vcombine.high %v493_v46, %v497_v47  ;;  %3251 = vmatprep.subr.bf16.mxu0 %v6774_v45  ;;  %v6653_v62 = vcombine.low %v493_v46, %v497_v47 }
  0xec   : > { %v625_v49 = vld [vmem:[#allocation2 + $0x5a0] sm:$0xff]  ;;  %3252 = vmatpush1.bf16.msra.mxu0 %v6773_v51 }
  0xed   : > { %v8664_v53 = vld [vmem:[%s8661_s23] sm:$0xff]  ;;  %v6782_v55 = vcombine.high %v621_v48, %v625_v49  ;;  %3212 = vmatprep.subr.bf16.mxu1 %v6654_v52  ;;  %v6781_v63 = vcombine.low %v621_v48, %v625_v49 }
  0xee   : > { %v501_v56 = vld [vmem:[#allocation2 + $0x1c0] sm:$0xff]  ;;  %v8671_v58 = vcombine.high %v8664_v53, %v8664_v53  ;;  %3213 = vmatpush1.bf16.msra.mxu1 %v6653_v62 }
  0xef   : > { %v505_v57 = vld [vmem:[#allocation2 + $0x1e0] sm:$0xff]  ;;  %3253 = vmatprep.subr.bf16.mxu0 %v6782_v55 }
  0xf0   : > { %v629_v59 = vld [vmem:[#allocation2 + $0x5c0] sm:$0xff]  ;;  %3232 = vmatprep.mubr.bf16.mxu1 %v8671_v58  ;;  %v6662_v0 = vcombine.high %v501_v56, %v505_v57  ;;  %v6661_v6 = vcombine.low %v501_v56, %v505_v57  ;;  %3254 = vmatpush1.bf16.msra.mxu0 %v6781_v63 }
  0xf1   : > { %v633_v60 = vld [vmem:[#allocation2 + $0x5e0] sm:$0xff] }
  0xf2   : > { %v6790_v1 = vcombine.high %v629_v59, %v633_v60  ;;  %v509_v2 = vld [vmem:[#allocation2 + $0x200] sm:$0xff]  ;;  %3214 = vmatprep.subr.bf16.mxu1 %v6662_v0  ;;  %v6789_v7 = vcombine.low %v629_v59, %v633_v60 }
  0xf3   : > { %v513_v3 = vld [vmem:[#allocation2 + $0x220] sm:$0xff]  ;;  %3215 = vmatpush1.bf16.msra.mxu1 %v6661_v6  ;;  %v446_v6 = vld [vmem:[#allocation2 + $0x8] sm:$0xff] }
  0xf4   : > { %v637_v4 = vld [vmem:[#allocation2 + $0x600] sm:$0xff]  ;;  %v6670_v8 = vcombine.high %v509_v2, %v513_v3  ;;  %3255 = vmatprep.subr.bf16.mxu0 %v6790_v1  ;;  %v6669_v14 = vcombine.low %v509_v2, %v513_v3 }
  0xf5   : > { %v641_v5 = vld [vmem:[#allocation2 + $0x620] sm:$0xff]  ;;  %3256 = vmatpush1.bf16.msra.mxu0 %v6789_v7  ;;  %v450_v7 = vld [vmem:[#allocation2 + $0x28] sm:$0xff] }
  0xf6   : > { %v6798_v9 = vcombine.high %v637_v4, %v641_v5  ;;  %v517_v10 = vld [vmem:[#allocation2 + $0x240] sm:$0xff]  ;;  %3216 = vmatprep.subr.bf16.mxu1 %v6670_v8  ;;  %v6797_v15 = vcombine.low %v637_v4, %v641_v5 }
  0xf7   : > { %v521_v11 = vld [vmem:[#allocation2 + $0x260] sm:$0xff]  ;;  %3217 = vmatpush1.bf16.msra.mxu1 %v6669_v14  ;;  %v454_v14 = vld [vmem:[#allocation2 + $0x48] sm:$0xff] }
  0xf8   : > { %v645_v12 = vld [vmem:[#allocation2 + $0x640] sm:$0xff]  ;;  %v6678_v16 = vcombine.high %v517_v10, %v521_v11  ;;  %3257 = vmatprep.subr.bf16.mxu0 %v6798_v9  ;;  %v6677_v22 = vcombine.low %v517_v10, %v521_v11 }
  0xf9   : > { %v649_v13 = vld [vmem:[#allocation2 + $0x660] sm:$0xff]  ;;  %3258 = vmatpush1.bf16.msra.mxu0 %v6797_v15  ;;  %v458_v15 = vld [vmem:[#allocation2 + $0x68] sm:$0xff] }
  0xfa   : > { %v6806_v17 = vcombine.high %v645_v12, %v649_v13  ;;  %v525_v18 = vld [vmem:[#allocation2 + $0x280] sm:$0xff]  ;;  %3218 = vmatprep.subr.bf16.mxu1 %v6678_v16  ;;  %v6805_v23 = vcombine.low %v645_v12, %v649_v13  ;;  %v6608_v12 = vcombine.high %v446_v6, %v450_v7  ;;  %v8681_v16 = vcombine.low %v8664_v53, %v8664_v53  ;;  %v462_v53 = vld [vmem:[#allocation2 + $0x88] sm:$0xff] }
  0xfb   : > { %v529_v19 = vld [vmem:[#allocation2 + $0x2a0] sm:$0xff]  ;;  %3219 = vmatpush1.bf16.msra.mxu1 %v6677_v22 }
  0xfc   : > { %v653_v20 = vld [vmem:[#allocation2 + $0x680] sm:$0xff]  ;;  %v6686_v24 = vcombine.high %v525_v18, %v529_v19  ;;  %3259 = vmatprep.subr.bf16.mxu0 %v6806_v17  ;;  %v6685_v30 = vcombine.low %v525_v18, %v529_v19  ;;  %v8684_v19 = vld [vmem:[%s8661_s23 + $0x10] sm:$0xff] }
  0xfd   : > { %v657_v21 = vld [vmem:[#allocation2 + $0x6a0] sm:$0xff]  ;;  %3260 = vmatpush1.bf16.msra.mxu0 %v6805_v23  ;;  %v6616_v23 = vcombine.high %v454_v14, %v458_v15 }
  0xfe   : > { %v6814_v25 = vcombine.high %v653_v20, %v657_v21  ;;  %v533_v26 = vld [vmem:[#allocation2 + $0x2c0] sm:$0xff]  ;;  %3220 = vmatprep.subr.bf16.mxu1 %v6686_v24  ;;  %v6813_v31 = vcombine.low %v653_v20, %v657_v21  ;;  %v6607_v20 = vcombine.low %v446_v6, %v450_v7  ;;  %v8688_v21 = vcombine.low %v8667_v54, %v8667_v54  ;;  %v506_v7 = vld [vmem:[#allocation2 + $0x1e8] sm:$0xff] }
  0xff   : > { %v537_v27 = vld [vmem:[#allocation2 + $0x2e0] sm:$0xff]  ;;  %3221 = vmatpush1.bf16.msra.mxu1 %v6685_v30  ;;  %v6615_v54 = vcombine.low %v454_v14, %v458_v15  ;;  %v514_v15 = vld [vmem:[#allocation2 + $0x228] sm:$0xff] }
 0x100   : > { %v661_v28 = vld [vmem:[#allocation2 + $0x6c0] sm:$0xff]  ;;  %v6694_v32 = vcombine.high %v533_v26, %v537_v27  ;;  %3261 = vmatprep.subr.bf16.mxu0 %v6814_v25  ;;  %v6693_v38 = vcombine.low %v533_v26, %v537_v27  ;;  %v466_v27 = vld [vmem:[#allocation2 + $0xa8] sm:$0xff] }
 0x101   : > { %v665_v29 = vld [vmem:[#allocation2 + $0x6e0] sm:$0xff]  ;;  %3262 = vmatpush1.bf16.msra.mxu0 %v6813_v31  ;;  %v6624_v30 = vcombine.high %v462_v53, %v466_v27 }
 0x102   : > { %v6822_v33 = vcombine.high %v661_v28, %v665_v29  ;;  %v541_v34 = vld [vmem:[#allocation2 + $0x300] sm:$0xff]  ;;  %3222 = vmatprep.subr.bf16.mxu1 %v6694_v32  ;;  %v6821_v39 = vcombine.low %v661_v28, %v665_v29  ;;  %v8692_v28 = vcombine.high %v8684_v19, %v8684_v19 }
 0x103   : > { %v545_v35 = vld [vmem:[#allocation2 + $0x320] sm:$0xff]  ;;  %3223 = vmatpush1.bf16.msra.mxu1 %v6693_v38 }
 0x104   : > { %v669_v36 = vld [vmem:[#allocation2 + $0x700] sm:$0xff]  ;;  %v6702_v40 = vcombine.high %v541_v34, %v545_v35  ;;  %3263 = vmatprep.subr.bf16.mxu0 %v6822_v33  ;;  %v6701_v46 = vcombine.low %v541_v34, %v545_v35  ;;  %v470_v33 = vld [vmem:[#allocation2 + $0xc8] sm:$0xff] }
 0x105   : > { %v673_v37 = vld [vmem:[#allocation2 + $0x720] sm:$0xff]  ;;  %3264 = vmatpush1.bf16.msra.mxu0 %v6821_v39  ;;  %v474_v35 = vld [vmem:[#allocation2 + $0xe8] sm:$0xff] }
 0x106   : > { %v6830_v41 = vcombine.high %v669_v36, %v673_v37  ;;  %v549_v42 = vld [vmem:[#allocation2 + $0x340] sm:$0xff]  ;;  %3224 = vmatprep.subr.bf16.mxu1 %v6702_v40  ;;  %v6829_v47 = vcombine.low %v669_v36, %v673_v37  ;;  %v6623_v36 = vcombine.low %v462_v53, %v466_v27  ;;  %v6632_v38 = vcombine.high %v470_v33, %v474_v35 }
 0x107   : > { %v553_v43 = vld [vmem:[#allocation2 + $0x360] sm:$0xff]  ;;  %3225 = vmatpush1.bf16.msra.mxu1 %v6701_v46 }
 0x108   : > { %v677_v44 = vld [vmem:[#allocation2 + $0x740] sm:$0xff]  ;;  %v6710_v48 = vcombine.high %v549_v42, %v553_v43  ;;  %3265 = vmatprep.subr.bf16.mxu0 %v6830_v41  ;;  %v6709_v56 = vcombine.low %v549_v42, %v553_v43  ;;  %v478_v41 = vld [vmem:[#allocation2 + $0x108] sm:$0xff] }
 0x109   : > { %v681_v45 = vld [vmem:[#allocation2 + $0x760] sm:$0xff]  ;;  %3266 = vmatpush1.bf16.msra.mxu0 %v6829_v47  ;;  %v482_v43 = vld [vmem:[#allocation2 + $0x128] sm:$0xff] }
 0x10a   : > { %v6838_v49 = vcombine.high %v677_v44, %v681_v45  ;;  %v557_v50 = vld [vmem:[#allocation2 + $0x380] sm:$0xff]  ;;  %3226 = vmatprep.subr.bf16.mxu1 %v6710_v48  ;;  %v6837_v57 = vcombine.low %v677_v44, %v681_v45  ;;  %v6631_v44 = vcombine.low %v470_v33, %v474_v35  ;;  %v6640_v46 = vcombine.high %v478_v41, %v482_v43  ;;  %v530_v33 = vld [vmem:[#allocation2 + $0x2a8] sm:$0xff] }
 0x10b   : > { %v561_v51 = vld [vmem:[#allocation2 + $0x3a0] sm:$0xff]  ;;  %3227 = vmatpush1.bf16.msra.mxu1 %v6709_v56 }
 0x10c   : > { %v685_v52 = vld [vmem:[#allocation2 + $0x780] sm:$0xff]  ;;  %v6718_v59 = vcombine.high %v557_v50, %v561_v51  ;;  %3267 = vmatprep.subr.bf16.mxu0 %v6838_v49  ;;  %v6717_v2 = vcombine.low %v557_v50, %v561_v51  ;;  %v486_v49 = vld [vmem:[#allocation2 + $0x148] sm:$0xff] }
 0x10d   : > { %v689_v55 = vld [vmem:[#allocation2 + $0x7a0] sm:$0xff]  ;;  %3268 = vmatpush1.bf16.msra.mxu0 %v6837_v57  ;;  %v490_v51 = vld [vmem:[#allocation2 + $0x168] sm:$0xff] }
 0x10e   : > { %v6846_v60 = vcombine.high %v685_v52, %v689_v55  ;;  %v565_v62 = vld [vmem:[#allocation2 + $0x3c0] sm:$0xff]  ;;  %3228 = vmatprep.subr.bf16.mxu1 %v6718_v59  ;;  %v6845_v3 = vcombine.low %v685_v52, %v689_v55  ;;  %v6639_v52 = vcombine.low %v478_v41, %v482_v43  ;;  %v6648_v56 = vcombine.high %v486_v49, %v490_v51  ;;  %v538_v41 = vld [vmem:[#allocation2 + $0x2e8] sm:$0xff] }
 0x10f   : > { %v569_v63 = vld [vmem:[#allocation2 + $0x3e0] sm:$0xff]  ;;  %3229 = vmatpush1.bf16.msra.mxu1 %v6717_v2 }
 0x110   : > { %v693_v0 = vld [vmem:[#allocation2 + $0x7c0] sm:$0xff]  ;;  %v6726_v4 = vcombine.high %v565_v62, %v569_v63  ;;  %3269 = vmatprep.subr.bf16.mxu0 %v6846_v60  ;;  %v6725_v10 = vcombine.low %v565_v62, %v569_v63  ;;  %v494_v60 = vld [vmem:[#allocation2 + $0x188] sm:$0xff] }
 0x111   : > { %v697_v1 = vld [vmem:[#allocation2 + $0x7e0] sm:$0xff]  ;;  %3270 = vmatpush1.bf16.msra.mxu0 %v6845_v3  ;;  %v498_v63 = vld [vmem:[#allocation2 + $0x1a8] sm:$0xff] }
 0x112   : > { %v6854_v5 = vcombine.high %v693_v0, %v697_v1  ;;  %v701_v8 = vld [vmem:[#allocation2 + $0x800] sm:$0xff]  ;;  %3230 = vmatprep.subr.bf16.mxu1 %v6726_v4  ;;  %v6853_v11 = vcombine.low %v693_v0, %v697_v1  ;;  %v6647_v0 = vcombine.low %v486_v49, %v490_v51  ;;  %v6656_v2 = vcombine.high %v494_v60, %v498_v63  ;;  %v546_v49 = vld [vmem:[#allocation2 + $0x328] sm:$0xff] }
 0x113   : > { %v705_v9 = vld [vmem:[#allocation2 + $0x820] sm:$0xff]  ;;  %3231 = vmatpush1.bf16.msra.mxu1 %v6725_v10 }
 0x114   : > { %3271 = vmatprep.subr.bf16.mxu0 %v6854_v5  ;;  %v6862_v13 = vcombine.high %v701_v8, %v705_v9  ;;  %v709_v17 = vld [vmem:[#allocation2 + $0x840] sm:$0xff]  ;;  %v6861_v22 = vcombine.low %v701_v8, %v705_v9  ;;  %3364 = vmatprep.subr.bf16.mxu1 %v6608_v12  ;;  %v502_v5 = vld [vmem:[#allocation2 + $0x1c8] sm:$0xff]  ;;  %v6655_v8 = vcombine.low %v494_v60, %v498_v63 }
 0x115   : > { %v713_v18 = vld [vmem:[#allocation2 + $0x860] sm:$0xff]  ;;  %3272 = vmatpush1.bf16.msra.mxu0 %v6853_v11  ;;  %v6664_v10 = vcombine.high %v502_v5, %v506_v7  ;;  %v554_v60 = vld [vmem:[#allocation2 + $0x368] sm:$0xff] }
 0x116   : > { %v717_v24 = vld [vmem:[#allocation2 + $0x880] sm:$0xff]  ;;  %3282 = vmatprep.subr.bf16.mxu0 %v6862_v13  ;;  %v6870_v25 = vcombine.high %v709_v17, %v713_v18  ;;  %3233 = vmatmul.mubr.bf16.vlgmr.msra.gmra.mrb[0].mxu1 %v8681_v16  ;;  %v6869_v29 = vcombine.low %v709_v17, %v713_v18  ;;  %v510_v13 = vld [vmem:[#allocation2 + $0x208] sm:$0xff]  ;;  %v6663_v17 = vcombine.low %v502_v5, %v506_v7 }
 0x117   : > { %v721_v26 = vld [vmem:[#allocation2 + $0x8a0] sm:$0xff]  ;;  %3365 = vmatpush1.bf16.msra.mxu1 %v6607_v20  ;;  %3396 = vmatprep.mubr.bf16.mxu1 %v8671_v58  ;;  %v6672_v20 = vcombine.high %v510_v13, %v514_v15  ;;  %v6671_v53 = vcombine.low %v510_v13, %v514_v15  ;;  %v562_v5 = vld [vmem:[#allocation2 + $0x3a8] sm:$0xff] }
 0x118   : > { %3274 = vmatmul.mubr.bf16.vlgmr.msra.gmra.mrb[0].mxu0 %v8688_v21  ;;  %3366 = vmatprep.subr.bf16.mxu1 %v6616_v23  ;;  %v725_v31 = vld [vmem:[#allocation2 + $0x8c0] sm:$0xff]  ;;  %v6878_v34 = vcombine.high %v717_v24, %v721_v26  ;;  %v6877_v37 = vcombine.low %v717_v24, %v721_v26  ;;  %v518_v24 = vld [vmem:[#allocation2 + $0x248] sm:$0xff] }
 0x119   : > { %3283 = vmatpush1.bf16.msra.mxu0 %v6861_v22  ;;  %v729_v32 = vld [vmem:[#allocation2 + $0x8e0] sm:$0xff]  ;;  %3314 = vmatprep.mubr.bf16.mxu0 %v8692_v28  ;;  %v522_v26 = vld [vmem:[#allocation2 + $0x268] sm:$0xff] }
 0x11a   : > { %3284 = vmatprep.subr.bf16.mxu0 %v6870_v25  ;;  %v733_v39 = vld [vmem:[#allocation2 + $0x900] sm:$0xff]  ;;  %v6886_v42 = vcombine.high %v725_v31, %v729_v32  ;;  %v6885_v45 = vcombine.low %v725_v31, %v729_v32  ;;  %v526_v31 = vld [vmem:[#allocation2 + $0x288] sm:$0xff] }
 0x11b   : > { %3367 = vmatpush1.bf16.msra.mxu1 %v6615_v54  ;;  %v737_v40 = vld [vmem:[#allocation2 + $0x920] sm:$0xff]  ;;  %v6680_v54 = vcombine.high %v518_v24, %v522_v26  ;;  %v570_v13 = vld [vmem:[#allocation2 + $0x3e8] sm:$0xff] }
 0x11c   : > { %3368 = vmatprep.subr.bf16.mxu1 %v6624_v30  ;;  %v741_v47 = vld [vmem:[#allocation2 + $0x940] sm:$0xff]  ;;  %v6894_v50 = vcombine.high %v733_v39, %v737_v40  ;;  %v6893_v55 = vcombine.low %v733_v39, %v737_v40  ;;  %v534_v39 = vld [vmem:[#allocation2 + $0x2c8] sm:$0xff] }
 0x11d   : > { %3285 = vmatpush1.bf16.msra.mxu0 %v6869_v29  ;;  %v745_v48 = vld [vmem:[#allocation2 + $0x960] sm:$0xff] }
 0x11e   : > { %3286 = vmatprep.subr.bf16.mxu0 %v6878_v34  ;;  %v749_v57 = vld [vmem:[#allocation2 + $0x980] sm:$0xff]  ;;  %v6902_v62 = vcombine.high %v741_v47, %v745_v48  ;;  %v6901_v1 = vcombine.low %v741_v47, %v745_v48  ;;  %v6679_v34 = vcombine.low %v518_v24, %v522_v26  ;;  %v542_v47 = vld [vmem:[#allocation2 + $0x308] sm:$0xff] }
 0x11f   : > { %3369 = vmatpush1.bf16.msra.mxu1 %v6623_v36  ;;  %v753_v59 = vld [vmem:[#allocation2 + $0x9a0] sm:$0xff]  ;;  %v6688_v36 = vcombine.high %v526_v31, %v530_v33  ;;  %v578_v24 = vld [vmem:[#allocation2 + $0x428] sm:$0xff] }
 0x120   : > { %3370 = vmatprep.subr.bf16.mxu1 %v6632_v38  ;;  %v757_v3 = vld [vmem:[#allocation2 + $0x9c0] sm:$0xff]  ;;  %v6910_v6 = vcombine.high %v749_v57, %v753_v59  ;;  %v6909_v9 = vcombine.low %v749_v57, %v753_v59  ;;  %v550_v57 = vld [vmem:[#allocation2 + $0x348] sm:$0xff] }
 0x121   : > { %3287 = vmatpush1.bf16.msra.mxu0 %v6877_v37  ;;  %v761_v4 = vld [vmem:[#allocation2 + $0x9e0] sm:$0xff] }
 0x122   : > { %3288 = vmatprep.subr.bf16.mxu0 %v6886_v42  ;;  %v765_v11 = vld [vmem:[#allocation2 + $0xa00] sm:$0xff]  ;;  %v6918_v14 = vcombine.high %v757_v3, %v761_v4  ;;  %v6917_v18 = vcombine.low %v757_v3, %v761_v4  ;;  %v6687_v42 = vcombine.low %v526_v31, %v530_v33  ;;  %v558_v3 = vld [vmem:[#allocation2 + $0x388] sm:$0xff]  ;;  %v8700_v33 = vcombine.low %v8684_v19, %v8684_v19 }
 0x123   : > { %3371 = vmatpush1.bf16.msra.mxu1 %v6631_v44  ;;  %v769_v12 = vld [vmem:[#allocation2 + $0xa20] sm:$0xff]  ;;  %v6696_v44 = vcombine.high %v534_v39, %v538_v41  ;;  %v586_v31 = vld [vmem:[#allocation2 + $0x468] sm:$0xff] }
 0x124   : > { %3372 = vmatprep.subr.bf16.mxu1 %v6640_v46  ;;  %v773_v22 = vld [vmem:[#allocation2 + $0xa40] sm:$0xff]  ;;  %v6926_v25 = vcombine.high %v765_v11, %v769_v12  ;;  %v6925_v27 = vcombine.low %v765_v11, %v769_v12  ;;  %v566_v11 = vld [vmem:[#allocation2 + $0x3c8] sm:$0xff] }
 0x125   : > { %3289 = vmatpush1.bf16.msra.mxu0 %v6885_v45  ;;  %v777_v23 = vld [vmem:[#allocation2 + $0xa60] sm:$0xff] }
 0x126   : > { %3290 = vmatprep.subr.bf16.mxu0 %v6894_v50  ;;  %v781_v29 = vld [vmem:[#allocation2 + $0xa80] sm:$0xff]  ;;  %v6934_v32 = vcombine.high %v773_v22, %v777_v23  ;;  %v6933_v35 = vcombine.low %v773_v22, %v777_v23  ;;  %v6695_v50 = vcombine.low %v534_v39, %v538_v41  ;;  %v574_v22 = vld [vmem:[#allocation2 + $0x408] sm:$0xff] }
 0x127   : > { %3373 = vmatpush1.bf16.msra.mxu1 %v6639_v52  ;;  %v785_v30 = vld [vmem:[#allocation2 + $0xaa0] sm:$0xff]  ;;  %v6704_v52 = vcombine.high %v542_v47, %v546_v49 }
 0x128   : > { %3374 = vmatprep.subr.bf16.mxu1 %v6648_v56  ;;  %v789_v37 = vld [vmem:[#allocation2 + $0xac0] sm:$0xff]  ;;  %v6942_v40 = vcombine.high %v781_v29, %v785_v30  ;;  %v6941_v43 = vcombine.low %v781_v29, %v785_v30  ;;  %v582_v29 = vld [vmem:[#allocation2 + $0x448] sm:$0xff] }
 0x129   : > { %3291 = vmatpush1.bf16.msra.mxu0 %v6893_v55  ;;  %v793_v38 = vld [vmem:[#allocation2 + $0xae0] sm:$0xff]  ;;  %v6743_v41 = vcombine.low %v582_v29, %v586_v31 }
 0x12a   : > { %3292 = vmatprep.subr.bf16.mxu0 %v6902_v62  ;;  %v797_v45 = vld [vmem:[#allocation2 + $0xb00] sm:$0xff]  ;;  %v6950_v48 = vcombine.high %v789_v37, %v793_v38  ;;  %v6949_v51 = vcombine.low %v789_v37, %v793_v38  ;;  %v6703_v62 = vcombine.low %v542_v47, %v546_v49  ;;  %v590_v38 = vld [vmem:[#allocation2 + $0x488] sm:$0xff] }
 0x12b   : > { %3375 = vmatpush1.bf16.msra.mxu1 %v6647_v0  ;;  %v801_v46 = vld [vmem:[#allocation2 + $0xb20] sm:$0xff]  ;;  %v6712_v0 = vcombine.high %v550_v57, %v554_v60  ;;  %v602_v47 = vld [vmem:[#allocation2 + $0x4e8] sm:$0xff] }
 0x12c   : > { %3376 = vmatprep.subr.bf16.mxu1 %v6656_v2  ;;  %v805_v55 = vld [vmem:[#allocation2 + $0xb40] sm:$0xff]  ;;  %v6958_v59 = vcombine.high %v797_v45, %v801_v46  ;;  %v6957_v63 = vcombine.low %v797_v45, %v801_v46  ;;  %v598_v45 = vld [vmem:[#allocation2 + $0x4c8] sm:$0xff] }
 0x12d   : > { %3293 = vmatpush1.bf16.msra.mxu0 %v6901_v1  ;;  %v809_v56 = vld [vmem:[#allocation2 + $0xb60] sm:$0xff] }
 0x12e   : > { %3294 = vmatprep.subr.bf16.mxu0 %v6910_v6  ;;  %v813_v1 = vld [vmem:[#allocation2 + $0xb80] sm:$0xff]  ;;  %v6966_v4 = vcombine.high %v805_v55, %v809_v56  ;;  %v6711_v6 = vcombine.low %v550_v57, %v554_v60  ;;  %v6965_v7 = vcombine.low %v805_v55, %v809_v56  ;;  %v606_v56 = vld [vmem:[#allocation2 + $0x508] sm:$0xff]  ;;  %v6759_v60 = vcombine.low %v598_v45, %v602_v47 }
 0x12f   : > { %3377 = vmatpush1.bf16.msra.mxu1 %v6655_v8  ;;  %v817_v2 = vld [vmem:[#allocation2 + $0xba0] sm:$0xff]  ;;  %v6720_v8 = vcombine.high %v558_v3, %v562_v5 }
 0x130   : > { %3378 = vmatprep.subr.bf16.mxu1 %v6664_v10  ;;  %v825_v10 = vld [vmem:[#allocation2 + $0xbe0] sm:$0xff]  ;;  %v6974_v12 = vcombine.high %v813_v1, %v817_v2  ;;  %v6973_v15 = vcombine.low %v813_v1, %v817_v2  ;;  %v614_v2 = vld [vmem:[#allocation2 + $0x548] sm:$0xff] }
 0x131   : > { %3295 = vmatpush1.bf16.msra.mxu0 %v6909_v9  ;;  %v821_v9 = vld [vmem:[#allocation2 + $0xbc0] sm:$0xff] }
 0x132   : > { %3296 = vmatprep.subr.bf16.mxu0 %v6918_v14  ;;  %v6719_v14 = vcombine.low %v558_v3, %v562_v5  ;;  %v6982_v23 = vcombine.high %v821_v9, %v825_v10  ;;  %v6981_v26 = vcombine.low %v821_v9, %v825_v10  ;;  %v849_v37 = vld [vmem:[#allocation2 + $0xca0] sm:$0xff]  ;;  %v622_v10 = vld [vmem:[#allocation2 + $0x588] sm:$0xff] }
 0x133   : > { %3379 = vmatpush1.bf16.msra.mxu1 %v6663_v17  ;;  %v6728_v17 = vcombine.high %v566_v11, %v570_v13  ;;  %v865_v55 = vld [vmem:[#allocation2 + $0xd20] sm:$0xff] }
 0x134   : > { %3380 = vmatprep.subr.bf16.mxu1 %v6672_v20  ;;  %v833_v20 = vld [vmem:[#allocation2 + $0xc20] sm:$0xff] }
 0x135   : > { %3297 = vmatpush1.bf16.msra.mxu0 %v6917_v18  ;;  %v829_v18 = vld [vmem:[#allocation2 + $0xc00] sm:$0xff] }
 0x136   : > { %3298 = vmatprep.subr.bf16.mxu0 %v6926_v25  ;;  %v6727_v25 = vcombine.low %v566_v11, %v570_v13  ;;  %v6990_v30 = vcombine.high %v829_v18, %v833_v20  ;;  %v873_v1 = vld [vmem:[#allocation2 + $0xd60] sm:$0xff] }
 0x137   : > { %3381 = vmatpush1.bf16.msra.mxu1 %v6671_v53  ;;  %v6736_v53 = vcombine.high %v574_v22, %v578_v24  ;;  %v881_v9 = vld [vmem:[#allocation2 + $0xda0] sm:$0xff] }
 0x138   : > { %3382 = vmatprep.subr.bf16.mxu1 %v6680_v54  ;;  %v841_v54 = vld [vmem:[#allocation2 + $0xc60] sm:$0xff] }
 0x139   : > { %3299 = vmatpush1.bf16.msra.mxu0 %v6925_v27  ;;  %v837_v27 = vld [vmem:[#allocation2 + $0xc40] sm:$0xff] }
 0x13a   : > { %3300 = vmatprep.subr.bf16.mxu0 %v6934_v32  ;;  %v6735_v32 = vcombine.low %v574_v22, %v578_v24  ;;  %v6998_v39 = vcombine.high %v837_v27, %v841_v54  ;;  %v630_v22 = vld [vmem:[#allocation2 + $0x5c8] sm:$0xff] }
 0x13b   : > { %3383 = vmatpush1.bf16.msra.mxu1 %v6679_v34  ;;  %v6989_v34 = vcombine.low %v829_v18, %v833_v20  ;;  %v889_v18 = vld [vmem:[#allocation2 + $0xde0] sm:$0xff] }
 0x13c   : > { %3384 = vmatprep.subr.bf16.mxu1 %v6688_v36  ;;  %v845_v36 = vld [vmem:[#allocation2 + $0xc80] sm:$0xff] }
 0x13d   : > { %3301 = vmatpush1.bf16.msra.mxu0 %v6933_v35  ;;  %v6744_v35 = vcombine.high %v582_v29, %v586_v31  ;;  %v7006_v46 = vcombine.high %v845_v36, %v849_v37 }
 0x13e   : > { %3302 = vmatprep.subr.bf16.mxu0 %v6942_v40  ;;  %v594_v40 = vld [vmem:[#allocation2 + $0x4a8] sm:$0xff] }
 0x13f   : > { %3385 = vmatpush1.bf16.msra.mxu1 %v6687_v42  ;;  %v6997_v42 = vcombine.low %v837_v27, %v841_v54  ;;  %v6752_v19 = vcombine.high %v590_v38, %v594_v40  ;;  %v6751_v49 = vcombine.low %v590_v38, %v594_v40  ;;  %v642_v27 = vld [vmem:[#allocation2 + $0x628] sm:$0xff]  ;;  %v447_v54 = vld [vmem:[#allocation2 + $0x10] sm:$0xff]  ;;  %v7607_v38 = vld [vmem:[%s8661_s23 + $0x18] ss:$0 sps:$4 sm:$0xff]  }
 0x140   : > { %3386 = vmatprep.subr.bf16.mxu1 %v6696_v44  ;;  %v857_v44 = vld [vmem:[#allocation2 + $0xce0] sm:$0xff]  ;;  %v459_v40 = vld [vmem:[#allocation2 + $0x70] sm:$0xff] }
 0x141   : > { %3303 = vmatpush1.bf16.msra.mxu0 %v6941_v43  ;;  %v853_v43 = vld [vmem:[#allocation2 + $0xcc0] sm:$0xff] }
 0x142   : > { %3304 = vmatprep.subr.bf16.mxu0 %v6950_v48  ;;  %v8379_v48 = vmov 0   ;;  %v7014_v57 = vcombine.high %v853_v43, %v857_v44 }
 0x143   : > { %3387 = vmatpush1.bf16.msra.mxu1 %v6695_v50  ;;  %v7005_v50 = vcombine.low %v845_v36, %v849_v37  ;;  %v650_v36 = vld [vmem:[#allocation2 + $0x668] sm:$0xff]  ;;  %v455_v37 = vld [vmem:[#allocation2 + $0x50] sm:$0xff] }
 0x144   : > { %3388 = vmatprep.subr.bf16.mxu1 %v6704_v52  ;;  %v861_v52 = vld [vmem:[#allocation2 + $0xd00] sm:$0xff] }
 0x145   : > { %3305 = vmatpush1.bf16.msra.mxu0 %v6949_v51  ;;  %v6760_v51 = vcombine.high %v598_v45, %v602_v47  ;;  %v7022_v3 = vcombine.high %v861_v52, %v865_v55  ;;  %v463_v45 = vld [vmem:[#allocation2 + $0x90] sm:$0xff] }
 0x146   : > { %3306 = vmatprep.subr.bf16.mxu0 %v6958_v59  ;;  %v610_v59 = vld [vmem:[#allocation2 + $0x528] sm:$0xff]  ;;  %v467_v47 = vld [vmem:[#allocation2 + $0xb0] sm:$0xff] }
 0x147   : > { %3389 = vmatpush1.bf16.msra.mxu1 %v6703_v62  ;;  %v7013_v62 = vcombine.low %v853_v43, %v857_v44  ;;  %v6767_v5 = vcombine.low %v606_v56, %v610_v59  ;;  %v654_v43 = vld [vmem:[#allocation2 + $0x688] sm:$0xff] }
 0x148   : > { %3390 = vmatprep.subr.bf16.mxu1 %v6712_v0  ;;  %v869_v0 = vld [vmem:[#allocation2 + $0xd40] sm:$0xff]  ;;  %v658_v44 = vld [vmem:[#allocation2 + $0x6a8] sm:$0xff] }
 0x149   : > { %3307 = vmatpush1.bf16.msra.mxu0 %v6957_v63  ;;  %v6768_v63 = vcombine.high %v606_v56, %v610_v59  ;;  %v7030_v11 = vcombine.high %v869_v0, %v873_v1  ;;  %v471_v56 = vld [vmem:[#allocation2 + $0xd0] sm:$0xff] }
 0x14a   : > { %3308 = vmatprep.subr.bf16.mxu0 %v6966_v4  ;;  %v618_v4 = vld [vmem:[#allocation2 + $0x568] sm:$0xff]  ;;  %v475_v59 = vld [vmem:[#allocation2 + $0xf0] sm:$0xff] }
 0x14b   : > { %3391 = vmatpush1.bf16.msra.mxu1 %v6711_v6  ;;  %v7021_v6 = vcombine.low %v861_v52, %v865_v55  ;;  %v6775_v13 = vcombine.low %v614_v2, %v618_v4  ;;  %v662_v52 = vld [vmem:[#allocation2 + $0x6c8] sm:$0xff] }
 0x14c   : > { %3392 = vmatprep.subr.bf16.mxu1 %v6720_v8  ;;  %v877_v8 = vld [vmem:[#allocation2 + $0xd80] sm:$0xff]  ;;  %v666_v55 = vld [vmem:[#allocation2 + $0x6e8] sm:$0xff] }
 0x14d   : > { %3309 = vmatpush1.bf16.msra.mxu0 %v6965_v7  ;;  %v6776_v7 = vcombine.high %v614_v2, %v618_v4  ;;  %v7038_v20 = vcombine.high %v877_v8, %v881_v9  ;;  %v479_v2 = vld [vmem:[#allocation2 + $0x110] sm:$0xff] }
 0x14e   : > { %3310 = vmatprep.subr.bf16.mxu0 %v6974_v12  ;;  %v626_v12 = vld [vmem:[#allocation2 + $0x5a8] sm:$0xff]  ;;  %v483_v4 = vld [vmem:[#allocation2 + $0x130] sm:$0xff] }
 0x14f   : > { %3393 = vmatpush1.bf16.msra.mxu1 %v6719_v14  ;;  %v7029_v14 = vcombine.low %v869_v0, %v873_v1  ;;  %v6783_v24 = vcombine.low %v622_v10, %v626_v12  ;;  %v670_v0 = vld [vmem:[#allocation2 + $0x708] sm:$0xff] }
 0x150   : > { %3394 = vmatprep.subr.bf16.mxu1 %v6728_v17  ;;  %v885_v17 = vld [vmem:[#allocation2 + $0xdc0] sm:$0xff]  ;;  %v674_v1 = vld [vmem:[#allocation2 + $0x728] sm:$0xff] }
 0x151   : > { %3311 = vmatpush1.bf16.msra.mxu0 %v6973_v15  ;;  %v6784_v15 = vcombine.high %v622_v10, %v626_v12  ;;  %v7046_v29 = vcombine.high %v885_v17, %v889_v18  ;;  %v487_v10 = vld [vmem:[#allocation2 + $0x150] sm:$0xff] }
 0x152   : > { %3312 = vmatprep.subr.bf16.mxu0 %v6982_v23  ;;  %v634_v23 = vld [vmem:[#allocation2 + $0x5e8] sm:$0xff]  ;;  %v491_v12 = vld [vmem:[#allocation2 + $0x170] sm:$0xff] }
 0x153   : > { %3395 = vmatpush1.bf16.msra.mxu1 %v6727_v25  ;;  %v7037_v25 = vcombine.low %v877_v8, %v881_v9  ;;  %v6791_v31 = vcombine.low %v630_v22, %v634_v23  ;;  %v678_v8 = vld [vmem:[#allocation2 + $0x748] sm:$0xff] }
 0x154   : > { %3405 = vmatprep.subr.bf16.mxu1 %v6736_v53  ;;  %v638_v53 = vld [vmem:[#allocation2 + $0x608] sm:$0xff] }
 0x155   : > { %3313 = vmatpush1.bf16.msra.mxu0 %v6981_v26  ;;  %v6792_v26 = vcombine.high %v630_v22, %v634_v23  ;;  %v682_v9 = vld [vmem:[#allocation2 + $0x768] sm:$0xff]  ;;  %v6650_v22 = vcombine.high %v487_v10, %v491_v12  ;;  %v499_v23 = vld [vmem:[#allocation2 + $0x1b0] sm:$0xff] }
 0x156   : > { %3323 = vmatprep.subr.bf16.mxu0 %v6990_v30  ;;  %3397 = vmatmul.mubr.bf16.vlgmr.msra.gmra.mrb[4].mxu1 %v8681_v16  ;;  %v451_v30 = vld [vmem:[#allocation2 + $0x30] sm:$0xff] }
 0x157   : > { %3406 = vmatpush1.bf16.msra.mxu1 %v6735_v32  ;;  %3437 = vmatprep.mubr.bf16.mxu1 %v8675_v61  ;;  %v7045_v32 = vcombine.low %v885_v17, %v889_v18  ;;  %v686_v17 = vld [vmem:[#allocation2 + $0x788] sm:$0xff] }
 0x158   : > { %3315 = vmatmul.mubr.bf16.vlgmr.msra.gmra.mrb[0].mxu0 %v8700_v33  ;;  %3407 = vmatprep.subr.bf16.mxu1 %v6744_v35  ;;  %v646_v35 = vld [vmem:[#allocation2 + $0x648] sm:$0xff] }
 0x159   : > { %3324 = vmatpush1.bf16.msra.mxu0 %v6989_v34  ;;  %3355 = vmatprep.mubr.bf16.mxu0 %v8379_v48  ;;  %v6800_v34 = vcombine.high %v638_v53, %v642_v27  ;;  %v690_v18 = vld [vmem:[#allocation2 + $0x7a8] sm:$0xff] }
 0x15a   : > { %3325 = vmatprep.subr.bf16.mxu0 %v6998_v39  ;;  %v6610_v39 = vcombine.high %v447_v54, %v451_v30 }
 0x15b   : > { %3408 = vmatpush1.bf16.msra.mxu1 %v6743_v41  ;;  %v6799_v41 = vcombine.low %v638_v53, %v642_v27  ;;  %v694_v53 = vld [vmem:[#allocation2 + $0x7c8] sm:$0xff] }
 0x15c   : > { %3409 = vmatprep.subr.bf16.mxu1 %v6752_v19  ;;  %v6808_v19 = vcombine.high %v646_v35, %v650_v36  ;;  %v698_v27 = vld [vmem:[#allocation2 + $0x7e8] sm:$0xff] }
 0x15d   : > { %3326 = vmatpush1.bf16.msra.mxu0 %v6997_v42  ;;  %v6609_v42 = vcombine.low %v447_v54, %v451_v30  ;;  %v503_v54 = vld [vmem:[#allocation2 + $0x1d0] sm:$0xff] }
 0x15e   : > { %3327 = vmatprep.subr.bf16.mxu0 %v7006_v46  ;;  %v6618_v46 = vcombine.high %v455_v37, %v459_v40  ;;  %v507_v30 = vld [vmem:[#allocation2 + $0x1f0] sm:$0xff] }
 0x15f   : > { %3410 = vmatpush1.bf16.msra.mxu1 %v6751_v49  ;;  %v6807_v49 = vcombine.low %v646_v35, %v650_v36  ;;  %v702_v35 = vld [vmem:[#allocation2 + $0x808] sm:$0xff] }
 0x160   : > { %3411 = vmatprep.subr.bf16.mxu1 %v6760_v51  ;;  %v6816_v51 = vcombine.high %v654_v43, %v658_v44  ;;  %v706_v36 = vld [vmem:[#allocation2 + $0x828] sm:$0xff] }
 0x161   : > { %3328 = vmatpush1.bf16.msra.mxu0 %v7005_v50  ;;  %v6617_v50 = vcombine.low %v455_v37, %v459_v40  ;;  %v511_v37 = vld [vmem:[#allocation2 + $0x210] sm:$0xff]  ;;  %v6855_v40 = vcombine.low %v694_v53, %v698_v27 }
 0x162   : > { %3329 = vmatprep.subr.bf16.mxu0 %v7014_v57  ;;  %v6626_v57 = vcombine.high %v463_v45, %v467_v47 }
 0x163   : > { %3412 = vmatpush1.bf16.msra.mxu1 %v6759_v60  ;;  %v6815_v60 = vcombine.low %v654_v43, %v658_v44  ;;  %v714_v43 = vld [vmem:[#allocation2 + $0x868] sm:$0xff]  ;;  %v519_v44 = vld [vmem:[#allocation2 + $0x250] sm:$0xff] }
 0x164   : > { %3413 = vmatprep.subr.bf16.mxu1 %v6768_v63  ;;  %v6824_v63 = vcombine.high %v662_v52, %v666_v55 }
 0x165   : > { %3330 = vmatpush1.bf16.msra.mxu0 %v7013_v62  ;;  %v6625_v62 = vcombine.low %v463_v45, %v467_v47  ;;  %v6863_v47 = vcombine.low %v702_v35, %v706_v36 }
 0x166   : > { %3331 = vmatprep.subr.bf16.mxu0 %v7022_v3  ;;  %v6634_v3 = vcombine.high %v471_v56, %v475_v59 }
 0x167   : > { %3414 = vmatpush1.bf16.msra.mxu1 %v6767_v5  ;;  %v6823_v5 = vcombine.low %v662_v52, %v666_v55  ;;  %v722_v52 = vld [vmem:[#allocation2 + $0x8a8] sm:$0xff]  ;;  %v527_v55 = vld [vmem:[#allocation2 + $0x290] sm:$0xff] }
 0x168   : > { %3415 = vmatprep.subr.bf16.mxu1 %v6776_v7  ;;  %v6832_v7 = vcombine.high %v670_v0, %v674_v1 }
 0x169   : > { %3332 = vmatpush1.bf16.msra.mxu0 %v7021_v6  ;;  %v6633_v6 = vcombine.low %v471_v56, %v475_v59 }
 0x16a   : > { %3333 = vmatprep.subr.bf16.mxu0 %v7030_v11  ;;  %v6642_v11 = vcombine.high %v479_v2, %v483_v4 }
 0x16b   : > { %3416 = vmatpush1.bf16.msra.mxu1 %v6775_v13  ;;  %v6831_v13 = vcombine.low %v670_v0, %v674_v1  ;;  %v730_v0 = vld [vmem:[#allocation2 + $0x8e8] sm:$0xff]  ;;  %v535_v1 = vld [vmem:[#allocation2 + $0x2d0] sm:$0xff] }
 0x16c   : > { %3417 = vmatprep.subr.bf16.mxu1 %v6784_v15  ;;  %v6840_v15 = vcombine.high %v678_v8, %v682_v9 }
 0x16d   : > { %3334 = vmatpush1.bf16.msra.mxu0 %v7029_v14  ;;  %v6641_v14 = vcombine.low %v479_v2, %v483_v4 }
 0x16e   : > { %3335 = vmatprep.subr.bf16.mxu0 %v7038_v20  ;;  %v495_v20 = vld [vmem:[#allocation2 + $0x190] sm:$0xff] }
 0x16f   : > { %3418 = vmatpush1.bf16.msra.mxu1 %v6783_v24  ;;  %v6839_v24 = vcombine.low %v678_v8, %v682_v9  ;;  %v738_v8 = vld [vmem:[#allocation2 + $0x928] sm:$0xff]  ;;  %v543_v9 = vld [vmem:[#allocation2 + $0x310] sm:$0xff] }
 0x170   : > { %3419 = vmatprep.subr.bf16.mxu1 %v6792_v26  ;;  %v6848_v26 = vcombine.high %v686_v17, %v690_v18 }
 0x171   : > { %3336 = vmatpush1.bf16.msra.mxu0 %v7037_v25  ;;  %v6649_v25 = vcombine.low %v487_v10, %v491_v12 }
 0x172   : > { %3337 = vmatprep.subr.bf16.mxu0 %v7046_v29  ;;  %v6658_v29 = vcombine.high %v495_v20, %v499_v23 }
 0x173   : > { %3420 = vmatpush1.bf16.msra.mxu1 %v6791_v31  ;;  %v6847_v31 = vcombine.low %v686_v17, %v690_v18  ;;  %v746_v17 = vld [vmem:[#allocation2 + $0x968] sm:$0xff]  ;;  %v551_v18 = vld [vmem:[#allocation2 + $0x350] sm:$0xff] }
 0x174   : > { %3421 = vmatprep.subr.bf16.mxu1 %v6800_v34  ;;  %v6856_v34 = vcombine.high %v694_v53, %v698_v27  ;;  %v754_v53 = vld [vmem:[#allocation2 + $0x9a8] sm:$0xff]  ;;  %v559_v27 = vld [vmem:[#allocation2 + $0x390] sm:$0xff] }
 0x175   : > { %3338 = vmatpush1.bf16.msra.mxu0 %v7045_v32  ;;  %v6657_v32 = vcombine.low %v495_v20, %v499_v23 }
 0x176   : > { %3528 = vmatprep.subr.bf16.mxu0 %v6610_v39  ;;  %v515_v39 = vld [vmem:[#allocation2 + $0x230] sm:$0xff] }
 0x177   : > { %3422 = vmatpush1.bf16.msra.mxu1 %v6799_v41  ;;  %v6665_v41 = vcombine.low %v503_v54, %v507_v30  ;;  %v6674_v45 = vcombine.high %v511_v37, %v515_v39 }
 0x178   : > { %3356 = vmatmul.mubr.bf16.vlgmr.msra.gmra.mrb[0].mxu0 %v7607_v38  ;;  %3423 = vmatprep.subr.bf16.mxu1 %v6808_v19  ;;  %v6666_v38 = vcombine.high %v503_v54, %v507_v30  ;;  %v710_v19 = vld [vmem:[#allocation2 + $0x848] sm:$0xff] }
 0x179   : > { %3529 = vmatpush1.bf16.msra.mxu0 %v6609_v42  ;;  %3560 = vmatprep.mubr.bf16.mxu0 %v8671_v58  ;;  %v6864_v42 = vcombine.high %v702_v35, %v706_v36  ;;  %v6871_v59 = vcombine.low %v710_v19, %v714_v43  ;;  %v762_v35 = vld [vmem:[#allocation2 + $0x9e8] sm:$0xff]  ;;  %v567_v36 = vld [vmem:[#allocation2 + $0x3d0] sm:$0xff] }
 0x17a   : > { %3530 = vmatprep.subr.bf16.mxu0 %v6618_v46  ;;  %v523_v46 = vld [vmem:[#allocation2 + $0x270] sm:$0xff] }
 0x17b   : > { %3424 = vmatpush1.bf16.msra.mxu1 %v6807_v49  ;;  %v6673_v49 = vcombine.low %v511_v37, %v515_v39  ;;  %v6682_v56 = vcombine.high %v519_v44, %v523_v46 }
 0x17c   : > { %3425 = vmatprep.subr.bf16.mxu1 %v6816_v51  ;;  %v718_v51 = vld [vmem:[#allocation2 + $0x888] sm:$0xff] }
 0x17d   : > { %3531 = vmatpush1.bf16.msra.mxu0 %v6617_v50  ;;  %v6872_v50 = vcombine.high %v710_v19, %v714_v43  ;;  %v6879_v4 = vcombine.low %v718_v51, %v722_v52  ;;  %v770_v19 = vld [vmem:[#allocation2 + $0xa28] sm:$0xff]  ;;  %v575_v43 = vld [vmem:[#allocation2 + $0x410] sm:$0xff] }
 0x17e   : > { %3532 = vmatprep.subr.bf16.mxu0 %v6626_v57  ;;  %v531_v57 = vld [vmem:[#allocation2 + $0x2b0] sm:$0xff] }
 0x17f   : > { %3426 = vmatpush1.bf16.msra.mxu1 %v6815_v60  ;;  %v6681_v60 = vcombine.low %v519_v44, %v523_v46  ;;  %v6690_v2 = vcombine.high %v527_v55, %v531_v57 }
 0x180   : > { %3427 = vmatprep.subr.bf16.mxu1 %v6824_v63  ;;  %v726_v63 = vld [vmem:[#allocation2 + $0x8c8] sm:$0xff] }
 0x181   : > { %3533 = vmatpush1.bf16.msra.mxu0 %v6625_v62  ;;  %v6880_v62 = vcombine.high %v718_v51, %v722_v52  ;;  %v6887_v12 = vcombine.low %v726_v63, %v730_v0  ;;  %v778_v51 = vld [vmem:[#allocation2 + $0xa68] sm:$0xff]  ;;  %v583_v52 = vld [vmem:[#allocation2 + $0x450] sm:$0xff] }
 0x182   : > { %3534 = vmatprep.subr.bf16.mxu0 %v6634_v3  ;;  %v539_v3 = vld [vmem:[#allocation2 + $0x2f0] sm:$0xff] }
 0x183   : > { %3428 = vmatpush1.bf16.msra.mxu1 %v6823_v5  ;;  %v6689_v5 = vcombine.low %v527_v55, %v531_v57  ;;  %v6698_v10 = vcombine.high %v535_v1, %v539_v3 }
 0x184   : > { %3429 = vmatprep.subr.bf16.mxu1 %v6832_v7  ;;  %v734_v7 = vld [vmem:[#allocation2 + $0x908] sm:$0xff] }
 0x185   : > { %3535 = vmatpush1.bf16.msra.mxu0 %v6633_v6  ;;  %v6888_v6 = vcombine.high %v726_v63, %v730_v0  ;;  %v6895_v23 = vcombine.low %v734_v7, %v738_v8  ;;  %v786_v63 = vld [vmem:[#allocation2 + $0xaa8] sm:$0xff]  ;;  %v591_v0 = vld [vmem:[#allocation2 + $0x490] sm:$0xff] }
 0x186   : > { %3536 = vmatprep.subr.bf16.mxu0 %v6642_v11  ;;  %v547_v11 = vld [vmem:[#allocation2 + $0x330] sm:$0xff] }
 0x187   : > { %3430 = vmatpush1.bf16.msra.mxu1 %v6831_v13  ;;  %v6697_v13 = vcombine.low %v535_v1, %v539_v3  ;;  %v6706_v20 = vcombine.high %v543_v9, %v547_v11 }
 0x188   : > { %3431 = vmatprep.subr.bf16.mxu1 %v6840_v15  ;;  %v742_v15 = vld [vmem:[#allocation2 + $0x948] sm:$0xff] }
 0x189   : > { %3537 = vmatpush1.bf16.msra.mxu0 %v6641_v14  ;;  %v6896_v14 = vcombine.high %v734_v7, %v738_v8  ;;  %v6903_v30 = vcombine.low %v742_v15, %v746_v17  ;;  %v794_v7 = vld [vmem:[#allocation2 + $0xae8] sm:$0xff]  ;;  %v599_v8 = vld [vmem:[#allocation2 + $0x4d0] sm:$0xff] }
 0x18a   : > { %3538 = vmatprep.subr.bf16.mxu0 %v6650_v22  ;;  %v555_v22 = vld [vmem:[#allocation2 + $0x370] sm:$0xff] }
 0x18b   : > { %3432 = vmatpush1.bf16.msra.mxu1 %v6839_v24  ;;  %v6705_v24 = vcombine.low %v543_v9, %v547_v11  ;;  %v6714_v54 = vcombine.high %v551_v18, %v555_v22 }
 0x18c   : > { %3433 = vmatprep.subr.bf16.mxu1 %v6848_v26  ;;  %v750_v26 = vld [vmem:[#allocation2 + $0x988] sm:$0xff] }
 0x18d   : > { %3539 = vmatpush1.bf16.msra.mxu0 %v6649_v25  ;;  %v6904_v25 = vcombine.high %v742_v15, %v746_v17  ;;  %v6911_v39 = vcombine.low %v750_v26, %v754_v53  ;;  %v802_v15 = vld [vmem:[#allocation2 + $0xb28] sm:$0xff]  ;;  %v607_v17 = vld [vmem:[#allocation2 + $0x510] sm:$0xff] }
 0x18e   : > { %3540 = vmatprep.subr.bf16.mxu0 %v6658_v29  ;;  %v563_v29 = vld [vmem:[#allocation2 + $0x3b0] sm:$0xff] }
 0x18f   : > { %3434 = vmatpush1.bf16.msra.mxu1 %v6847_v31  ;;  %v6713_v31 = vcombine.low %v551_v18, %v555_v22  ;;  %v6722_v37 = vcombine.high %v559_v27, %v563_v29 }
 0x190   : > { %3435 = vmatprep.subr.bf16.mxu1 %v6856_v34  ;;  %v758_v34 = vld [vmem:[#allocation2 + $0x9c8] sm:$0xff] }
 0x191   : > { %3541 = vmatpush1.bf16.msra.mxu0 %v6657_v32  ;;  %v6912_v32 = vcombine.high %v750_v26, %v754_v53  ;;  %v6919_v46 = vcombine.low %v758_v34, %v762_v35  ;;  %v810_v26 = vld [vmem:[#allocation2 + $0xb68] sm:$0xff]  ;;  %v615_v53 = vld [vmem:[#allocation2 + $0x550] sm:$0xff] }
 0x192   : > { %3542 = vmatprep.subr.bf16.mxu0 %v6666_v38  ;;  %v571_v38 = vld [vmem:[#allocation2 + $0x3f0] sm:$0xff] }
 0x193   : > { %3436 = vmatpush1.bf16.msra.mxu1 %v6855_v40  ;;  %v6721_v40 = vcombine.low %v559_v27, %v563_v29  ;;  %v6730_v44 = vcombine.high %v567_v36, %v571_v38 }
 0x194   : > { %3446 = vmatprep.subr.bf16.mxu1 %v6864_v42  ;;  %v766_v42 = vld [vmem:[#allocation2 + $0xa08] sm:$0xff] }
 0x195   : > { %3543 = vmatpush1.bf16.msra.mxu0 %v6665_v41  ;;  %v6920_v41 = vcombine.high %v758_v34, %v762_v35  ;;  %v6927_v57 = vcombine.low %v766_v42, %v770_v19  ;;  %v818_v35 = vld [vmem:[#allocation2 + $0xba8] sm:$0xff] }
 0x196   : > { %3544 = vmatprep.subr.bf16.mxu0 %v6674_v45  ;;  %3438 = vmatmul.mubr.bf16.vlgmr.msra.gmra.mrb[4].mxu1 %v8688_v21  ;;  %v579_v45 = vld [vmem:[#allocation2 + $0x430] sm:$0xff] }
 0x197   : > { %3447 = vmatpush1.bf16.msra.mxu1 %v6863_v47  ;;  %3478 = vmatprep.mubr.bf16.mxu1 %v8692_v28  ;;  %v6729_v47 = vcombine.low %v567_v36, %v571_v38  ;;  %v6738_v55 = vcombine.high %v575_v43, %v579_v45  ;;  %v623_v36 = vld [vmem:[#allocation2 + $0x590] sm:$0xff] }
 0x198   : > { %3448 = vmatprep.subr.bf16.mxu1 %v6872_v50  ;;  %v774_v50 = vld [vmem:[#allocation2 + $0xa48] sm:$0xff] }
 0x199   : > { %3545 = vmatpush1.bf16.msra.mxu0 %v6673_v49  ;;  %v6928_v49 = vcombine.high %v766_v42, %v770_v19  ;;  %v6935_v3 = vcombine.low %v774_v50, %v778_v51  ;;  %v822_v42 = vld [vmem:[#allocation2 + $0xbc8] sm:$0xff] }
 0x19a   : > { %3546 = vmatprep.subr.bf16.mxu0 %v6682_v56  ;;  %v587_v56 = vld [vmem:[#allocation2 + $0x470] sm:$0xff]  ;;  %v826_v19 = vld [vmem:[#allocation2 + $0xbe8] sm:$0xff] }
 0x19b   : > { %3449 = vmatpush1.bf16.msra.mxu1 %v6871_v59  ;;  %v6737_v59 = vcombine.low %v575_v43, %v579_v45  ;;  %v6746_v1 = vcombine.high %v583_v52, %v587_v56  ;;  %v631_v43 = vld [vmem:[#allocation2 + $0x5d0] sm:$0xff] }
 0x19c   : > { %3450 = vmatprep.subr.bf16.mxu1 %v6880_v62  ;;  %v782_v62 = vld [vmem:[#allocation2 + $0xa88] sm:$0xff] }
 0x19d   : > { %3547 = vmatpush1.bf16.msra.mxu0 %v6681_v60  ;;  %v6936_v60 = vcombine.high %v774_v50, %v778_v51  ;;  %v6943_v11 = vcombine.low %v782_v62, %v786_v63  ;;  %v830_v50 = vld [vmem:[#allocation2 + $0xc08] sm:$0xff] }
 0x19e   : > { %3548 = vmatprep.subr.bf16.mxu0 %v6690_v2  ;;  %v595_v2 = vld [vmem:[#allocation2 + $0x4b0] sm:$0xff]  ;;  %v834_v51 = vld [vmem:[#allocation2 + $0xc28] sm:$0xff] }
 0x19f   : > { %3451 = vmatpush1.bf16.msra.mxu1 %v6879_v4  ;;  %v6745_v4 = vcombine.low %v583_v52, %v587_v56  ;;  %v6754_v9 = vcombine.high %v591_v0, %v595_v2  ;;  %v639_v52 = vld [vmem:[#allocation2 + $0x610] sm:$0xff]  ;;  %v6983_v56 = vcombine.low %v822_v42, %v826_v19 }
 0x1a0   : > { %3452 = vmatprep.subr.bf16.mxu1 %v6888_v6  ;;  %v790_v6 = vld [vmem:[#allocation2 + $0xac8] sm:$0xff] }
 0x1a1   : > { %3549 = vmatpush1.bf16.msra.mxu0 %v6689_v5  ;;  %v6944_v5 = vcombine.high %v782_v62, %v786_v63  ;;  %v6951_v22 = vcombine.low %v790_v6, %v794_v7  ;;  %v838_v62 = vld [vmem:[#allocation2 + $0xc48] sm:$0xff] }
 0x1a2   : > { %3550 = vmatprep.subr.bf16.mxu0 %v6698_v10  ;;  %v603_v10 = vld [vmem:[#allocation2 + $0x4f0] sm:$0xff]  ;;  %v842_v63 = vld [vmem:[#allocation2 + $0xc68] sm:$0xff] }
 0x1a3   : > { %3453 = vmatpush1.bf16.msra.mxu1 %v6887_v12  ;;  %v6753_v12 = vcombine.low %v591_v0, %v595_v2  ;;  %v6762_v18 = vcombine.high %v599_v8, %v603_v10  ;;  %v647_v0 = vld [vmem:[#allocation2 + $0x650] sm:$0xff]  ;;  %v6991_v2 = vcombine.low %v830_v50, %v834_v51 }
 0x1a4   : > { %3454 = vmatprep.subr.bf16.mxu1 %v6896_v14  ;;  %v798_v14 = vld [vmem:[#allocation2 + $0xb08] sm:$0xff] }
 0x1a5   : > { %3551 = vmatpush1.bf16.msra.mxu0 %v6697_v13  ;;  %v6952_v13 = vcombine.high %v790_v6, %v794_v7  ;;  %v6959_v29 = vcombine.low %v798_v14, %v802_v15  ;;  %v846_v6 = vld [vmem:[#allocation2 + $0xc88] sm:$0xff] }
 0x1a6   : > { %3552 = vmatprep.subr.bf16.mxu0 %v6706_v20  ;;  %v611_v20 = vld [vmem:[#allocation2 + $0x530] sm:$0xff]  ;;  %v850_v7 = vld [vmem:[#allocation2 + $0xca8] sm:$0xff] }
 0x1a7   : > { %3455 = vmatpush1.bf16.msra.mxu1 %v6895_v23  ;;  %v6761_v23 = vcombine.low %v599_v8, %v603_v10  ;;  %v6770_v27 = vcombine.high %v607_v17, %v611_v20  ;;  %v655_v8 = vld [vmem:[#allocation2 + $0x690] sm:$0xff]  ;;  %v6999_v10 = vcombine.low %v838_v62, %v842_v63 }
 0x1a8   : > { %3456 = vmatprep.subr.bf16.mxu1 %v6904_v25  ;;  %v806_v25 = vld [vmem:[#allocation2 + $0xb48] sm:$0xff] }
 0x1a9   : > { %3553 = vmatpush1.bf16.msra.mxu0 %v6705_v24  ;;  %v6960_v24 = vcombine.high %v798_v14, %v802_v15  ;;  %v6967_v38 = vcombine.low %v806_v25, %v810_v26  ;;  %v854_v14 = vld [vmem:[#allocation2 + $0xcc8] sm:$0xff] }
 0x1aa   : > { %3554 = vmatprep.subr.bf16.mxu0 %v6714_v54  ;;  %v619_v54 = vld [vmem:[#allocation2 + $0x570] sm:$0xff]  ;;  %v858_v15 = vld [vmem:[#allocation2 + $0xce8] sm:$0xff] }
 0x1ab   : > { %3457 = vmatpush1.bf16.msra.mxu1 %v6903_v30  ;;  %v6769_v30 = vcombine.low %v607_v17, %v611_v20  ;;  %v6778_v34 = vcombine.high %v615_v53, %v619_v54  ;;  %v663_v17 = vld [vmem:[#allocation2 + $0x6d0] sm:$0xff]  ;;  %v7007_v20 = vcombine.low %v846_v6, %v850_v7 }
 0x1ac   : > { %3458 = vmatprep.subr.bf16.mxu1 %v6912_v32  ;;  %v814_v32 = vld [vmem:[#allocation2 + $0xb88] sm:$0xff] }
 0x1ad   : > { %3555 = vmatpush1.bf16.msra.mxu0 %v6713_v31  ;;  %v6968_v31 = vcombine.high %v806_v25, %v810_v26  ;;  %v6975_v45 = vcombine.low %v814_v32, %v818_v35  ;;  %v862_v25 = vld [vmem:[#allocation2 + $0xd08] sm:$0xff] }
 0x1ae   : > { %3556 = vmatprep.subr.bf16.mxu0 %v6722_v37  ;;  %v627_v37 = vld [vmem:[#allocation2 + $0x5b0] sm:$0xff]  ;;  %v866_v26 = vld [vmem:[#allocation2 + $0xd28] sm:$0xff] }
 0x1af   : > { %3459 = vmatpush1.bf16.msra.mxu1 %v6911_v39  ;;  %v6777_v39 = vcombine.low %v615_v53, %v619_v54  ;;  %v671_v53 = vld [vmem:[#allocation2 + $0x710] sm:$0xff]  ;;  %v7015_v54 = vcombine.low %v854_v14, %v858_v15 }
 0x1b0   : > { %3460 = vmatprep.subr.bf16.mxu1 %v6920_v41  ;;  %v6786_v41 = vcombine.high %v623_v36, %v627_v37 }
 0x1b1   : > { %3557 = vmatpush1.bf16.msra.mxu0 %v6721_v40  ;;  %v6976_v40 = vcombine.high %v814_v32, %v818_v35  ;;  %v870_v32 = vld [vmem:[#allocation2 + $0xd48] sm:$0xff]  ;;  %v679_v35 = vld [vmem:[#allocation2 + $0x750] sm:$0xff] }
 0x1b2   : > { %3558 = vmatprep.subr.bf16.mxu0 %v6730_v44  ;;  %v635_v44 = vld [vmem:[#allocation2 + $0x5f0] sm:$0xff] }
 0x1b3   : > { %3461 = vmatpush1.bf16.msra.mxu1 %v6919_v46  ;;  %v6785_v46 = vcombine.low %v623_v36, %v627_v37  ;;  %v683_v36 = vld [vmem:[#allocation2 + $0x770] sm:$0xff]  ;;  %v7023_v37 = vcombine.low %v862_v25, %v866_v26 }
 0x1b4   : > { %3462 = vmatprep.subr.bf16.mxu1 %v6928_v49  ;;  %v6794_v49 = vcombine.high %v631_v43, %v635_v44 }
 0x1b5   : > { %3559 = vmatpush1.bf16.msra.mxu0 %v6729_v47  ;;  %v6984_v47 = vcombine.high %v822_v42, %v826_v19  ;;  %v882_v42 = vld [vmem:[#allocation2 + $0xda8] sm:$0xff]  ;;  %v687_v19 = vld [vmem:[#allocation2 + $0x790] sm:$0xff] }
 0x1b6   : > { %3569 = vmatprep.subr.bf16.mxu0 %v6738_v55  ;;  %v643_v55 = vld [vmem:[#allocation2 + $0x630] sm:$0xff] }
 0x1b7   : > { %3463 = vmatpush1.bf16.msra.mxu1 %v6927_v57  ;;  %v6793_v57 = vcombine.low %v631_v43, %v635_v44  ;;  %v691_v43 = vld [vmem:[#allocation2 + $0x7b0] sm:$0xff] }
 0x1b8   : > { %3561 = vmatmul.mubr.bf16.vlgmr.msra.gmra.mrb[4].mxu0 %v8681_v16  ;;  %3464 = vmatprep.subr.bf16.mxu1 %v6936_v60  ;;  %v6802_v60 = vcombine.high %v639_v52, %v643_v55 }
 0x1b9   : > { %3570 = vmatpush1.bf16.msra.mxu0 %v6737_v59  ;;  %3601 = vmatprep.mubr.bf16.mxu0 %v8675_v61  ;;  %v6992_v59 = vcombine.high %v830_v50, %v834_v51  ;;  %v886_v50 = vld [vmem:[#allocation2 + $0xdc8] sm:$0xff] }
 0x1ba   : > { %3571 = vmatprep.subr.bf16.mxu0 %v6746_v1  ;;  %v651_v1 = vld [vmem:[#allocation2 + $0x670] sm:$0xff]  ;;  %v890_v51 = vld [vmem:[#allocation2 + $0xde8] sm:$0xff] }
 0x1bb   : > { %3465 = vmatpush1.bf16.msra.mxu1 %v6935_v3  ;;  %v6801_v3 = vcombine.low %v639_v52, %v643_v55  ;;  %v695_v55 = vld [vmem:[#allocation2 + $0x7d0] sm:$0xff] }
 0x1bc   : > { %3466 = vmatprep.subr.bf16.mxu1 %v6944_v5  ;;  %v6810_v5 = vcombine.high %v647_v0, %v651_v1 }
 0x1bd   : > { %3572 = vmatpush1.bf16.msra.mxu0 %v6745_v4  ;;  %v7000_v4 = vcombine.high %v838_v62, %v842_v63  ;;  %v6849_v62 = vcombine.low %v687_v19, %v691_v43  ;;  %v7048_v63 = vcombine.high %v886_v50, %v890_v51 }
 0x1be   : > { %3573 = vmatprep.subr.bf16.mxu0 %v6754_v9  ;;  %v659_v9 = vld [vmem:[#allocation2 + $0x6b0] sm:$0xff] }
 0x1bf   : > { %3467 = vmatpush1.bf16.msra.mxu1 %v6943_v11  ;;  %v6809_v11 = vcombine.low %v647_v0, %v651_v1  ;;  %v448_v1 = vld [vmem:[#allocation2 + $0x18] sm:$0xff] }
 0x1c0   : > { %3468 = vmatprep.subr.bf16.mxu1 %v6952_v13  ;;  %v6818_v13 = vcombine.high %v655_v8, %v659_v9 }
 0x1c1   : > { %3574 = vmatpush1.bf16.msra.mxu0 %v6753_v12  ;;  %v7008_v12 = vcombine.high %v846_v6, %v850_v7 }
 0x1c2   : > { %3575 = vmatprep.subr.bf16.mxu0 %v6762_v18  ;;  %v667_v18 = vld [vmem:[#allocation2 + $0x6f0] sm:$0xff] }
 0x1c3   : > { %3469 = vmatpush1.bf16.msra.mxu1 %v6951_v22  ;;  %v6817_v22 = vcombine.low %v655_v8, %v659_v9  ;;  %v456_v9 = vld [vmem:[#allocation2 + $0x58] sm:$0xff] }
 0x1c4   : > { %3470 = vmatprep.subr.bf16.mxu1 %v6960_v24  ;;  %v6826_v24 = vcombine.high %v663_v17, %v667_v18 }
 0x1c5   : > { %3576 = vmatpush1.bf16.msra.mxu0 %v6761_v23  ;;  %v7016_v23 = vcombine.high %v854_v14, %v858_v15 }
 0x1c6   : > { %3577 = vmatprep.subr.bf16.mxu0 %v6770_v27  ;;  %v675_v27 = vld [vmem:[#allocation2 + $0x730] sm:$0xff] }
 0x1c7   : > { %3471 = vmatpush1.bf16.msra.mxu1 %v6959_v29  ;;  %v6825_v29 = vcombine.low %v663_v17, %v667_v18  ;;  %v464_v18 = vld [vmem:[#allocation2 + $0x98] sm:$0xff] }
 0x1c8   : > { %3472 = vmatprep.subr.bf16.mxu1 %v6968_v31  ;;  %v6834_v31 = vcombine.high %v671_v53, %v675_v27 }
 0x1c9   : > { %3578 = vmatpush1.bf16.msra.mxu0 %v6769_v30  ;;  %v7024_v30 = vcombine.high %v862_v25, %v866_v26 }
 0x1ca   : > { %3579 = vmatprep.subr.bf16.mxu0 %v6778_v34  ;;  %v874_v34 = vld [vmem:[#allocation2 + $0xd68] sm:$0xff] }
 0x1cb   : > { %3473 = vmatpush1.bf16.msra.mxu1 %v6967_v38  ;;  %v6833_v38 = vcombine.low %v671_v53, %v675_v27  ;;  %v7031_v44 = vcombine.low %v870_v32, %v874_v34 }
 0x1cc   : > { %3474 = vmatprep.subr.bf16.mxu1 %v6976_v40  ;;  %v6842_v40 = vcombine.high %v679_v35, %v683_v36 }
 0x1cd   : > { %3580 = vmatpush1.bf16.msra.mxu0 %v6777_v39  ;;  %v7032_v39 = vcombine.high %v870_v32, %v874_v34 }
 0x1ce   : > { %3581 = vmatprep.subr.bf16.mxu0 %v6786_v41  ;;  %v878_v41 = vld [vmem:[#allocation2 + $0xd88] sm:$0xff] }
 0x1cf   : > { %3475 = vmatpush1.bf16.msra.mxu1 %v6975_v45  ;;  %v6841_v45 = vcombine.low %v679_v35, %v683_v36 }
 0x1d0   : > { %3476 = vmatprep.subr.bf16.mxu1 %v6984_v47 }
 0x1d1   : > { %3582 = vmatpush1.bf16.msra.mxu0 %v6785_v46  ;;  %v7040_v46 = vcombine.high %v878_v41, %v882_v42 }
 0x1d2   : > { %3583 = vmatprep.subr.bf16.mxu0 %v6794_v49  ;;  %v6850_v49 = vcombine.high %v687_v19, %v691_v43  ;;  %v488_v43 = vld [vmem:[#allocation2 + $0x158] sm:$0xff] }
 0x1d3   : > { %3477 = vmatpush1.bf16.msra.mxu1 %v6983_v56  ;;  %v699_v56 = vld [vmem:[#allocation2 + $0x7f0] sm:$0xff] }
 0x1d4   : > { %3487 = vmatprep.subr.bf16.mxu1 %v6992_v59  ;;  %v7039_v59 = vcombine.low %v878_v41, %v882_v42  ;;  %v6858_v0 = vcombine.high %v695_v55, %v699_v56  ;;  %v6857_v6 = vcombine.low %v695_v55, %v699_v56  ;;  %v496_v56 = vld [vmem:[#allocation2 + $0x198] sm:$0xff] }
 0x1d5   : > { %3584 = vmatpush1.bf16.msra.mxu0 %v6793_v57 }
 0x1d6   : > { %3585 = vmatprep.subr.bf16.mxu0 %v6802_v60  ;;  %3479 = vmatmul.mubr.bf16.vlgmr.msra.gmra.mrb[4].mxu1 %v8700_v33 }
 0x1d7   : > { %3488 = vmatpush1.bf16.msra.mxu1 %v6991_v2  ;;  %3519 = vmatprep.mubr.bf16.mxu1 %v8379_v48  ;;  %v452_v2 = vld [vmem:[#allocation2 + $0x38] sm:$0xff] }
 0x1d8   : > { %3489 = vmatprep.subr.bf16.mxu1 %v7000_v4  ;;  %v707_v4 = vld [vmem:[#allocation2 + $0x830] sm:$0xff]  ;;  %v6612_v7 = vcombine.high %v448_v1, %v452_v2 }
 0x1d9   : > { %3586 = vmatpush1.bf16.msra.mxu0 %v6801_v3  ;;  %v703_v3 = vld [vmem:[#allocation2 + $0x810] sm:$0xff] }
 0x1da   : > { %3587 = vmatprep.subr.bf16.mxu0 %v6810_v5  ;;  %v7047_v5 = vcombine.low %v886_v50, %v890_v51  ;;  %v6866_v8 = vcombine.high %v703_v3, %v707_v4  ;;  %v6865_v14 = vcombine.low %v703_v3, %v707_v4  ;;  %v508_v3 = vld [vmem:[#allocation2 + $0x1f8] sm:$0xff]  ;;  %v759_v4 = vld [vmem:[#allocation2 + $0x9d0] sm:$0xff] }
 0x1db   : > { %3490 = vmatpush1.bf16.msra.mxu1 %v6999_v10  ;;  %v460_v10 = vld [vmem:[#allocation2 + $0x78] sm:$0xff] }
 0x1dc   : > { %3491 = vmatprep.subr.bf16.mxu1 %v7008_v12  ;;  %v715_v12 = vld [vmem:[#allocation2 + $0x870] sm:$0xff]  ;;  %v6620_v15 = vcombine.high %v456_v9, %v460_v10  ;;  %v6619_v25 = vcombine.low %v456_v9, %v460_v10  ;;  %v512_v10 = vld [vmem:[#allocation2 + $0x218] sm:$0xff] }
 0x1dd   : > { %3588 = vmatpush1.bf16.msra.mxu0 %v6809_v11  ;;  %v711_v11 = vld [vmem:[#allocation2 + $0x850] sm:$0xff] }
 0x1de   : > { %3589 = vmatprep.subr.bf16.mxu0 %v6818_v13  ;;  %v6611_v13 = vcombine.low %v448_v1, %v452_v2  ;;  %v6874_v17 = vcombine.high %v711_v11, %v715_v12  ;;  %v6873_v26 = vcombine.low %v711_v11, %v715_v12  ;;  %v504_v2 = vld [vmem:[#allocation2 + $0x1d8] sm:$0xff]  ;;  %v767_v12 = vld [vmem:[#allocation2 + $0xa10] sm:$0xff] }
 0x1df   : > { %3492 = vmatpush1.bf16.msra.mxu1 %v7007_v20  ;;  %v468_v20 = vld [vmem:[#allocation2 + $0xb8] sm:$0xff] }
 0x1e0   : > { %3493 = vmatprep.subr.bf16.mxu1 %v7016_v23  ;;  %v719_v23 = vld [vmem:[#allocation2 + $0x890] sm:$0xff]  ;;  %v6628_v53 = vcombine.high %v464_v18, %v468_v20  ;;  %v6627_v32 = vcombine.low %v464_v18, %v468_v20  ;;  %v516_v11 = vld [vmem:[#allocation2 + $0x238] sm:$0xff] }
 0x1e1   : > { %3590 = vmatpush1.bf16.msra.mxu0 %v6817_v22  ;;  %v8719_v22 = vld [vmem:[%s8661_s23 + $0x18] ss:$0 sps:$4 sm:$0xff]  }
 0x1e2   : > { %3591 = vmatprep.subr.bf16.mxu0 %v6826_v24  ;;  %v723_v24 = vld [vmem:[#allocation2 + $0x8b0] sm:$0xff]  ;;  %v520_v20 = vld [vmem:[#allocation2 + $0x258] sm:$0xff] }
 0x1e3   : > { %3494 = vmatpush1.bf16.msra.mxu1 %v7015_v54  ;;  %v6882_v27 = vcombine.high %v719_v23, %v723_v24  ;;  %v472_v54 = vld [vmem:[#allocation2 + $0xd8] sm:$0xff]  ;;  %v6881_v34 = vcombine.low %v719_v23, %v723_v24  ;;  %v775_v24 = vld [vmem:[#allocation2 + $0xa50] sm:$0xff] }
 0x1e4   : > { %3495 = vmatprep.subr.bf16.mxu1 %v7024_v30  ;;  %v727_v30 = vld [vmem:[#allocation2 + $0x8d0] sm:$0xff]  ;;  %v524_v23 = vld [vmem:[#allocation2 + $0x278] sm:$0xff] }
 0x1e5   : > { %3592 = vmatpush1.bf16.msra.mxu0 %v6825_v29  ;;  %v476_v29 = vld [vmem:[#allocation2 + $0xf8] sm:$0xff] }
 0x1e6   : > { %3593 = vmatprep.subr.bf16.mxu0 %v6834_v31  ;;  %v731_v31 = vld [vmem:[#allocation2 + $0x8f0] sm:$0xff]  ;;  %v6636_v35 = vcombine.high %v472_v54, %v476_v29  ;;  %v6635_v41 = vcombine.low %v472_v54, %v476_v29  ;;  %v528_v29 = vld [vmem:[#allocation2 + $0x298] sm:$0xff] }
 0x1e7   : > { %3496 = vmatpush1.bf16.msra.mxu1 %v7023_v37  ;;  %v6890_v36 = vcombine.high %v727_v30, %v731_v31  ;;  %v480_v37 = vld [vmem:[#allocation2 + $0x118] sm:$0xff]  ;;  %v6889_v42 = vcombine.low %v727_v30, %v731_v31  ;;  %v783_v31 = vld [vmem:[#allocation2 + $0xa90] sm:$0xff] }
 0x1e8   : > { %3497 = vmatprep.subr.bf16.mxu1 %v7032_v39  ;;  %v735_v39 = vld [vmem:[#allocation2 + $0x910] sm:$0xff]  ;;  %v532_v30 = vld [vmem:[#allocation2 + $0x2b8] sm:$0xff] }
 0x1e9   : > { %3594 = vmatpush1.bf16.msra.mxu0 %v6833_v38  ;;  %v8714_v47 = vpop.f32.mrb[0].mxu1  ;;  %v484_v38 = vld [vmem:[#allocation2 + $0x138] sm:$0xff] }
 0x1ea   : > { %3595 = vmatprep.subr.bf16.mxu0 %v6842_v40  ;;  %v8716_v52 = vpop.f32.mrb[1].mxu1  ;;  %v739_v40 = vld [vmem:[#allocation2 + $0x930] sm:$0xff]  ;;  %v6644_v19 = vcombine.high %v480_v37, %v484_v38 }
 0x1eb   : > { %v3238_v57 = vpop.f32.mrb[2].mxu1  ;;  %3498 = vmatpush1.bf16.msra.mxu1 %v7031_v44  ;;  %v492_v44 = vld [vmem:[#allocation2 + $0x178] sm:$0xff]  ;;  %v6897_v50 = vcombine.low %v735_v39, %v739_v40 }
 0x1ec   : > { %v3239_v60 = vpop.f32.mrb[3].mxu1  ;;  %3499 = vmatprep.subr.bf16.mxu1 %v7040_v46  ;;  %v747_v46 = vld [vmem:[#allocation2 + $0x970] sm:$0xff]  ;;  %v6652_v51 = vcombine.high %v488_v43, %v492_v44  ;;  %v500_v57 = vld [vmem:[#allocation2 + $0x1b8] sm:$0xff] }
 0x1ed   : > { %3596 = vmatpush1.bf16.msra.mxu0 %v6841_v45  ;;  %v743_v45 = vld [vmem:[#allocation2 + $0x950] sm:$0xff] }
 0x1ee   : > { %3597 = vmatprep.subr.bf16.mxu0 %v6850_v49  ;;  %v6643_v49 = vcombine.low %v480_v37, %v484_v38  ;;  %v6906_v55 = vcombine.high %v743_v45, %v747_v46  ;;  %v755_v60 = vld [vmem:[#allocation2 + $0x9b0] sm:$0xff]  ;;  %v536_v38 = vld [vmem:[#allocation2 + $0x2d8] sm:$0xff] }
 0x1ef   : > { %3500 = vmatpush1.bf16.msra.mxu1 %v7039_v59  ;;  %v751_v59 = vld [vmem:[#allocation2 + $0x990] sm:$0xff] }
 0x1f0   : > { %3501 = vmatprep.subr.bf16.mxu1 %v7048_v63  ;;  %v6905_v63 = vcombine.low %v743_v45, %v747_v46  ;;  %v6914_v1 = vcombine.high %v751_v59, %v755_v60  ;;  %v548_v45 = vld [vmem:[#allocation2 + $0x338] sm:$0xff]  ;;  %v799_v46 = vld [vmem:[#allocation2 + $0xb10] sm:$0xff] }
 0x1f1   : > { %3598 = vmatpush1.bf16.msra.mxu0 %v6849_v62  ;;  %v6651_v62 = vcombine.low %v488_v43, %v492_v44  ;;  %v544_v44 = vld [vmem:[#allocation2 + $0x318] sm:$0xff] }
 0x1f2   : > { %3599 = vmatprep.subr.bf16.mxu0 %v6858_v0  ;;  %v6660_v0 = vcombine.high %v496_v56, %v500_v57 }
 0x1f3   : > { %3502 = vmatpush1.bf16.msra.mxu1 %v7047_v5  ;;  %v763_v5 = vld [vmem:[#allocation2 + $0x9f0] sm:$0xff] }
 0x1f4   : > { %3692 = vmatprep.subr.bf16.mxu1 %v6612_v7  ;;  %v6913_v7 = vcombine.low %v751_v59, %v755_v60  ;;  %v6922_v9 = vcombine.high %v759_v4, %v763_v5  ;;  %v556_v59 = vld [vmem:[#allocation2 + $0x378] sm:$0xff]  ;;  %v807_v60 = vld [vmem:[#allocation2 + $0xb50] sm:$0xff] }
 0x1f5   : > { %3600 = vmatpush1.bf16.msra.mxu0 %v6857_v6  ;;  %v6659_v6 = vcombine.low %v496_v56, %v500_v57  ;;  %v552_v57 = vld [vmem:[#allocation2 + $0x358] sm:$0xff] }
 0x1f6   : > { %3610 = vmatprep.subr.bf16.mxu0 %v6866_v8  ;;  %3520 = vmatmul.mubr.bf16.vlgmr.msra.gmra.mrb[4].mxu1 %v8719_v22  ;;  %v6668_v8 = vcombine.high %v504_v2, %v508_v3 }
 0x1f7   : > { %3693 = vmatpush1.bf16.msra.mxu1 %v6611_v13  ;;  %3724 = vmatprep.mubr.bf16.mxu1 %v8671_v58  ;;  %v6898_v58 = vcombine.high %v735_v39, %v739_v40  ;;  %v771_v13 = vld [vmem:[#allocation2 + $0xa30] sm:$0xff]  ;;  %v540_v39 = vld [vmem:[#allocation2 + $0x2f8] sm:$0xff] }
 0x1f8   : > { %3602 = vmatmul.mubr.bf16.vlgmr.msra.gmra.mrb[4].mxu0 %v8688_v21  ;;  %3694 = vmatprep.subr.bf16.mxu1 %v6620_v15  ;;  %v6921_v15 = vcombine.low %v759_v4, %v763_v5  ;;  %v6930_v18 = vcombine.high %v767_v12, %v771_v13  ;;  %v791_v40 = vld [vmem:[#allocation2 + $0xad0] sm:$0xff]  ;;  %v564_v4 = vld [vmem:[#allocation2 + $0x3b8] sm:$0xff] }
 0x1f9   : > { %3611 = vmatpush1.bf16.msra.mxu0 %v6865_v14  ;;  %3642 = vmatprep.mubr.bf16.mxu0 %v8692_v28  ;;  %v6667_v14 = vcombine.low %v504_v2, %v508_v3  ;;  %v560_v3 = vld [vmem:[#allocation2 + $0x398] sm:$0xff]  ;;  %v815_v5 = vld [vmem:[#allocation2 + $0xb90] sm:$0xff] }
 0x1fa   : > { %3612 = vmatprep.subr.bf16.mxu0 %v6874_v17  ;;  %v6676_v17 = vcombine.high %v512_v10, %v516_v11 }
 0x1fb   : > { %3695 = vmatpush1.bf16.msra.mxu1 %v6619_v25  ;;  %v779_v25 = vld [vmem:[#allocation2 + $0xa70] sm:$0xff] }
 0x1fc   : > { %3696 = vmatprep.subr.bf16.mxu1 %v6628_v53  ;;  %v6929_v53 = vcombine.low %v767_v12, %v771_v13  ;;  %v6938_v54 = vcombine.high %v775_v24, %v779_v25  ;;  %v572_v12 = vld [vmem:[#allocation2 + $0x3f8] sm:$0xff]  ;;  %v823_v13 = vld [vmem:[#allocation2 + $0xbd0] sm:$0xff] }
 0x1fd   : > { %3613 = vmatpush1.bf16.msra.mxu0 %v6873_v26  ;;  %v6675_v26 = vcombine.low %v512_v10, %v516_v11  ;;  %v568_v11 = vld [vmem:[#allocation2 + $0x3d8] sm:$0xff] }
 0x1fe   : > { %3614 = vmatprep.subr.bf16.mxu0 %v6882_v27  ;;  %v6684_v27 = vcombine.high %v520_v20, %v524_v23 }
 0x1ff   : > { %3697 = vmatpush1.bf16.msra.mxu1 %v6627_v32  ;;  %v787_v32 = vld [vmem:[#allocation2 + $0xab0] sm:$0xff] }
 0x200   : > { %3698 = vmatprep.subr.bf16.mxu1 %v6636_v35  ;;  %v6937_v35 = vcombine.low %v775_v24, %v779_v25  ;;  %v6946_v37 = vcombine.high %v783_v31, %v787_v32  ;;  %v580_v24 = vld [vmem:[#allocation2 + $0x438] sm:$0xff]  ;;  %v831_v25 = vld [vmem:[#allocation2 + $0xc10] sm:$0xff] }
 0x201   : > { %3615 = vmatpush1.bf16.msra.mxu0 %v6881_v34  ;;  %v6683_v34 = vcombine.low %v520_v20, %v524_v23  ;;  %v576_v23 = vld [vmem:[#allocation2 + $0x418] sm:$0xff] }
 0x202   : > { %3616 = vmatprep.subr.bf16.mxu0 %v6890_v36  ;;  %v6692_v36 = vcombine.high %v528_v29, %v532_v30 }
 0x203   : > { %3699 = vmatpush1.bf16.msra.mxu1 %v6635_v41  ;;  %v795_v41 = vld [vmem:[#allocation2 + $0xaf0] sm:$0xff] }
 0x204   : > { %3700 = vmatprep.subr.bf16.mxu1 %v6644_v19  ;;  %v6945_v19 = vcombine.low %v783_v31, %v787_v32  ;;  %v6954_v43 = vcombine.high %v791_v40, %v795_v41  ;;  %v588_v31 = vld [vmem:[#allocation2 + $0x478] sm:$0xff]  ;;  %v839_v32 = vld [vmem:[#allocation2 + $0xc50] sm:$0xff] }
 0x205   : > { %3617 = vmatpush1.bf16.msra.mxu0 %v6889_v42  ;;  %v6691_v42 = vcombine.low %v528_v29, %v532_v30  ;;  %v584_v30 = vld [vmem:[#allocation2 + $0x458] sm:$0xff] }
 0x206   : > { %3618 = vmatprep.subr.bf16.mxu0 %v6898_v58  ;;  %v6700_v58 = vcombine.high %v536_v38, %v540_v39 }
 0x207   : > { %3701 = vmatpush1.bf16.msra.mxu1 %v6643_v49  ;;  %v803_v49 = vld [vmem:[#allocation2 + $0xb30] sm:$0xff] }
 0x208   : > { %3702 = vmatprep.subr.bf16.mxu1 %v6652_v51  ;;  %v6953_v51 = vcombine.low %v791_v40, %v795_v41  ;;  %v6962_v56 = vcombine.high %v799_v46, %v803_v49  ;;  %v596_v40 = vld [vmem:[#allocation2 + $0x4b8] sm:$0xff]  ;;  %v847_v41 = vld [vmem:[#allocation2 + $0xc90] sm:$0xff] }
 0x209   : > { %3619 = vmatpush1.bf16.msra.mxu0 %v6897_v50  ;;  %v6699_v50 = vcombine.low %v536_v38, %v540_v39  ;;  %v592_v39 = vld [vmem:[#allocation2 + $0x498] sm:$0xff] }
 0x20a   : > { %3620 = vmatprep.subr.bf16.mxu0 %v6906_v55  ;;  %v6708_v55 = vcombine.high %v544_v44, %v548_v45 }
 0x20b   : > { %3703 = vmatpush1.bf16.msra.mxu1 %v6651_v62  ;;  %v811_v62 = vld [vmem:[#allocation2 + $0xb70] sm:$0xff] }
 0x20c   : > { %3704 = vmatprep.subr.bf16.mxu1 %v6660_v0  ;;  %v6961_v0 = vcombine.low %v799_v46, %v803_v49  ;;  %v6970_v2 = vcombine.high %v807_v60, %v811_v62  ;;  %v600_v46 = vld [vmem:[#allocation2 + $0x4d8] sm:$0xff] }
 0x20d   : > { %3621 = vmatpush1.bf16.msra.mxu0 %v6905_v63  ;;  %v6707_v63 = vcombine.low %v544_v44, %v548_v45  ;;  %v895_v44 = vlaneseq  ;;  %v604_v49 = vld [vmem:[#allocation2 + $0x4f8] sm:$0xff] }
 0x20e   : > { %3622 = vmatprep.subr.bf16.mxu0 %v6914_v1  ;;  %v6716_v1 = vcombine.high %v552_v57, %v556_v59 }
 0x20f   : > { %3705 = vmatpush1.bf16.msra.mxu1 %v6659_v6  ;;  %v819_v6 = vld [vmem:[#allocation2 + $0xbb0] sm:$0xff] }
 0x210   : > { %3706 = vmatprep.subr.bf16.mxu1 %v6668_v8  ;;  %v6969_v8 = vcombine.low %v807_v60, %v811_v62  ;;  %v6978_v10 = vcombine.high %v815_v5, %v819_v6  ;;  %v608_v60 = vld [vmem:[#allocation2 + $0x518] sm:$0xff] }
 0x211   : > { %3623 = vmatpush1.bf16.msra.mxu0 %v6913_v7  ;;  %v6715_v7 = vcombine.low %v552_v57, %v556_v59  ;;  %v8729_v57 = vshrl.u32 %v895_v44, 7  ;;  %v612_v62 = vld [vmem:[#allocation2 + $0x538] sm:$0xff] }
 0x212   : > { %3624 = vmatprep.subr.bf16.mxu0 %v6922_v9  ;;  %v6724_v9 = vcombine.high %v560_v3, %v564_v4 }
 0x213   : > { %3707 = vmatpush1.bf16.msra.mxu1 %v6667_v14  ;;  %v827_v14 = vld [vmem:[#allocation2 + $0xbf0] sm:$0xff] }
 0x214   : > { %3708 = vmatprep.subr.bf16.mxu1 %v6676_v17  ;;  %v6977_v17 = vcombine.low %v815_v5, %v819_v6  ;;  %v6986_v20 = vcombine.high %v823_v13, %v827_v14  ;;  %v616_v5 = vld [vmem:[#allocation2 + $0x558] sm:$0xff] }
 0x215   : > { %3625 = vmatpush1.bf16.msra.mxu0 %v6921_v15  ;;  %v6723_v15 = vcombine.low %v560_v3, %v564_v4  ;;  %v8732_v3 = vsub.s32 0, %v8729_v57  ;;  %v620_v6 = vld [vmem:[#allocation2 + $0x578] sm:$0xff] }
 0x216   : > { %3626 = vmatprep.subr.bf16.mxu0 %v6930_v18  ;;  %v6732_v18 = vcombine.high %v568_v11, %v572_v12 }
 0x217   : > { %3709 = vmatpush1.bf16.msra.mxu1 %v6675_v26  ;;  %v835_v26 = vld [vmem:[#allocation2 + $0xc30] sm:$0xff] }
 0x218   : > { %3710 = vmatprep.subr.bf16.mxu1 %v6684_v27  ;;  %v6985_v27 = vcombine.low %v823_v13, %v827_v14  ;;  %v6994_v29 = vcombine.high %v831_v25, %v835_v26  ;;  %v6780_v13 = vcombine.high %v616_v5, %v620_v6 }
 0x219   : > { %3627 = vmatpush1.bf16.msra.mxu0 %v6929_v53  ;;  %v6731_v53 = vcombine.low %v568_v11, %v572_v12  ;;  %v6771_v11 = vcombine.low %v608_v60, %v612_v62 }
 0x21a   : > { %3628 = vmatprep.subr.bf16.mxu0 %v6938_v54  ;;  %v6740_v54 = vcombine.high %v576_v23, %v580_v24 }
 0x21b   : > { %3711 = vmatpush1.bf16.msra.mxu1 %v6683_v34  ;;  %v843_v34 = vld [vmem:[#allocation2 + $0xc70] sm:$0xff] }
 0x21c   : > { %3712 = vmatprep.subr.bf16.mxu1 %v6692_v36  ;;  %v6993_v36 = vcombine.low %v831_v25, %v835_v26  ;;  %v7002_v38 = vcombine.high %v839_v32, %v843_v34  ;;  %v6779_v25 = vcombine.low %v616_v5, %v620_v6  ;;  %v664_v5 = vld [vmem:[#allocation2 + $0x6d8] sm:$0xff] }
 0x21d   : > { %3629 = vmatpush1.bf16.msra.mxu0 %v6937_v35  ;;  %v6739_v35 = vcombine.low %v576_v23, %v580_v24  ;;  %v879_v23 = vld [vmem:[#allocation2 + $0xd90] sm:$0xff]  ;;  %v668_v6 = vld [vmem:[#allocation2 + $0x6f8] sm:$0xff] }
 0x21e   : > { %3630 = vmatprep.subr.bf16.mxu0 %v6946_v37  ;;  %v6748_v37 = vcombine.high %v584_v30, %v588_v31  ;;  %v883_v24 = vld [vmem:[#allocation2 + $0xdb0] sm:$0xff] }
 0x21f   : > { %3713 = vmatpush1.bf16.msra.mxu1 %v6691_v42  ;;  %v851_v42 = vld [vmem:[#allocation2 + $0xcb0] sm:$0xff] }
 0x220   : > { %3714 = vmatprep.subr.bf16.mxu1 %v6700_v58  ;;  %v7001_v58 = vcombine.low %v839_v32, %v843_v34  ;;  %v7010_v45 = vcombine.high %v847_v41, %v851_v42  ;;  %v887_v34 = vld [vmem:[#allocation2 + $0xdd0] sm:$0xff] }
 0x221   : > { %3631 = vmatpush1.bf16.msra.mxu0 %v6945_v19  ;;  %v6747_v19 = vcombine.low %v584_v30, %v588_v31  ;;  %v636_v30 = vld [vmem:[#allocation2 + $0x5f8] sm:$0xff] }
 0x222   : > { %3632 = vmatprep.subr.bf16.mxu0 %v6954_v43  ;;  %v6756_v43 = vcombine.high %v592_v39, %v596_v40 }
 0x223   : > { %3715 = vmatpush1.bf16.msra.mxu1 %v6699_v50  ;;  %v855_v50 = vld [vmem:[#allocation2 + $0xcd0] sm:$0xff] }
 0x224   : > { %3716 = vmatprep.subr.bf16.mxu1 %v6708_v55  ;;  %v7009_v55 = vcombine.low %v847_v41, %v851_v42  ;;  %v7041_v41 = vcombine.low %v879_v23, %v883_v24 }
 0x225   : > { %3633 = vmatpush1.bf16.msra.mxu0 %v6953_v51  ;;  %v859_v51 = vld [vmem:[#allocation2 + $0xcf0] sm:$0xff] }
 0x226   : > { %3634 = vmatprep.subr.bf16.mxu0 %v6962_v56  ;;  %v6764_v56 = vcombine.high %v600_v46, %v604_v49  ;;  %v7018_v59 = vcombine.high %v855_v50, %v859_v51 }
 0x227   : > { %3717 = vmatpush1.bf16.msra.mxu1 %v6707_v63  ;;  %v863_v63 = vld [vmem:[#allocation2 + $0xd10] sm:$0xff] }
 0x228   : > { %3718 = vmatprep.subr.bf16.mxu1 %v6716_v1  ;;  %v6763_v1 = vcombine.low %v600_v46, %v604_v49  ;;  %v7610_v49 = vld [vmem:[#allocation6 + $0x4] ss:$16 sps:$4 sm:$0xff]  }
 0x229   : > { %3635 = vmatpush1.bf16.msra.mxu0 %v6961_v0  ;;  %v867_v0 = vld [vmem:[#allocation2 + $0xd30] sm:$0xff] }
 0x22a   : > { %3636 = vmatprep.subr.bf16.mxu0 %v6970_v2  ;;  %v7017_v2 = vcombine.low %v855_v50, %v859_v51  ;;  %v7026_v4 = vcombine.high %v863_v63, %v867_v0  ;;  %v7025_v12 = vcombine.low %v863_v63, %v867_v0  ;;  %v648_v51 = vld [vmem:[#allocation2 + $0x658] sm:$0xff] }
 0x22b   : > { %3719 = vmatpush1.bf16.msra.mxu1 %v6715_v7  ;;  %v8734_v7 = vld [vmem:[#allocation4] sm:$0xff]  ;;  %v660_v63 = vld [vmem:[#allocation2 + $0x6b8] sm:$0xff] }
 0x22c   : > { %3720 = vmatprep.subr.bf16.mxu1 %v6724_v9  ;;  %v871_v9 = vld [vmem:[#allocation2 + $0xd50] sm:$0xff]  ;;  %v898_v14 = vrot.slane %v8734_v7, %v8732_v3 }
 0x22d   : > { %3637 = vmatpush1.bf16.msra.mxu0 %v6969_v8  ;;  %v8737_v8 = vsub.s32 1, %v8729_v57 }
 0x22e   : > { %3638 = vmatprep.subr.bf16.mxu0 %v6978_v10  ;;  %v875_v10 = vld [vmem:[#allocation2 + $0xd70] sm:$0xff] }
 0x22f   : > { %3721 = vmatpush1.bf16.msra.mxu1 %v6723_v15  ;;  %v7034_v15 = vcombine.high %v871_v9, %v875_v10  ;;  %v7033_v26 = vcombine.low %v871_v9, %v875_v10  ;;  %v7614_v10 = vld [vmem:[#allocation6 + $0x40] ss:$16 sps:$4 sm:$0xff]  }
 0x230   : > { %3722 = vmatprep.subr.bf16.mxu1 %v6732_v18  ;;  %v628_v18 = vld [vmem:[#allocation2 + $0x5b8] sm:$0xff] }
 0x231   : > { %3639 = vmatpush1.bf16.msra.mxu0 %v6977_v17  ;;  %v624_v17 = vld [vmem:[#allocation2 + $0x598] sm:$0xff] }
 0x232   : > { %3640 = vmatprep.subr.bf16.mxu0 %v6986_v20  ;;  %v902_v20 = vrot.slane %v8734_v7, %v8737_v8 }
 0x233   : > { %3723 = vmatpush1.bf16.msra.mxu1 %v6731_v53  ;;  %v6788_v53 = vcombine.high %v624_v17, %v628_v18 }
 0x234   : > { %3733 = vmatprep.subr.bf16.mxu1 %v6740_v54  ;;  %v7042_v54 = vcombine.high %v879_v23, %v883_v24  ;;  %v3237_v31 = vadd.f32 %v8716_v52, %v902_v20  ;;  %v680_v20 = vld [vmem:[#allocation2 + $0x758] sm:$0xff] }
 0x235   : > { %3641 = vmatpush1.bf16.msra.mxu0 %v6985_v27  ;;  %v3235_v27 = vadd.f32 %v8714_v47, %v898_v14  ;;  %v6827_v14 = vcombine.low %v664_v5, %v668_v6  ;;  %v684_v23 = vld [vmem:[#allocation2 + $0x778] sm:$0xff] }
 0x236   : > { %3651 = vmatprep.subr.bf16.mxu0 %v6994_v29  ;;  %3725 = vmatmul.mubr.bf16.vlgmr.msra.gmra.mrb[8].mxu1 %v8681_v16  ;;  %v6755_v16 = vcombine.low %v592_v39, %v596_v40  ;;  %v632_v29 = vld [vmem:[#allocation2 + $0x5d8] sm:$0xff] }
 0x237   : > { %3734 = vmatpush1.bf16.msra.mxu1 %v6739_v35  ;;  %3765 = vmatprep.mubr.bf16.mxu1 %v8675_v61  ;;  %v6772_v61 = vcombine.high %v608_v60, %v612_v62  ;;  %v891_v35 = vld [vmem:[#allocation2 + $0xdf0] sm:$0xff]  ;;  %v6796_v47 = vcombine.high %v632_v29, %v636_v30  ;;  %v6795_v44 = vcombine.low %v632_v29, %v636_v30  ;;  %v7613_v60 = vld [vmem:[#allocation6 + $0x24] ss:$16 sps:$4 sm:$0xff]   ;;  %v7623_v30 = vld [vmem:[#allocation6 + $0xa0] ss:$16 sps:$4 sm:$0xff]  }
 0x238   : > { %3643 = vmatmul.mubr.bf16.vlgmr.msra.gmra.mrb[4].mxu0 %v8700_v33  ;;  %3735 = vmatprep.subr.bf16.mxu1 %v6748_v37  ;;  %v656_v62 = vld [vmem:[#allocation2 + $0x698] sm:$0xff]  ;;  %v6843_v29 = vcombine.low %v680_v20, %v684_v23 }
 0x239   : > { %3652 = vmatpush1.bf16.msra.mxu0 %v6993_v36  ;;  %3683 = vmatprep.mubr.bf16.mxu0 %v8379_v48  ;;  %v6819_v9 = vcombine.low %v656_v62, %v660_v63 }
 0x23a   : > { %3653 = vmatprep.subr.bf16.mxu0 %v7002_v38  ;;  %v6787_v38 = vcombine.low %v624_v17, %v628_v18  ;;  %v7622_v18 = vld [vmem:[#allocation6 + $0x84] ss:$16 sps:$4 sm:$0xff]  }
 0x23b   : > { %3736 = vmatpush1.bf16.msra.mxu1 %v6747_v19  ;;  %v7050_v19 = vcombine.high %v887_v34, %v891_v35 }
 0x23c   : > { %3737 = vmatprep.subr.bf16.mxu1 %v6756_v43  ;;  %v644_v43 = vld [vmem:[#allocation2 + $0x638] sm:$0xff] }
 0x23d   : > { %3654 = vmatpush1.bf16.msra.mxu0 %v7001_v58  ;;  %v640_v58 = vld [vmem:[#allocation2 + $0x618] sm:$0xff] }
 0x23e   : > { %3655 = vmatprep.subr.bf16.mxu0 %v7010_v45  ;;  %v7049_v45 = vcombine.low %v887_v34, %v891_v35  ;;  %v6804_v46 = vcombine.high %v640_v58, %v644_v43  ;;  %v696_v34 = vld [vmem:[#allocation2 + $0x7d8] sm:$0xff] }
 0x23f   : > { %3738 = vmatpush1.bf16.msra.mxu1 %v6755_v16  ;;  %v652_v16 = vld [vmem:[#allocation2 + $0x678] sm:$0xff] }
 0x240   : > { %3739 = vmatprep.subr.bf16.mxu1 %v6764_v56  ;;  %v7608_v56 = vld [vmem:[#allocation6] ss:$16 sps:$4 sm:$0xff]  }
 0x241   : > { %3656 = vmatpush1.bf16.msra.mxu0 %v7009_v55  ;;  %v6803_v55 = vcombine.low %v640_v58, %v644_v43  ;;  %v700_v35 = vld [vmem:[#allocation2 + $0x7f8] sm:$0xff] }
 0x242   : > { %3657 = vmatprep.subr.bf16.mxu0 %v7018_v59  ;;  %v6812_v59 = vcombine.high %v648_v51, %v652_v16  ;;  %v7634_v43 = vld [vmem:[#allocation6 + $0x104] ss:$16 sps:$4 sm:$0xff]  }
 0x243   : > { %3740 = vmatpush1.bf16.msra.mxu1 %v6763_v1  ;;  %v6811_v1 = vcombine.low %v648_v51, %v652_v16  ;;  %v720_v51 = vld [vmem:[#allocation2 + $0x898] sm:$0xff] }
 0x244   : > { %3741 = vmatprep.subr.bf16.mxu1 %v6772_v61  ;;  %v6820_v61 = vcombine.high %v656_v62, %v660_v63  ;;  %v724_v16 = vld [vmem:[#allocation2 + $0x8b8] sm:$0xff] }
 0x245   : > { %3658 = vmatpush1.bf16.msra.mxu0 %v7017_v2  ;;  %v7611_v2 = vld [vmem:[#allocation6 + $0x20] ss:$16 sps:$4 sm:$0xff]  }
 0x246   : > { %3659 = vmatprep.subr.bf16.mxu0 %v7026_v4  ;;  %v7616_v4 = vld [vmem:[#allocation6 + $0x44] ss:$16 sps:$4 sm:$0xff]  }
 0x247   : > { %3742 = vmatpush1.bf16.msra.mxu1 %v6771_v11  ;;  %v6828_v11 = vcombine.high %v664_v5, %v668_v6  ;;  %v728_v62 = vld [vmem:[#allocation2 + $0x8d8] sm:$0xff] }
 0x248   : > { %3743 = vmatprep.subr.bf16.mxu1 %v6780_v13  ;;  %v676_v13 = vld [vmem:[#allocation2 + $0x738] sm:$0xff] }
 0x249   : > { %3660 = vmatpush1.bf16.msra.mxu0 %v7025_v12  ;;  %v672_v12 = vld [vmem:[#allocation2 + $0x718] sm:$0xff] }
 0x24a   : > { %3661 = vmatprep.subr.bf16.mxu0 %v7034_v15  ;;  %v7617_v15 = vld [vmem:[#allocation6 + $0x60] ss:$16 sps:$4 sm:$0xff]   ;;  %v6836_v17 = vcombine.high %v672_v12, %v676_v13  ;;  %v6835_v24 = vcombine.low %v672_v12, %v676_v13 }
 0x24b   : > { %v3357_v32 = vpop.f32.mrb[0].mxu0  ;;  %3744 = vmatpush1.bf16.msra.mxu1 %v6779_v25  ;;  %v7620_v25 = vld [vmem:[#allocation6 + $0x80] ss:$16 sps:$4 sm:$0xff]  }
 0x24c   : > { %v8745_v36 = vadd.f32 %v3357_v32, %v3235_v27  ;;  %v3359_v37 = vpop.f32.mrb[1].mxu0  ;;  %3745 = vmatprep.subr.bf16.mxu1 %v6788_v53  ;;  %v7625_v53 = vld [vmem:[#allocation6 + $0xa4] ss:$16 sps:$4 sm:$0xff]   ;;  %v7641_v6 = vld [vmem:[#allocation6 + $0x160] ss:$16 sps:$4 sm:$0xff]  }
 0x24d   : > { %v7417_v39 = vadd.f32 %v3359_v37, %v3237_v31  ;;  %v3361_v40 = vpop.f32.mrb[2].mxu0  ;;  %3662 = vmatpush1.bf16.msra.mxu0 %v7033_v26  ;;  %v6844_v26 = vcombine.high %v680_v20, %v684_v23  ;;  %v688_v27 = vld [vmem:[#allocation2 + $0x798] sm:$0xff] }
 0x24e   : > { %v3362_v42 = vpop.f32.mrb[3].mxu0  ;;  %3663 = vmatprep.subr.bf16.mxu0 %v7042_v54  ;;  %v692_v54 = vld [vmem:[#allocation2 + $0x7b8] sm:$0xff] }
 0x24f   : > { %v3857_v52 = vmul.f32 0.2, %v7417_v39  ;;  %3746 = vmatpush1.bf16.msra.mxu1 %v6787_v38  ;;  %v6852_v31 = vcombine.high %v688_v27, %v692_v54  ;;  %v7628_v32 = vld [vmem:[#allocation6 + $0xc4] ss:$16 sps:$4 sm:$0xff]   ;;  %v6851_v37 = vcombine.low %v688_v27, %v692_v54  ;;  %v7626_v38 = vld [vmem:[#allocation6 + $0xc0] ss:$16 sps:$4 sm:$0xff]   ;;  %v6859_v42 = vcombine.low %v696_v34, %v700_v35 }
 0x250   : > { %3747 = vmatprep.subr.bf16.mxu1 %v6796_v47  ;;  %v7631_v40 = vld [vmem:[#allocation6 + $0xe4] ss:$16 sps:$4 sm:$0xff]   ;;  %v7644_v13 = vld [vmem:[#allocation6 + $0x180] ss:$16 sps:$4 sm:$0xff]  }
 0x251   : > { %3664 = vmatpush1.bf16.msra.mxu0 %v7041_v41  ;;  %v3865_v50 = vmax.f32 %v7417_v39, %v3857_v52  ;;  %v6860_v39 = vcombine.high %v696_v34, %v700_v35  ;;  %v704_v41 = vld [vmem:[#allocation2 + $0x818] sm:$0xff] }
 0x252   : > { %3665 = vmatprep.subr.bf16.mxu0 %v7050_v19  ;;  %v708_v47 = vld [vmem:[#allocation2 + $0x838] sm:$0xff] }
 0x253   : > { %3748 = vmatpush1.bf16.msra.mxu1 %v6795_v44  ;;  %v8747_v0 = vpack.c.bf16 %v3865_v50, %v3865_v50  ;;  %v7629_v19 = vld [vmem:[#allocation6 + $0xe0] ss:$16 sps:$4 sm:$0xff]   ;;  %v6868_v58 = vcombine.high %v704_v41, %v708_v47  ;;  %v7637_v50 = vld [vmem:[#allocation6 + $0x124] ss:$16 sps:$4 sm:$0xff]  }
 0x254   : > { %3749 = vmatprep.subr.bf16.mxu1 %v6804_v46  ;;  %v712_v52 = vld [vmem:[#allocation2 + $0x858] sm:$0xff] }
 0x255   : > { %3666 = vmatpush1.bf16.msra.mxu0 %v7049_v45  ;;  %v716_v44 = vld [vmem:[#allocation2 + $0x878] sm:$0xff]  ;;  %v6867_v45 = vcombine.low %v704_v41, %v708_v47 }
 0x256   : > { %5438 = vmatprep.subr.bf16.mxu0 %v7610_v49  ;;  %v7632_v46 = vld [vmem:[#allocation6 + $0x100] ss:$16 sps:$4 sm:$0xff]   ;;  %v6876_v49 = vcombine.high %v712_v52, %v716_v44 }
 0x257   : > { %3750 = vmatpush1.bf16.msra.mxu1 %v6803_v55  ;;  %v6875_v55 = vcombine.low %v712_v52, %v716_v44  ;;  %v732_v63 = vld [vmem:[#allocation2 + $0x8f8] sm:$0xff] }
 0x258   : > { %3684 = vmatmul.mubr.bf16.vlgmr.msra.gmra.mrb[4].mxu0 %v8719_v22  ;;  %3751 = vmatprep.subr.bf16.mxu1 %v6812_v59  ;;  %v7619_v22 = vld [vmem:[#allocation6 + $0x64] ss:$16 sps:$4 sm:$0xff]   ;;  %v6884_v59 = vcombine.high %v720_v51, %v724_v16  ;;  %v7647_v23 = vld [vmem:[#allocation6 + $0x1a0] ss:$16 sps:$4 sm:$0xff]  }
 0x259   : > { %5439 = vmatpush1.bf16.msra.mxu0 %v7608_v56  ;;  %5470 = vmatprep.mubr.bf16.mxu0 %v8747_v0  ;;  %v7635_v56 = vld [vmem:[#allocation6 + $0x120] ss:$16 sps:$4 sm:$0xff]   ;;  %v7661_v52 = vld [vmem:[#allocation6 + $0x224] ss:$16 sps:$4 sm:$0xff]  }
 0x25a   : > { %5440 = vmatprep.subr.bf16.mxu0 %v7613_v60  ;;  %v7640_v60 = vld [vmem:[#allocation6 + $0x144] ss:$16 sps:$4 sm:$0xff]   ;;  %v7650_v54 = vld [vmem:[#allocation6 + $0x1c0] ss:$16 sps:$4 sm:$0xff]  }
 0x25b   : > { %3752 = vmatpush1.bf16.msra.mxu1 %v6811_v1  ;;  %v6883_v1 = vcombine.low %v720_v51, %v724_v16  ;;  %v740_v5 = vld [vmem:[#allocation2 + $0x938] sm:$0xff] }
 0x25c   : > { %3753 = vmatprep.subr.bf16.mxu1 %v6820_v61  ;;  %v6892_v61 = vcombine.high %v728_v62, %v732_v63  ;;  %v772_v34 = vld [vmem:[#allocation2 + $0xa38] sm:$0xff] }
 0x25d   : > { %5441 = vmatpush1.bf16.msra.mxu0 %v7611_v2  ;;  %v7638_v2 = vld [vmem:[#allocation6 + $0x140] ss:$16 sps:$4 sm:$0xff]  }
 0x25e   : > { %5442 = vmatprep.subr.bf16.mxu0 %v7616_v4  ;;  %v736_v4 = vld [vmem:[#allocation2 + $0x918] sm:$0xff] }
 0x25f   : > { %3754 = vmatpush1.bf16.msra.mxu1 %v6819_v9  ;;  %v6900_v9 = vcombine.high %v736_v4, %v740_v5  ;;  %v6899_v12 = vcombine.low %v736_v4, %v740_v5  ;;  %v776_v41 = vld [vmem:[#allocation2 + $0xa58] sm:$0xff] }
 0x260   : > { %3755 = vmatprep.subr.bf16.mxu1 %v6828_v11  ;;  %v744_v11 = vld [vmem:[#allocation2 + $0x958] sm:$0xff] }
 0x261   : > { %5443 = vmatpush1.bf16.msra.mxu0 %v7614_v10  ;;  %v7646_v10 = vld [vmem:[#allocation6 + $0x184] ss:$16 sps:$4 sm:$0xff]  }
 0x262   : > { %5444 = vmatprep.subr.bf16.mxu0 %v7619_v22  ;;  %v748_v22 = vld [vmem:[#allocation2 + $0x978] sm:$0xff] }
 0x263   : > { %3756 = vmatpush1.bf16.msra.mxu1 %v6827_v14  ;;  %v6908_v14 = vcombine.high %v744_v11, %v748_v22  ;;  %v6907_v20 = vcombine.low %v744_v11, %v748_v22  ;;  %v780_v47 = vld [vmem:[#allocation2 + $0xa78] sm:$0xff] }
 0x264   : > { %3757 = vmatprep.subr.bf16.mxu1 %v6836_v17  ;;  %v752_v17 = vld [vmem:[#allocation2 + $0x998] sm:$0xff] }
 0x265   : > { %5445 = vmatpush1.bf16.msra.mxu0 %v7617_v15  ;;  %v7649_v15 = vld [vmem:[#allocation6 + $0x1a4] ss:$16 sps:$4 sm:$0xff]  }
 0x266   : > { %5446 = vmatprep.subr.bf16.mxu0 %v7622_v18  ;;  %v756_v18 = vld [vmem:[#allocation2 + $0x9b8] sm:$0xff] }
 0x267   : > { %3758 = vmatpush1.bf16.msra.mxu1 %v6835_v24  ;;  %v6916_v24 = vcombine.high %v752_v17, %v756_v18  ;;  %v6915_v27 = vcombine.low %v752_v17, %v756_v18  ;;  %v784_v44 = vld [vmem:[#allocation2 + $0xa98] sm:$0xff] }
 0x268   : > { %3759 = vmatprep.subr.bf16.mxu1 %v6844_v26  ;;  %v760_v26 = vld [vmem:[#allocation2 + $0x9d8] sm:$0xff] }
 0x269   : > { %5447 = vmatpush1.bf16.msra.mxu0 %v7620_v25  ;;  %v7652_v25 = vld [vmem:[#allocation6 + $0x1c4] ss:$16 sps:$4 sm:$0xff]  }
 0x26a   : > { %5448 = vmatprep.subr.bf16.mxu0 %v7625_v53  ;;  %v764_v53 = vld [vmem:[#allocation2 + $0x9f8] sm:$0xff] }
 0x26b   : > { %3760 = vmatpush1.bf16.msra.mxu1 %v6843_v29  ;;  %v6924_v29 = vcombine.high %v760_v26, %v764_v53  ;;  %v6923_v35 = vcombine.low %v760_v26, %v764_v53  ;;  %v792_v51 = vld [vmem:[#allocation2 + $0xad8] sm:$0xff] }
 0x26c   : > { %3761 = vmatprep.subr.bf16.mxu1 %v6852_v31  ;;  %v7655_v31 = vld [vmem:[#allocation6 + $0x1e4] ss:$16 sps:$4 sm:$0xff]  }
 0x26d   : > { %5449 = vmatpush1.bf16.msra.mxu0 %v7623_v30  ;;  %v3856_v30 = vmul.f32 0.2, %v8745_v36  ;;  %v796_v16 = vld [vmem:[#allocation2 + $0xaf8] sm:$0xff] }
 0x26e   : > { %5450 = vmatprep.subr.bf16.mxu0 %v7628_v32  ;;  %v768_v32 = vld [vmem:[#allocation2 + $0xa18] sm:$0xff] }
 0x26f   : > { %3762 = vmatpush1.bf16.msra.mxu1 %v6851_v37  ;;  %v7653_v37 = vld [vmem:[#allocation6 + $0x1e0] ss:$16 sps:$4 sm:$0xff]  }
 0x270   : > { %3763 = vmatprep.subr.bf16.mxu1 %v6860_v39  ;;  %v3864_v39 = vmax.f32 %v8745_v36, %v3856_v30  ;;  %v6939_v36 = vcombine.low %v776_v41, %v780_v47  ;;  %v808_v4 = vld [vmem:[#allocation2 + $0xb58] sm:$0xff] }
 0x271   : > { %5451 = vmatpush1.bf16.msra.mxu0 %v7626_v38  ;;  %v6932_v38 = vcombine.high %v768_v32, %v772_v34  ;;  %v812_v5 = vld [vmem:[#allocation2 + $0xb78] sm:$0xff] }
 0x272   : > { %5452 = vmatprep.subr.bf16.mxu0 %v7631_v40  ;;  %v7658_v40 = vld [vmem:[#allocation6 + $0x204] ss:$16 sps:$4 sm:$0xff]  }
 0x273   : > { %3764 = vmatpush1.bf16.msra.mxu1 %v6859_v42  ;;  %v6931_v42 = vcombine.low %v768_v32, %v772_v34  ;;  %v816_v11 = vld [vmem:[#allocation2 + $0xb98] sm:$0xff] }
 0x274   : > { %3774 = vmatprep.subr.bf16.mxu1 %v6868_v58  ;;  %v6940_v58 = vcombine.high %v776_v41, %v780_v47  ;;  %v820_v22 = vld [vmem:[#allocation2 + $0xbb8] sm:$0xff] }
 0x275   : > { %5453 = vmatpush1.bf16.msra.mxu0 %v7629_v19  ;;  %v7656_v19 = vld [vmem:[#allocation6 + $0x200] ss:$16 sps:$4 sm:$0xff]   ;;  %v7682_v30 = vld [vmem:[#allocation6 + $0x304] ss:$16 sps:$4 sm:$0xff]  }
 0x276   : > { %5454 = vmatprep.subr.bf16.mxu0 %v7634_v43  ;;  %3766 = vmatmul.mubr.bf16.vlgmr.msra.gmra.mrb[8].mxu1 %v8688_v21  ;;  %v7643_v21 = vld [vmem:[#allocation6 + $0x164] ss:$16 sps:$4 sm:$0xff]   ;;  %v8755_v43 = vpack.c.bf16 %v3864_v39, %v3864_v39  ;;  %v7683_v47 = vld [vmem:[#allocation6 + $0x320] ss:$16 sps:$4 sm:$0xff]  }
 0x277   : > { %3775 = vmatpush1.bf16.msra.mxu1 %v6867_v45  ;;  %3806 = vmatprep.mubr.bf16.mxu1 %v8692_v28  ;;  %v6891_v28 = vcombine.low %v728_v62, %v732_v63  ;;  %v788_v45 = vld [vmem:[#allocation2 + $0xab8] sm:$0xff] }
 0x278   : > { %3776 = vmatprep.subr.bf16.mxu1 %v6876_v49  ;;  %v6948_v49 = vcombine.high %v784_v44, %v788_v45  ;;  %v800_v62 = vld [vmem:[#allocation2 + $0xb18] sm:$0xff] }
 0x279   : > { %5455 = vmatpush1.bf16.msra.mxu0 %v7632_v46  ;;  %v7659_v46 = vld [vmem:[#allocation6 + $0x220] ss:$16 sps:$4 sm:$0xff]  }
 0x27a   : > { %5456 = vmatprep.subr.bf16.mxu0 %v7637_v50  ;;  %v7664_v50 = vld [vmem:[#allocation6 + $0x244] ss:$16 sps:$4 sm:$0xff]  }
 0x27b   : > { %3777 = vmatpush1.bf16.msra.mxu1 %v6875_v55  ;;  %v6947_v55 = vcombine.low %v784_v44, %v788_v45  ;;  %v804_v63 = vld [vmem:[#allocation2 + $0xb38] sm:$0xff] }
 0x27c   : > { %3778 = vmatprep.subr.bf16.mxu1 %v6884_v59  ;;  %v6956_v59 = vcombine.high %v792_v51, %v796_v16  ;;  %v824_v17 = vld [vmem:[#allocation2 + $0xbd8] sm:$0xff] }
 0x27d   : > { %5457 = vmatpush1.bf16.msra.mxu0 %v7635_v56  ;;  %v7662_v56 = vld [vmem:[#allocation6 + $0x240] ss:$16 sps:$4 sm:$0xff]  }
 0x27e   : > { %5458 = vmatprep.subr.bf16.mxu0 %v7640_v60  ;;  %v7667_v60 = vld [vmem:[#allocation6 + $0x264] ss:$16 sps:$4 sm:$0xff]   ;;  %v7686_v45 = vld [vmem:[#allocation6 + $0x340] ss:$16 sps:$4 sm:$0xff]  }
 0x27f   : > { %3779 = vmatpush1.bf16.msra.mxu1 %v6883_v1  ;;  %v6955_v1 = vcombine.low %v792_v51, %v796_v16  ;;  %v828_v18 = vld [vmem:[#allocation2 + $0xbf8] sm:$0xff] }
 0x280   : > { %3780 = vmatprep.subr.bf16.mxu1 %v6892_v61  ;;  %v6964_v61 = vcombine.high %v800_v62, %v804_v63  ;;  %v832_v26 = vld [vmem:[#allocation2 + $0xc18] sm:$0xff] }
 0x281   : > { %5459 = vmatpush1.bf16.msra.mxu0 %v7638_v2  ;;  %v7665_v2 = vld [vmem:[#allocation6 + $0x260] ss:$16 sps:$4 sm:$0xff]   ;;  %v7694_v16 = vld [vmem:[#allocation6 + $0x384] ss:$16 sps:$4 sm:$0xff]  }
 0x282   : > { %5460 = vmatprep.subr.bf16.mxu0 %v7643_v21  ;;  %v7670_v21 = vld [vmem:[#allocation6 + $0x284] ss:$16 sps:$4 sm:$0xff]  }
 0x283   : > { %3781 = vmatpush1.bf16.msra.mxu1 %v6891_v28  ;;  %v6963_v28 = vcombine.low %v800_v62, %v804_v63  ;;  %v836_v53 = vld [vmem:[#allocation2 + $0xc38] sm:$0xff]  ;;  %v909_v62 = vsub.s32 3, %v8729_v57 }
 0x284   : > { %3782 = vmatprep.subr.bf16.mxu1 %v6900_v9  ;;  %v6972_v9 = vcombine.high %v808_v4, %v812_v5  ;;  %v844_v32 = vld [vmem:[#allocation2 + $0xc78] sm:$0xff]  ;;  %v6995_v34 = vcombine.low %v832_v26, %v836_v53 }
 0x285   : > { %5461 = vmatpush1.bf16.msra.mxu0 %v7641_v6  ;;  %v7668_v6 = vld [vmem:[#allocation6 + $0x280] ss:$16 sps:$4 sm:$0xff]  }
 0x286   : > { %5462 = vmatprep.subr.bf16.mxu0 %v7646_v10  ;;  %v7673_v10 = vld [vmem:[#allocation6 + $0x2a4] ss:$16 sps:$4 sm:$0xff]   ;;  %v7692_v63 = vld [vmem:[#allocation6 + $0x380] ss:$16 sps:$4 sm:$0xff]  }
 0x287   : > { %3783 = vmatpush1.bf16.msra.mxu1 %v6899_v12  ;;  %v6971_v12 = vcombine.low %v808_v4, %v812_v5  ;;  %v848_v39 = vld [vmem:[#allocation2 + $0xc98] sm:$0xff]  ;;  %v910_v5 = vrot.slane %v8734_v7, %v909_v62 }
 0x288   : > { %3784 = vmatprep.subr.bf16.mxu1 %v6908_v14  ;;  %v6980_v14 = vcombine.high %v816_v11, %v820_v22 }
 0x289   : > { %5463 = vmatpush1.bf16.msra.mxu0 %v7644_v13  ;;  %v7671_v13 = vld [vmem:[#allocation6 + $0x2a0] ss:$16 sps:$4 sm:$0xff]  }
 0x28a   : > { %5464 = vmatprep.subr.bf16.mxu0 %v7649_v15  ;;  %v7676_v15 = vld [vmem:[#allocation6 + $0x2c4] ss:$16 sps:$4 sm:$0xff]  }
 0x28b   : > { %3785 = vmatpush1.bf16.msra.mxu1 %v6907_v20  ;;  %v6979_v20 = vcombine.low %v816_v11, %v820_v22  ;;  %v7700_v11 = vld [vmem:[#allocation6 + $0x3c4] ss:$16 sps:$4 sm:$0xff]  }
 0x28c   : > { %3786 = vmatprep.subr.bf16.mxu1 %v6916_v24  ;;  %v6988_v24 = vcombine.high %v824_v17, %v828_v18  ;;  %v888_v22 = vld [vmem:[#allocation2 + $0xdd8] sm:$0xff] }
 0x28d   : > { %5465 = vmatpush1.bf16.msra.mxu0 %v7647_v23  ;;  %v7674_v23 = vld [vmem:[#allocation6 + $0x2c0] ss:$16 sps:$4 sm:$0xff]  }
 0x28e   : > { %5466 = vmatprep.subr.bf16.mxu0 %v7652_v25  ;;  %v7679_v25 = vld [vmem:[#allocation6 + $0x2e4] ss:$16 sps:$4 sm:$0xff]  }
 0x28f   : > { %3787 = vmatpush1.bf16.msra.mxu1 %v6915_v27  ;;  %v6987_v27 = vcombine.low %v824_v17, %v828_v18 }
 0x290   : > { %3788 = vmatprep.subr.bf16.mxu1 %v6924_v29  ;;  %v6996_v29 = vcombine.high %v832_v26, %v836_v53  ;;  %v7703_v26 = vld [vmem:[#allocation6 + $0x3e4] ss:$16 sps:$4 sm:$0xff]  }
 0x291   : > { %5467 = vmatpush1.bf16.msra.mxu0 %v7650_v54  ;;  %v7677_v54 = vld [vmem:[#allocation6 + $0x2e0] ss:$16 sps:$4 sm:$0xff]  }
 0x292   : > { %5468 = vmatprep.subr.bf16.mxu0 %v7655_v31  ;;  %v840_v31 = vld [vmem:[#allocation2 + $0xc58] sm:$0xff] }
 0x293   : > { %3789 = vmatpush1.bf16.msra.mxu1 %v6923_v35  ;;  %v7680_v35 = vld [vmem:[#allocation6 + $0x300] ss:$16 sps:$4 sm:$0xff]   ;;  %v7003_v41 = vcombine.low %v840_v31, %v844_v32 }
 0x294   : > { %3790 = vmatprep.subr.bf16.mxu1 %v6932_v38  ;;  %v7685_v38 = vld [vmem:[#allocation6 + $0x324] ss:$16 sps:$4 sm:$0xff]  }
 0x295   : > { %5469 = vmatpush1.bf16.msra.mxu0 %v7653_v37  ;;  %v7004_v37 = vcombine.high %v840_v31, %v844_v32  ;;  %v7730_v32 = vld [vmem:[#allocation6 + $0x404] ss:$16 sps:$4 sm:$0xff]  }
 0x296   : > { %5479 = vmatprep.subr.bf16.mxu0 %v7658_v40  ;;  %v852_v40 = vld [vmem:[#allocation2 + $0xcb8] sm:$0xff] }
 0x297   : > { %3791 = vmatpush1.bf16.msra.mxu1 %v6931_v42  ;;  %v7012_v42 = vcombine.high %v848_v39, %v852_v40  ;;  %v7011_v44 = vcombine.low %v848_v39, %v852_v40  ;;  %v8109_v39 = vld [vmem:[%s8661_s23 + $0x18] ss:$0 sps:$4 sm:$0xff]   ;;  %v7736_v40 = vld [vmem:[#allocation6 + $0x424] ss:$16 sps:$4 sm:$0xff]  }
 0x298   : > { %5471 = vmatmul.mubr.bf16.vlgmr.msra.gmra.mrb[8].mxu0 %v8755_v43  ;;  %3792 = vmatprep.subr.bf16.mxu1 %v6940_v58  ;;  %v856_v58 = vld [vmem:[#allocation2 + $0xcd8] sm:$0xff] }
 0x299   : > { %5480 = vmatpush1.bf16.msra.mxu0 %v7656_v19  ;;  %v7688_v19 = vld [vmem:[#allocation6 + $0x344] ss:$16 sps:$4 sm:$0xff]  }
 0x29a   : > { %5481 = vmatprep.subr.bf16.mxu0 %v7661_v52  ;;  %v860_v52 = vld [vmem:[#allocation2 + $0xcf8] sm:$0xff] }
 0x29b   : > { %3793 = vmatpush1.bf16.msra.mxu1 %v6939_v36  ;;  %v7020_v36 = vcombine.high %v856_v58, %v860_v52 }
 0x29c   : > { %3794 = vmatprep.subr.bf16.mxu1 %v6948_v49  ;;  %v868_v49 = vld [vmem:[#allocation2 + $0xd38] sm:$0xff] }
 0x29d   : > { %5482 = vmatpush1.bf16.msra.mxu0 %v7659_v46  ;;  %v864_v46 = vld [vmem:[#allocation2 + $0xd18] sm:$0xff] }
 0x29e   : > { %5483 = vmatprep.subr.bf16.mxu0 %v7664_v50  ;;  %v7689_v50 = vld [vmem:[#allocation6 + $0x360] ss:$16 sps:$4 sm:$0xff]   ;;  %v7028_v51 = vcombine.high %v864_v46, %v868_v49 }
 0x29f   : > { %3795 = vmatpush1.bf16.msra.mxu1 %v6947_v55  ;;  %v872_v55 = vld [vmem:[#allocation2 + $0xd58] sm:$0xff] }
 0x2a0   : > { %3796 = vmatprep.subr.bf16.mxu1 %v6956_v59  ;;  %v905_v59 = vsub.s32 2, %v8729_v57 }
 0x2a1   : > { %5484 = vmatpush1.bf16.msra.mxu0 %v7662_v56  ;;  %v876_v56 = vld [vmem:[#allocation2 + $0xd78] sm:$0xff] }
 0x2a2   : > { %5485 = vmatprep.subr.bf16.mxu0 %v7667_v60  ;;  %v7027_v60 = vcombine.low %v864_v46, %v868_v49  ;;  %v906_v4 = vrot.slane %v8734_v7, %v905_v59  ;;  %v7698_v7 = vld [vmem:[#allocation6 + $0x3c0] ss:$16 sps:$4 sm:$0xff]   ;;  %v7754_v46 = vld [vmem:[#allocation6 + $0x484] ss:$16 sps:$4 sm:$0xff]   ;;  %v7716_v49 = vld [vmem:[#allocation6 + $0x88] ss:$16 sps:$4 sm:$0xff]  }
 0x2a3   : > { %3797 = vmatpush1.bf16.msra.mxu1 %v6955_v1  ;;  %v7036_v1 = vcombine.high %v872_v55, %v876_v56 }
 0x2a4   : > { %3798 = vmatprep.subr.bf16.mxu1 %v6964_v61  ;;  %v880_v61 = vld [vmem:[#allocation2 + $0xd98] sm:$0xff] }
 0x2a5   : > { %5486 = vmatpush1.bf16.msra.mxu0 %v7665_v2  ;;  %v7697_v2 = vld [vmem:[#allocation6 + $0x3a4] ss:$16 sps:$4 sm:$0xff]  }
 0x2a6   : > { %5487 = vmatprep.subr.bf16.mxu0 %v7670_v21  ;;  %v884_v21 = vld [vmem:[#allocation2 + $0xdb8] sm:$0xff] }
 0x2a7   : > { %3799 = vmatpush1.bf16.msra.mxu1 %v6963_v28  ;;  %v7035_v28 = vcombine.low %v872_v55, %v876_v56  ;;  %v7043_v18 = vcombine.low %v880_v61, %v884_v21  ;;  %v7724_v55 = vld [vmem:[#allocation6 + $0xcc] ss:$16 sps:$4 sm:$0xff]   ;;  %v7758_v56 = vld [vmem:[#allocation6 + $0x4a0] ss:$16 sps:$4 sm:$0xff]  }
 0x2a8   : > { %3800 = vmatprep.subr.bf16.mxu1 %v6972_v9  ;;  %v7044_v9 = vcombine.high %v880_v61, %v884_v21  ;;  %v7772_v61 = vld [vmem:[#allocation6 + $0x4e4] ss:$16 sps:$4 sm:$0xff]   ;;  %v7725_v21 = vld [vmem:[#allocation6 + $0xe8] ss:$16 sps:$4 sm:$0xff]  }
 0x2a9   : > { %5488 = vmatpush1.bf16.msra.mxu0 %v7668_v6  ;;  %v7695_v6 = vld [vmem:[#allocation6 + $0x3a0] ss:$16 sps:$4 sm:$0xff]  }
 0x2aa   : > { %5489 = vmatprep.subr.bf16.mxu0 %v7673_v10 }
 0x2ab   : > { %3801 = vmatpush1.bf16.msra.mxu1 %v6971_v12  ;;  %v892_v12 = vld [vmem:[#allocation2 + $0xdf8] sm:$0xff] }
 0x2ac   : > { %3802 = vmatprep.subr.bf16.mxu1 %v6980_v14 }
 0x2ad   : > { %5490 = vmatpush1.bf16.msra.mxu0 %v7671_v13 }
 0x2ae   : > { %5491 = vmatprep.subr.bf16.mxu0 %v7676_v15 }
 0x2af   : > { %3803 = vmatpush1.bf16.msra.mxu1 %v6979_v20 }
 0x2b0   : > { %3804 = vmatprep.subr.bf16.mxu1 %v6988_v24 }
 0x2b1   : > { %5492 = vmatpush1.bf16.msra.mxu0 %v7674_v23  ;;  %v7052_v23 = vcombine.high %v888_v22, %v892_v12 }
 0x2b2   : > { %5493 = vmatprep.subr.bf16.mxu0 %v7679_v25 }
 0x2b3   : > { %3805 = vmatpush1.bf16.msra.mxu1 %v6987_v27  ;;  %v7051_v27 = vcombine.low %v888_v22, %v892_v12  ;;  %v7737_v22 = vld [vmem:[#allocation6 + $0x128] ss:$16 sps:$4 sm:$0xff]   ;;  %v7745_v12 = vld [vmem:[#allocation6 + $0x14c] ss:$16 sps:$4 sm:$0xff]  }
 0x2b4   : > { %3815 = vmatprep.subr.bf16.mxu1 %v6996_v29  ;;  %v7706_v29 = vld [vmem:[#allocation6 + $0xc] ss:$16 sps:$4 sm:$0xff]  }
 0x2b5   : > { %5494 = vmatpush1.bf16.msra.mxu0 %v7677_v54  ;;  %v7701_v54 = vld [vmem:[#allocation6 + $0x3e0] ss:$16 sps:$4 sm:$0xff]  }
 0x2b6   : > { %5495 = vmatprep.subr.bf16.mxu0 %v7682_v30  ;;  %3807 = vmatmul.mubr.bf16.vlgmr.msra.gmra.mrb[8].mxu1 %v8700_v33  ;;  %v7691_v33 = vld [vmem:[#allocation6 + $0x364] ss:$16 sps:$4 sm:$0xff]  }
 0x2b7   : > { %3816 = vmatpush1.bf16.msra.mxu1 %v6995_v34  ;;  %3847 = vmatprep.mubr.bf16.mxu1 %v8379_v48  ;;  %v7019_v48 = vcombine.low %v856_v58, %v860_v52  ;;  %v7704_v34 = vld [vmem:[#allocation6 + $0x8] ss:$16 sps:$4 sm:$0xff]   ;;  %v7715_v52 = vld [vmem:[#allocation6 + $0x6c] ss:$16 sps:$4 sm:$0xff]  }
 0x2b8   : > { %3817 = vmatprep.subr.bf16.mxu1 %v7004_v37  ;;  %v7710_v58 = vld [vmem:[#allocation6 + $0x48] ss:$16 sps:$4 sm:$0xff]  }
 0x2b9   : > { %5496 = vmatpush1.bf16.msra.mxu0 %v7680_v35  ;;  %v7709_v35 = vld [vmem:[#allocation6 + $0x2c] ss:$16 sps:$4 sm:$0xff]  }
 0x2ba   : > { %5497 = vmatprep.subr.bf16.mxu0 %v7685_v38  ;;  %v7728_v38 = vld [vmem:[#allocation6 + $0x400] ss:$16 sps:$4 sm:$0xff]  }
 0x2bb   : > { %3818 = vmatpush1.bf16.msra.mxu1 %v7003_v41  ;;  %v7707_v41 = vld [vmem:[#allocation6 + $0x28] ss:$16 sps:$4 sm:$0xff]  }
 0x2bc   : > { %3819 = vmatprep.subr.bf16.mxu1 %v7012_v42  ;;  %v7734_v42 = vld [vmem:[#allocation6 + $0x420] ss:$16 sps:$4 sm:$0xff]  }
 0x2bd   : > { %5498 = vmatpush1.bf16.msra.mxu0 %v7683_v47  ;;  %v7712_v47 = vld [vmem:[#allocation6 + $0x4c] ss:$16 sps:$4 sm:$0xff]  }
 0x2be   : > { %5499 = vmatprep.subr.bf16.mxu0 %v7688_v19  ;;  %v7742_v19 = vld [vmem:[#allocation6 + $0x444] ss:$16 sps:$4 sm:$0xff]  }
 0x2bf   : > { %3820 = vmatpush1.bf16.msra.mxu1 %v7011_v44  ;;  %v7740_v44 = vld [vmem:[#allocation6 + $0x440] ss:$16 sps:$4 sm:$0xff]  }
 0x2c0   : > { %3821 = vmatprep.subr.bf16.mxu1 %v7020_v36  ;;  %v7713_v36 = vld [vmem:[#allocation6 + $0x68] ss:$16 sps:$4 sm:$0xff]  }
 0x2c1   : > { %5500 = vmatpush1.bf16.msra.mxu0 %v7686_v45  ;;  %v7748_v45 = vld [vmem:[#allocation6 + $0x464] ss:$16 sps:$4 sm:$0xff]  }
 0x2c2   : > { %5501 = vmatprep.subr.bf16.mxu0 %v7691_v33  ;;  %v7718_v33 = vld [vmem:[#allocation6 + $0x8c] ss:$16 sps:$4 sm:$0xff]  }
 0x2c3   : > { %3822 = vmatpush1.bf16.msra.mxu1 %v7019_v48  ;;  %v7721_v48 = vld [vmem:[#allocation6 + $0xac] ss:$16 sps:$4 sm:$0xff]  }
 0x2c4   : > { %3823 = vmatprep.subr.bf16.mxu1 %v7028_v51  ;;  %v7760_v51 = vld [vmem:[#allocation6 + $0x4a4] ss:$16 sps:$4 sm:$0xff]  }
 0x2c5   : > { %5502 = vmatpush1.bf16.msra.mxu0 %v7689_v50  ;;  %v7752_v50 = vld [vmem:[#allocation6 + $0x480] ss:$16 sps:$4 sm:$0xff]  }
 0x2c6   : > { %5503 = vmatprep.subr.bf16.mxu0 %v7694_v16  ;;  %v7719_v16 = vld [vmem:[#allocation6 + $0xa8] ss:$16 sps:$4 sm:$0xff]  }
 0x2c7   : > { %3824 = vmatpush1.bf16.msra.mxu1 %v7027_v60  ;;  %v7766_v60 = vld [vmem:[#allocation6 + $0x4c4] ss:$16 sps:$4 sm:$0xff]  }
 0x2c8   : > { %3825 = vmatprep.subr.bf16.mxu1 %v7036_v1  ;;  %v7727_v1 = vld [vmem:[#allocation6 + $0xec] ss:$16 sps:$4 sm:$0xff]  }
 0x2c9   : > { %5504 = vmatpush1.bf16.msra.mxu0 %v7692_v63  ;;  %v3521_v10 = vpop.f32.mrb[4].mxu1  ;;  %v7722_v63 = vld [vmem:[#allocation6 + $0xc8] ss:$16 sps:$4 sm:$0xff]  }
 0x2ca   : > { %5505 = vmatprep.subr.bf16.mxu0 %v7697_v2  ;;  %v7418_v13 = vadd.f32 %v3521_v10, %v906_v4  ;;  %v3523_v14 = vpop.f32.mrb[5].mxu1  ;;  %v7764_v2 = vld [vmem:[#allocation6 + $0x4c0] ss:$16 sps:$4 sm:$0xff]   ;;  %v7733_v4 = vld [vmem:[#allocation6 + $0x10c] ss:$16 sps:$4 sm:$0xff]  }
 0x2cb   : > { %v7419_v15 = vadd.f32 %v3523_v14, %v910_v5  ;;  %v3525_v17 = vpop.f32.mrb[6].mxu1  ;;  %3826 = vmatpush1.bf16.msra.mxu1 %v7035_v28  ;;  %v7770_v5 = vld [vmem:[#allocation6 + $0x4e0] ss:$16 sps:$4 sm:$0xff]   ;;  %v7778_v28 = vld [vmem:[#allocation6 + $0x504] ss:$16 sps:$4 sm:$0xff]  }
 0x2cc   : > { %v3526_v20 = vpop.f32.mrb[7].mxu1  ;;  %3827 = vmatprep.subr.bf16.mxu1 %v7044_v9  ;;  %v3858_v24 = vmul.f32 0.2, %v7418_v13  ;;  %v7739_v9 = vld [vmem:[#allocation6 + $0x12c] ss:$16 sps:$4 sm:$0xff]  }
 0x2cd   : > { %5506 = vmatpush1.bf16.msra.mxu0 %v7695_v6  ;;  %v3859_v25 = vmul.f32 0.2, %v7419_v15  ;;  %v7731_v6 = vld [vmem:[#allocation6 + $0x108] ss:$16 sps:$4 sm:$0xff]   ;;  %v7776_v10 = vld [vmem:[#allocation6 + $0x500] ss:$16 sps:$4 sm:$0xff]  }
 0x2ce   : > { %5507 = vmatprep.subr.bf16.mxu0 %v7700_v11  ;;  %v3866_v30 = vmax.f32 %v7418_v13, %v3858_v24  ;;  %v7784_v11 = vld [vmem:[#allocation6 + $0x524] ss:$16 sps:$4 sm:$0xff]   ;;  %v7782_v13 = vld [vmem:[#allocation6 + $0x520] ss:$16 sps:$4 sm:$0xff]   ;;  %v7751_v17 = vld [vmem:[#allocation6 + $0x16c] ss:$16 sps:$4 sm:$0xff]  }
 0x2cf   : > { %v3867_v53 = vmax.f32 %v7419_v15, %v3859_v25  ;;  %3828 = vmatpush1.bf16.msra.mxu1 %v7043_v18  ;;  %v7790_v14 = vld [vmem:[#allocation6 + $0x544] ss:$16 sps:$4 sm:$0xff]   ;;  %v7743_v15 = vld [vmem:[#allocation6 + $0x148] ss:$16 sps:$4 sm:$0xff]   ;;  %v7788_v18 = vld [vmem:[#allocation6 + $0x540] ss:$16 sps:$4 sm:$0xff]  }
 0x2d0   : > { %3829 = vmatprep.subr.bf16.mxu1 %v7052_v23  ;;  %v8771_v37 = vpack.c.bf16 %v3866_v30, %v3866_v30  ;;  %v7796_v20 = vld [vmem:[#allocation6 + $0x564] ss:$16 sps:$4 sm:$0xff]   ;;  %v7757_v23 = vld [vmem:[#allocation6 + $0x18c] ss:$16 sps:$4 sm:$0xff]   ;;  %v7794_v24 = vld [vmem:[#allocation6 + $0x560] ss:$16 sps:$4 sm:$0xff]  }
 0x2d1   : > { %5508 = vmatpush1.bf16.msra.mxu0 %v7698_v7  ;;  %v8768_v31 = vpack.c.bf16 %v3867_v53, %v3867_v53  ;;  %v7749_v7 = vld [vmem:[#allocation6 + $0x168] ss:$16 sps:$4 sm:$0xff]   ;;  %v7802_v25 = vld [vmem:[#allocation6 + $0x584] ss:$16 sps:$4 sm:$0xff]   ;;  %v7763_v53 = vld [vmem:[#allocation6 + $0x1ac] ss:$16 sps:$4 sm:$0xff]  }
 0x2d2   : > { %5509 = vmatprep.subr.bf16.mxu0 %v7703_v26  ;;  %v7755_v26 = vld [vmem:[#allocation6 + $0x188] ss:$16 sps:$4 sm:$0xff]   ;;  %v7769_v30 = vld [vmem:[#allocation6 + $0x1cc] ss:$16 sps:$4 sm:$0xff]  }
 0x2d3   : > { %3830 = vmatpush1.bf16.msra.mxu1 %v7051_v27  ;;  %5511 = vmatprep.mubr.bf16.mxu0 %v8768_v31  ;;  %v7800_v27 = vld [vmem:[#allocation6 + $0x580] ss:$16 sps:$4 sm:$0xff]  }
 0x2d4   : > { %5602 = vmatprep.subr.bf16.mxu1 %v7706_v29  ;;  %v7761_v29 = vld [vmem:[#allocation6 + $0x1a8] ss:$16 sps:$4 sm:$0xff]  }
 0x2d5   : > { %5510 = vmatpush1.bf16.msra.mxu0 %v7701_v54  ;;  %v7808_v54 = vld [vmem:[#allocation6 + $0x5a4] ss:$16 sps:$4 sm:$0xff]  }
 0x2d6   : > { %5520 = vmatprep.subr.bf16.mxu0 %v7730_v32  ;;  %3848 = vmatmul.mubr.bf16.vlgmr.msra.gmra.mrb[8].mxu1 %v8109_v39  ;;  %v7806_v32 = vld [vmem:[#allocation6 + $0x5a0] ss:$16 sps:$4 sm:$0xff]  }
 0x2d7   : > { %5603 = vmatpush1.bf16.msra.mxu1 %v7704_v34  ;;  %5634 = vmatprep.mubr.bf16.mxu1 %v8747_v0  ;;  %v7746_v0 = vld [vmem:[#allocation6 + $0x460] ss:$16 sps:$4 sm:$0xff]   ;;  %v7814_v34 = vld [vmem:[#allocation6 + $0x5c4] ss:$16 sps:$4 sm:$0xff]  }
 0x2d8   : > { %5512 = vmatmul.mubr.bf16.vlgmr.msra.gmra.mrb[8].mxu0 %v8771_v37  ;;  %5604 = vmatprep.subr.bf16.mxu1 %v7709_v35  ;;  %v7767_v35 = vld [vmem:[#allocation6 + $0x1c8] ss:$16 sps:$4 sm:$0xff]   ;;  %v7812_v39 = vld [vmem:[#allocation6 + $0x5c0] ss:$16 sps:$4 sm:$0xff]  }
 0x2d9   : > { %5521 = vmatpush1.bf16.msra.mxu0 %v7728_v38  ;;  %v7775_v38 = vld [vmem:[#allocation6 + $0x1ec] ss:$16 sps:$4 sm:$0xff]  }
 0x2da   : > { %5522 = vmatprep.subr.bf16.mxu0 %v7736_v40  ;;  %v7820_v40 = vld [vmem:[#allocation6 + $0x5e4] ss:$16 sps:$4 sm:$0xff]  }
 0x2db   : > { %5605 = vmatpush1.bf16.msra.mxu1 %v7707_v41  ;;  %v7773_v41 = vld [vmem:[#allocation6 + $0x1e8] ss:$16 sps:$4 sm:$0xff]  }
 0x2dc   : > { %5606 = vmatprep.subr.bf16.mxu1 %v7712_v47  ;;  %v7781_v47 = vld [vmem:[#allocation6 + $0x20c] ss:$16 sps:$4 sm:$0xff]  }
 0x2dd   : > { %5523 = vmatpush1.bf16.msra.mxu0 %v7734_v42  ;;  %v7818_v42 = vld [vmem:[#allocation6 + $0x5e0] ss:$16 sps:$4 sm:$0xff]  }
 0x2de   : > { %5524 = vmatprep.subr.bf16.mxu0 %v7742_v19  ;;  %v7874_v19 = vld [vmem:[#allocation6 + $0x604] ss:$16 sps:$4 sm:$0xff]  }
 0x2df   : > { %5607 = vmatpush1.bf16.msra.mxu1 %v7710_v58  ;;  %v7779_v58 = vld [vmem:[#allocation6 + $0x208] ss:$16 sps:$4 sm:$0xff]  }
 0x2e0   : > { %5608 = vmatprep.subr.bf16.mxu1 %v7715_v52  ;;  %v7787_v52 = vld [vmem:[#allocation6 + $0x22c] ss:$16 sps:$4 sm:$0xff]  }
 0x2e1   : > { %5525 = vmatpush1.bf16.msra.mxu0 %v7740_v44  ;;  %v7785_v44 = vld [vmem:[#allocation6 + $0x228] ss:$16 sps:$4 sm:$0xff]  }
 0x2e2   : > { %5526 = vmatprep.subr.bf16.mxu0 %v7748_v45  ;;  %v7793_v45 = vld [vmem:[#allocation6 + $0x24c] ss:$16 sps:$4 sm:$0xff]  }
 0x2e3   : > { %5609 = vmatpush1.bf16.msra.mxu1 %v7713_v36  ;;  %v7791_v36 = vld [vmem:[#allocation6 + $0x248] ss:$16 sps:$4 sm:$0xff]  }
 0x2e4   : > { %5610 = vmatprep.subr.bf16.mxu1 %v7718_v33  ;;  %v7799_v33 = vld [vmem:[#allocation6 + $0x26c] ss:$16 sps:$4 sm:$0xff]  }
 0x2e5   : > { %5527 = vmatpush1.bf16.msra.mxu0 %v7746_v0  ;;  %v7797_v0 = vld [vmem:[#allocation6 + $0x268] ss:$16 sps:$4 sm:$0xff]  }
 0x2e6   : > { %5528 = vmatprep.subr.bf16.mxu0 %v7754_v46  ;;  %v7805_v46 = vld [vmem:[#allocation6 + $0x28c] ss:$16 sps:$4 sm:$0xff]  }
 0x2e7   : > { %5611 = vmatpush1.bf16.msra.mxu1 %v7716_v49  ;;  %v7803_v49 = vld [vmem:[#allocation6 + $0x288] ss:$16 sps:$4 sm:$0xff]  }
 0x2e8   : > { %5612 = vmatprep.subr.bf16.mxu1 %v7721_v48  ;;  %v913_v48 = vsub.s32 4, %v8729_v57 }
 0x2e9   : > { %5529 = vmatpush1.bf16.msra.mxu0 %v7752_v50  ;;  %v7811_v50 = vld [vmem:[#allocation6 + $0x2ac] ss:$16 sps:$4 sm:$0xff]  }
 0x2ea   : > { %5530 = vmatprep.subr.bf16.mxu0 %v7760_v51 }
 0x2eb   : > { %5613 = vmatpush1.bf16.msra.mxu1 %v7719_v16  ;;  %v7809_v16 = vld [vmem:[#allocation6 + $0x2a8] ss:$16 sps:$4 sm:$0xff]  }
 0x2ec   : > { %5614 = vmatprep.subr.bf16.mxu1 %v7724_v55 }
 0x2ed   : > { %5531 = vmatpush1.bf16.msra.mxu0 %v7758_v56  ;;  %v7817_v56 = vld [vmem:[#allocation6 + $0x2cc] ss:$16 sps:$4 sm:$0xff]  }
 0x2ee   : > { %5532 = vmatprep.subr.bf16.mxu0 %v7766_v60 }
 0x2ef   : > { %5615 = vmatpush1.bf16.msra.mxu1 %v7722_v63 }
 0x2f0   : > { %5616 = vmatprep.subr.bf16.mxu1 %v7727_v1 }
 0x2f1   : > { %5533 = vmatpush1.bf16.msra.mxu0 %v7764_v2  ;;  %v7815_v2 = vld [vmem:[#allocation6 + $0x2c8] ss:$16 sps:$4 sm:$0xff]  }
 0x2f2   : > { %5534 = vmatprep.subr.bf16.mxu0 %v7772_v61 }
 0x2f3   : > { %5617 = vmatpush1.bf16.msra.mxu1 %v7725_v21 }
 0x2f4   : > { %5618 = vmatprep.subr.bf16.mxu1 %v7733_v4  ;;  %v7823_v4 = vld [vmem:[#allocation6 + $0x2ec] ss:$16 sps:$4 sm:$0xff]  }
 0x2f5   : > { %5535 = vmatpush1.bf16.msra.mxu0 %v7770_v5 }
 0x2f6   : > { %5536 = vmatprep.subr.bf16.mxu0 %v7778_v28 }
 0x2f7   : > { %5619 = vmatpush1.bf16.msra.mxu1 %v7731_v6 }
 0x2f8   : > { %5620 = vmatprep.subr.bf16.mxu1 %v7739_v9 }
 0x2f9   : > { %5537 = vmatpush1.bf16.msra.mxu0 %v7776_v10  ;;  %v7821_v10 = vld [vmem:[#allocation6 + $0x2e8] ss:$16 sps:$4 sm:$0xff]  }
 0x2fa   : > { %5538 = vmatprep.subr.bf16.mxu0 %v7784_v11 }
 0x2fb   : > { %5621 = vmatpush1.bf16.msra.mxu1 %v7737_v22  ;;  %v7826_v22 = vld [vmem:[#allocation6 + $0x30c] ss:$16 sps:$4 sm:$0xff]  }
 0x2fc   : > { %5622 = vmatprep.subr.bf16.mxu1 %v7745_v12 }
 0x2fd   : > { %5539 = vmatpush1.bf16.msra.mxu0 %v7782_v13  ;;  %v7872_v13 = vld [vmem:[#allocation6 + $0x600] ss:$16 sps:$4 sm:$0xff]  }
 0x2fe   : > { %5540 = vmatprep.subr.bf16.mxu0 %v7790_v14 }
 0x2ff   : > { %5623 = vmatpush1.bf16.msra.mxu1 %v7743_v15  ;;  %v7824_v15 = vld [vmem:[#allocation6 + $0x308] ss:$16 sps:$4 sm:$0xff]  }
 0x300   : > { %5624 = vmatprep.subr.bf16.mxu1 %v7751_v17  ;;  %v7880_v17 = vld [vmem:[#allocation6 + $0x624] ss:$16 sps:$4 sm:$0xff]  }
 0x301   : > { %5541 = vmatpush1.bf16.msra.mxu0 %v7788_v18  ;;  %v7829_v18 = vld [vmem:[#allocation6 + $0x32c] ss:$16 sps:$4 sm:$0xff]  }
 0x302   : > { %5542 = vmatprep.subr.bf16.mxu0 %v7796_v20  ;;  %v7878_v20 = vld [vmem:[#allocation6 + $0x620] ss:$16 sps:$4 sm:$0xff]  }
 0x303   : > { %5625 = vmatpush1.bf16.msra.mxu1 %v7749_v7  ;;  %v7827_v7 = vld [vmem:[#allocation6 + $0x328] ss:$16 sps:$4 sm:$0xff]  }
 0x304   : > { %5626 = vmatprep.subr.bf16.mxu1 %v7757_v23  ;;  %v7886_v23 = vld [vmem:[#allocation6 + $0x644] ss:$16 sps:$4 sm:$0xff]  }
 0x305   : > { %5543 = vmatpush1.bf16.msra.mxu0 %v7794_v24  ;;  %v7832_v24 = vld [vmem:[#allocation6 + $0x34c] ss:$16 sps:$4 sm:$0xff]  }
 0x306   : > { %5544 = vmatprep.subr.bf16.mxu0 %v7802_v25  ;;  %v7884_v25 = vld [vmem:[#allocation6 + $0x640] ss:$16 sps:$4 sm:$0xff]  }
 0x307   : > { %5627 = vmatpush1.bf16.msra.mxu1 %v7755_v26  ;;  %v7830_v26 = vld [vmem:[#allocation6 + $0x348] ss:$16 sps:$4 sm:$0xff]  }
 0x308   : > { %5628 = vmatprep.subr.bf16.mxu1 %v7763_v53  ;;  %v7892_v53 = vld [vmem:[#allocation6 + $0x664] ss:$16 sps:$4 sm:$0xff]  }
 0x309   : > { %5545 = vmatpush1.bf16.msra.mxu0 %v7800_v27  ;;  %v7835_v27 = vld [vmem:[#allocation6 + $0x36c] ss:$16 sps:$4 sm:$0xff]  }
 0x30a   : > { %5546 = vmatprep.subr.bf16.mxu0 %v7808_v54  ;;  %v7890_v54 = vld [vmem:[#allocation6 + $0x660] ss:$16 sps:$4 sm:$0xff]  }
 0x30b   : > { %5629 = vmatpush1.bf16.msra.mxu1 %v7761_v29  ;;  %v7833_v29 = vld [vmem:[#allocation6 + $0x368] ss:$16 sps:$4 sm:$0xff]  }
 0x30c   : > { %5630 = vmatprep.subr.bf16.mxu1 %v7769_v30  ;;  %v7898_v30 = vld [vmem:[#allocation6 + $0x684] ss:$16 sps:$4 sm:$0xff]  }
 0x30d   : > { %5547 = vmatpush1.bf16.msra.mxu0 %v7806_v32  ;;  %v7838_v32 = vld [vmem:[#allocation6 + $0x38c] ss:$16 sps:$4 sm:$0xff]  }
 0x30e   : > { %5548 = vmatprep.subr.bf16.mxu0 %v7814_v34  ;;  %v7896_v34 = vld [vmem:[#allocation6 + $0x680] ss:$16 sps:$4 sm:$0xff]  }
 0x30f   : > { %5631 = vmatpush1.bf16.msra.mxu1 %v7767_v35  ;;  %v7836_v35 = vld [vmem:[#allocation6 + $0x388] ss:$16 sps:$4 sm:$0xff]  }
 0x310   : > { %5632 = vmatprep.subr.bf16.mxu1 %v7775_v38  ;;  %v7904_v38 = vld [vmem:[#allocation6 + $0x6a4] ss:$16 sps:$4 sm:$0xff]  }
 0x311   : > { %5549 = vmatpush1.bf16.msra.mxu0 %v7812_v39  ;;  %v7841_v39 = vld [vmem:[#allocation6 + $0x3ac] ss:$16 sps:$4 sm:$0xff]  }
 0x312   : > { %5550 = vmatprep.subr.bf16.mxu0 %v7820_v40  ;;  %v7902_v40 = vld [vmem:[#allocation6 + $0x6a0] ss:$16 sps:$4 sm:$0xff]  }
 0x313   : > { %5633 = vmatpush1.bf16.msra.mxu1 %v7773_v41  ;;  %v7839_v41 = vld [vmem:[#allocation6 + $0x3a8] ss:$16 sps:$4 sm:$0xff]  }
 0x314   : > { %5643 = vmatprep.subr.bf16.mxu1 %v7781_v47  ;;  %v7910_v47 = vld [vmem:[#allocation6 + $0x6c4] ss:$16 sps:$4 sm:$0xff]  }
 0x315   : > { %5551 = vmatpush1.bf16.msra.mxu0 %v7818_v42  ;;  %v7844_v42 = vld [vmem:[#allocation6 + $0x3cc] ss:$16 sps:$4 sm:$0xff]  }
 0x316   : > { %5635 = vmatmul.mubr.bf16.vlgmr.msra.gmra.mrb[12].mxu1 %v8755_v43  ;;  %5561 = vmatprep.subr.bf16.mxu0 %v7874_v19  ;;  %v917_v43 = vsub.s32 5, %v8729_v57  ;;  %v7908_v19 = vld [vmem:[#allocation6 + $0x6c0] ss:$16 sps:$4 sm:$0xff]  }
 0x317   : > { %5644 = vmatpush1.bf16.msra.mxu1 %v7779_v58  ;;  %5675 = vmatprep.mubr.bf16.mxu1 %v8768_v31  ;;  %v8780_v31 = vld [vmem:[#allocation4] sm:$0xff] }
 0x318   : > { %5645 = vmatprep.subr.bf16.mxu1 %v7787_v52  ;;  %v914_v51 = vrot.slane %v8780_v31, %v913_v48  ;;  %v918_v55 = vrot.slane %v8780_v31, %v917_v43  ;;  %v7842_v58 = vld [vmem:[#allocation6 + $0x3c8] ss:$16 sps:$4 sm:$0xff]   ;;  %v7916_v52 = vld [vmem:[#allocation6 + $0x6e4] ss:$16 sps:$4 sm:$0xff]   ;;  %v7853_v48 = vld [vmem:[#allocation6 + $0x42c] ss:$16 sps:$4 sm:$0xff]  }
 0x319   : > { %v7928_v43 = vld [vmem:[#allocation6 + $0x724] ss:$16 sps:$4 sm:$0xff]  }
 0x31b   : > { %5646 = vmatpush1.bf16.msra.mxu1 %v7785_v44  ;;  %v7847_v44 = vld [vmem:[#allocation6 + $0x3ec] ss:$16 sps:$4 sm:$0xff]  }
 0x31c   : > { %5647 = vmatprep.subr.bf16.mxu1 %v7793_v45  ;;  %v7914_v45 = vld [vmem:[#allocation6 + $0x6e0] ss:$16 sps:$4 sm:$0xff]  }
 0x31f   : > { %5648 = vmatpush1.bf16.msra.mxu1 %v7791_v36  ;;  %v7845_v36 = vld [vmem:[#allocation6 + $0x3e8] ss:$16 sps:$4 sm:$0xff]  }
 0x320   : > { %5649 = vmatprep.subr.bf16.mxu1 %v7799_v33  ;;  %v7922_v33 = vld [vmem:[#allocation6 + $0x704] ss:$16 sps:$4 sm:$0xff]  }
 0x323   : > { %5650 = vmatpush1.bf16.msra.mxu1 %v7797_v0  ;;  %v7850_v0 = vld [vmem:[#allocation6 + $0x40c] ss:$16 sps:$4 sm:$0xff]  }
 0x324   : > { %5651 = vmatprep.subr.bf16.mxu1 %v7805_v46  ;;  %v7920_v46 = vld [vmem:[#allocation6 + $0x700] ss:$16 sps:$4 sm:$0xff]  }
 0x327   : > { %5652 = vmatpush1.bf16.msra.mxu1 %v7803_v49  ;;  %v7848_v49 = vld [vmem:[#allocation6 + $0x408] ss:$16 sps:$4 sm:$0xff]  }
 0x328   : > { %5653 = vmatprep.subr.bf16.mxu1 %v7811_v50  ;;  %v7926_v50 = vld [vmem:[#allocation6 + $0x720] ss:$16 sps:$4 sm:$0xff]  }
 0x32b   : > { %v3685_v60 = vpop.f32.mrb[4].mxu0  ;;  %5654 = vmatpush1.bf16.msra.mxu1 %v7809_v16  ;;  %v7934_v16 = vld [vmem:[#allocation6 + $0x744] ss:$16 sps:$4 sm:$0xff]  }
 0x32c   : > { %v7420_v63 = vadd.f32 %v3685_v60, %v914_v51  ;;  %v3687_v1 = vpop.f32.mrb[5].mxu0  ;;  %5655 = vmatprep.subr.bf16.mxu1 %v7817_v56  ;;  %v7851_v51 = vld [vmem:[#allocation6 + $0x428] ss:$16 sps:$4 sm:$0xff]   ;;  %v7932_v56 = vld [vmem:[#allocation6 + $0x740] ss:$16 sps:$4 sm:$0xff]  }
 0x32d   : > { %v7421_v61 = vadd.f32 %v3687_v1, %v918_v55  ;;  %v3689_v21 = vpop.f32.mrb[6].mxu0  ;;  %v7856_v55 = vld [vmem:[#allocation6 + $0x44c] ss:$16 sps:$4 sm:$0xff]   ;;  %v7854_v60 = vld [vmem:[#allocation6 + $0x448] ss:$16 sps:$4 sm:$0xff]  }
 0x32e   : > { %v3860_v5 = vmul.f32 0.2, %v7420_v63  ;;  %v3690_v28 = vpop.f32.mrb[7].mxu0  ;;  %v7859_v1 = vld [vmem:[#allocation6 + $0x46c] ss:$16 sps:$4 sm:$0xff]  }
 0x32f   : > { %v3861_v6 = vmul.f32 0.2, %v7421_v61  ;;  %5656 = vmatpush1.bf16.msra.mxu1 %v7815_v2  ;;  %v7857_v2 = vld [vmem:[#allocation6 + $0x468] ss:$16 sps:$4 sm:$0xff]   ;;  %v7862_v21 = vld [vmem:[#allocation6 + $0x48c] ss:$16 sps:$4 sm:$0xff]  }
 0x330   : > { %v3868_v9 = vmax.f32 %v7420_v63, %v3860_v5  ;;  %5657 = vmatprep.subr.bf16.mxu1 %v7823_v4  ;;  %v7940_v63 = vld [vmem:[#allocation6 + $0x764] ss:$16 sps:$4 sm:$0xff]   ;;  %v7944_v4 = vld [vmem:[#allocation6 + $0x780] ss:$16 sps:$4 sm:$0xff]   ;;  %v7860_v5 = vld [vmem:[#allocation6 + $0x488] ss:$16 sps:$4 sm:$0xff]  }
 0x331   : > { %v3869_v11 = vmax.f32 %v7421_v61, %v3861_v6  ;;  %v7946_v61 = vld [vmem:[#allocation6 + $0x784] ss:$16 sps:$4 sm:$0xff]   ;;  %v7865_v6 = vld [vmem:[#allocation6 + $0x4ac] ss:$16 sps:$4 sm:$0xff]  }
 0x332   : > { %v8786_v14 = vpack.c.bf16 %v3868_v9, %v3868_v9  ;;  %v7952_v28 = vld [vmem:[#allocation6 + $0x7a4] ss:$16 sps:$4 sm:$0xff]   ;;  %v7950_v9 = vld [vmem:[#allocation6 + $0x7a0] ss:$16 sps:$4 sm:$0xff]  }
 0x333   : > { %v8784_v12 = vpack.c.bf16 %v3869_v11, %v3869_v11  ;;  %5658 = vmatpush1.bf16.msra.mxu1 %v7821_v10  ;;  %v7863_v10 = vld [vmem:[#allocation6 + $0x4a8] ss:$16 sps:$4 sm:$0xff]   ;;  %v7958_v11 = vld [vmem:[#allocation6 + $0x7c4] ss:$16 sps:$4 sm:$0xff]  }
 0x334   : > { %5659 = vmatprep.subr.bf16.mxu1 %v7826_v22  ;;  %v7868_v22 = vld [vmem:[#allocation6 + $0x4cc] ss:$16 sps:$4 sm:$0xff]  }
 0x335   : > { %5552 = vmatprep.mubr.bf16.mxu0 %v8784_v12 }
 0x336   : > { %5553 = vmatmul.mubr.bf16.vlgmr.msra.gmra.mrb[8].mxu0 %v8786_v14 }
 0x337   : > { %5562 = vmatpush1.bf16.msra.mxu0 %v7872_v13  ;;  %5660 = vmatpush1.bf16.msra.mxu1 %v7824_v15  ;;  %v7866_v13 = vld [vmem:[#allocation6 + $0x4c8] ss:$16 sps:$4 sm:$0xff]   ;;  %v7964_v15 = vld [vmem:[#allocation6 + $0x7e4] ss:$16 sps:$4 sm:$0xff]  }
 0x338   : > { %5563 = vmatprep.subr.bf16.mxu0 %v7880_v17  ;;  %5661 = vmatprep.subr.bf16.mxu1 %v7829_v18  ;;  %v7871_v17 = vld [vmem:[#allocation6 + $0x4ec] ss:$16 sps:$4 sm:$0xff]   ;;  %v7962_v18 = vld [vmem:[#allocation6 + $0x7e0] ss:$16 sps:$4 sm:$0xff]  }
 0x33b   : > { %5564 = vmatpush1.bf16.msra.mxu0 %v7878_v20  ;;  %5662 = vmatpush1.bf16.msra.mxu1 %v7827_v7  ;;  %v7869_v20 = vld [vmem:[#allocation6 + $0x4e8] ss:$16 sps:$4 sm:$0xff]  }
 0x33c   : > { %5565 = vmatprep.subr.bf16.mxu0 %v7886_v23  ;;  %5663 = vmatprep.subr.bf16.mxu1 %v7832_v24  ;;  %v7994_v7 = vld [vmem:[#allocation9 + $0x4] ss:$8 sps:$4 sm:$0xff]   ;;  %v7877_v23 = vld [vmem:[#allocation6 + $0x50c] ss:$16 sps:$4 sm:$0xff]  }
 0x33d   : > { %v7875_v24 = vld [vmem:[#allocation6 + $0x508] ss:$16 sps:$4 sm:$0xff]  }
 0x33f   : > { %5566 = vmatpush1.bf16.msra.mxu0 %v7884_v25  ;;  %5664 = vmatpush1.bf16.msra.mxu1 %v7830_v26  ;;  %v7883_v25 = vld [vmem:[#allocation6 + $0x52c] ss:$16 sps:$4 sm:$0xff]   ;;  %v7881_v26 = vld [vmem:[#allocation6 + $0x528] ss:$16 sps:$4 sm:$0xff]  }
 0x340   : > { %5567 = vmatprep.subr.bf16.mxu0 %v7892_v53  ;;  %5665 = vmatprep.subr.bf16.mxu1 %v7835_v27  ;;  %v7889_v53 = vld [vmem:[#allocation6 + $0x54c] ss:$16 sps:$4 sm:$0xff]   ;;  %v7887_v27 = vld [vmem:[#allocation6 + $0x548] ss:$16 sps:$4 sm:$0xff]  }
 0x343   : > { %5568 = vmatpush1.bf16.msra.mxu0 %v7890_v54  ;;  %5666 = vmatpush1.bf16.msra.mxu1 %v7833_v29  ;;  %v7895_v54 = vld [vmem:[#allocation6 + $0x56c] ss:$16 sps:$4 sm:$0xff]   ;;  %v7893_v29 = vld [vmem:[#allocation6 + $0x568] ss:$16 sps:$4 sm:$0xff]  }
 0x344   : > { %5569 = vmatprep.subr.bf16.mxu0 %v7898_v30  ;;  %5667 = vmatprep.subr.bf16.mxu1 %v7838_v32  ;;  %v7901_v30 = vld [vmem:[#allocation6 + $0x58c] ss:$16 sps:$4 sm:$0xff]   ;;  %v7899_v32 = vld [vmem:[#allocation6 + $0x588] ss:$16 sps:$4 sm:$0xff]  }
 0x347   : > { %5570 = vmatpush1.bf16.msra.mxu0 %v7896_v34  ;;  %5668 = vmatpush1.bf16.msra.mxu1 %v7836_v35  ;;  %v7907_v34 = vld [vmem:[#allocation6 + $0x5ac] ss:$16 sps:$4 sm:$0xff]   ;;  %v7905_v35 = vld [vmem:[#allocation6 + $0x5a8] ss:$16 sps:$4 sm:$0xff]  }
 0x348   : > { %5571 = vmatprep.subr.bf16.mxu0 %v7904_v38  ;;  %5669 = vmatprep.subr.bf16.mxu1 %v7841_v39  ;;  %v7913_v38 = vld [vmem:[#allocation6 + $0x5cc] ss:$16 sps:$4 sm:$0xff]   ;;  %v7911_v39 = vld [vmem:[#allocation6 + $0x5c8] ss:$16 sps:$4 sm:$0xff]  }
 0x34b   : > { %5572 = vmatpush1.bf16.msra.mxu0 %v7902_v40  ;;  %5670 = vmatpush1.bf16.msra.mxu1 %v7839_v41  ;;  %v7919_v40 = vld [vmem:[#allocation6 + $0x5ec] ss:$16 sps:$4 sm:$0xff]   ;;  %v7917_v41 = vld [vmem:[#allocation6 + $0x5e8] ss:$16 sps:$4 sm:$0xff]  }
 0x34c   : > { %5573 = vmatprep.subr.bf16.mxu0 %v7910_v47  ;;  %5671 = vmatprep.subr.bf16.mxu1 %v7844_v42  ;;  %v7925_v47 = vld [vmem:[#allocation6 + $0x60c] ss:$16 sps:$4 sm:$0xff]   ;;  %v7923_v42 = vld [vmem:[#allocation6 + $0x608] ss:$16 sps:$4 sm:$0xff]  }
 0x34f   : > { %5574 = vmatpush1.bf16.msra.mxu0 %v7908_v19  ;;  %5672 = vmatpush1.bf16.msra.mxu1 %v7842_v58  ;;  %v7931_v19 = vld [vmem:[#allocation6 + $0x62c] ss:$16 sps:$4 sm:$0xff]   ;;  %v7929_v58 = vld [vmem:[#allocation6 + $0x628] ss:$16 sps:$4 sm:$0xff]  }
 0x350   : > { %5575 = vmatprep.subr.bf16.mxu0 %v7916_v52  ;;  %5673 = vmatprep.subr.bf16.mxu1 %v7847_v44  ;;  %v7937_v52 = vld [vmem:[#allocation6 + $0x64c] ss:$16 sps:$4 sm:$0xff]   ;;  %v7935_v44 = vld [vmem:[#allocation6 + $0x648] ss:$16 sps:$4 sm:$0xff]  }
 0x353   : > { %5576 = vmatpush1.bf16.msra.mxu0 %v7914_v45  ;;  %5674 = vmatpush1.bf16.msra.mxu1 %v7845_v36  ;;  %v7943_v45 = vld [vmem:[#allocation6 + $0x66c] ss:$16 sps:$4 sm:$0xff]   ;;  %v7941_v36 = vld [vmem:[#allocation6 + $0x668] ss:$16 sps:$4 sm:$0xff]  }
 0x354   : > { %5577 = vmatprep.subr.bf16.mxu0 %v7922_v33  ;;  %5684 = vmatprep.subr.bf16.mxu1 %v7850_v0  ;;  %v7949_v33 = vld [vmem:[#allocation6 + $0x68c] ss:$16 sps:$4 sm:$0xff]   ;;  %v921_v0 = vsub.s32 6, %v8729_v57 }
 0x356   : > { %5676 = vmatmul.mubr.bf16.vlgmr.msra.gmra.mrb[12].mxu1 %v8771_v37  ;;  %v7938_v37 = vld [vmem:[#allocation6 + $0x760] ss:$16 sps:$4 sm:$0xff]  }
 0x357   : > { %5578 = vmatpush1.bf16.msra.mxu0 %v7920_v46  ;;  %5685 = vmatpush1.bf16.msra.mxu1 %v7848_v49  ;;  %v7947_v46 = vld [vmem:[#allocation6 + $0x688] ss:$16 sps:$4 sm:$0xff]   ;;  %v925_v49 = vsub.s32 7, %v8729_v57 }
 0x358   : > { %5716 = vmatprep.mubr.bf16.mxu1 %v8784_v12  ;;  %5686 = vmatprep.subr.bf16.mxu1 %v7853_v48  ;;  %v7956_v12 = vld [vmem:[#allocation6 + $0x7c0] ss:$16 sps:$4 sm:$0xff]   ;;  %v922_v48 = vrot.slane %v8780_v31, %v921_v0  ;;  %v8022_v0 = vld [vmem:[#allocation9 + $0xa0] ss:$8 sps:$4 sm:$0xff]  }
 0x359   : > { %5579 = vmatprep.subr.bf16.mxu0 %v7928_v43  ;;  %v926_v43 = vrot.slane %v8780_v31, %v925_v49  ;;  %v8025_v49 = vld [vmem:[#allocation9 + $0xb0] ss:$8 sps:$4 sm:$0xff]  }
 0x35b   : > { %5580 = vmatpush1.bf16.msra.mxu0 %v7926_v50  ;;  %5687 = vmatpush1.bf16.msra.mxu1 %v7851_v51  ;;  %v7953_v50 = vld [vmem:[#allocation6 + $0x6a8] ss:$16 sps:$4 sm:$0xff]   ;;  %v7961_v51 = vld [vmem:[#allocation6 + $0x6cc] ss:$16 sps:$4 sm:$0xff]  }
 0x35c   : > { %5581 = vmatprep.subr.bf16.mxu0 %v7934_v16  ;;  %5688 = vmatprep.subr.bf16.mxu1 %v7856_v55 }
 0x35f   : > { %5582 = vmatpush1.bf16.msra.mxu0 %v7932_v56  ;;  %5689 = vmatpush1.bf16.msra.mxu1 %v7854_v60 }
 0x360   : > { %5583 = vmatprep.subr.bf16.mxu0 %v7940_v63  ;;  %5690 = vmatprep.subr.bf16.mxu1 %v7859_v1  ;;  %v7959_v1 = vld [vmem:[#allocation6 + $0x6c8] ss:$16 sps:$4 sm:$0xff]  }
 0x363   : > { %5584 = vmatpush1.bf16.msra.mxu0 %v7938_v37  ;;  %5691 = vmatpush1.bf16.msra.mxu1 %v7857_v2 }
 0x364   : > { %5585 = vmatprep.subr.bf16.mxu0 %v7946_v61  ;;  %5692 = vmatprep.subr.bf16.mxu1 %v7862_v21  ;;  %v7967_v61 = vld [vmem:[#allocation6 + $0x6ec] ss:$16 sps:$4 sm:$0xff]  }
 0x367   : > { %5586 = vmatpush1.bf16.msra.mxu0 %v7944_v4  ;;  %5693 = vmatpush1.bf16.msra.mxu1 %v7860_v5 }
 0x368   : > { %5587 = vmatprep.subr.bf16.mxu0 %v7952_v28  ;;  %5694 = vmatprep.subr.bf16.mxu1 %v7865_v6  ;;  %v7965_v28 = vld [vmem:[#allocation6 + $0x6e8] ss:$16 sps:$4 sm:$0xff]   ;;  %v7970_v6 = vld [vmem:[#allocation6 + $0x70c] ss:$16 sps:$4 sm:$0xff]  }
 0x36b   : > { %5588 = vmatpush1.bf16.msra.mxu0 %v7950_v9  ;;  %5695 = vmatpush1.bf16.msra.mxu1 %v7863_v10  ;;  %v7992_v9 = vld [vmem:[#allocation9] ss:$8 sps:$4 sm:$0xff]  }
 0x36c   : > { %5589 = vmatprep.subr.bf16.mxu0 %v7958_v11  ;;  %5696 = vmatprep.subr.bf16.mxu1 %v7868_v22  ;;  %v7997_v11 = vld [vmem:[#allocation9 + $0x14] ss:$8 sps:$4 sm:$0xff]  }
 0x36d   : > { %v7968_v22 = vld [vmem:[#allocation6 + $0x708] ss:$16 sps:$4 sm:$0xff]  }
 0x36f   : > { %5590 = vmatpush1.bf16.msra.mxu0 %v7956_v12  ;;  %5697 = vmatpush1.bf16.msra.mxu1 %v7866_v13  ;;  %v7973_v12 = vld [vmem:[#allocation6 + $0x72c] ss:$16 sps:$4 sm:$0xff]  }
 0x370   : > { %5591 = vmatprep.subr.bf16.mxu0 %v7964_v15  ;;  %5698 = vmatprep.subr.bf16.mxu1 %v7871_v17  ;;  %v7995_v13 = vld [vmem:[#allocation9 + $0x10] ss:$8 sps:$4 sm:$0xff]   ;;  %v8000_v15 = vld [vmem:[#allocation9 + $0x24] ss:$8 sps:$4 sm:$0xff]  }
 0x371   : > { %v7971_v17 = vld [vmem:[#allocation6 + $0x728] ss:$16 sps:$4 sm:$0xff]  }
 0x373   : > { %5592 = vmatpush1.bf16.msra.mxu0 %v7962_v18  ;;  %5699 = vmatpush1.bf16.msra.mxu1 %v7869_v20  ;;  %v7976_v18 = vld [vmem:[#allocation6 + $0x74c] ss:$16 sps:$4 sm:$0xff]  }
 0x374   : > { %6174 = vmatprep.subr.bf16.mxu0 %v7994_v7  ;;  %5700 = vmatprep.subr.bf16.mxu1 %v7877_v23  ;;  %v7998_v20 = vld [vmem:[#allocation9 + $0x20] ss:$8 sps:$4 sm:$0xff]   ;;  %v8003_v7 = vld [vmem:[#allocation9 + $0x34] ss:$8 sps:$4 sm:$0xff]  }
 0x375   : > { %v7974_v23 = vld [vmem:[#allocation6 + $0x748] ss:$16 sps:$4 sm:$0xff]  }
 0x377   : > { %5701 = vmatpush1.bf16.msra.mxu1 %v7875_v24  ;;  %v7979_v24 = vld [vmem:[#allocation6 + $0x76c] ss:$16 sps:$4 sm:$0xff]  }
 0x378   : > { %5702 = vmatprep.subr.bf16.mxu1 %v7883_v25  ;;  %v8001_v25 = vld [vmem:[#allocation9 + $0x30] ss:$8 sps:$4 sm:$0xff]  }
 0x37b   : > { %5703 = vmatpush1.bf16.msra.mxu1 %v7881_v26  ;;  %v8006_v26 = vld [vmem:[#allocation9 + $0x44] ss:$8 sps:$4 sm:$0xff]  }
 0x37c   : > { %5704 = vmatprep.subr.bf16.mxu1 %v7889_v53  ;;  %v7977_v53 = vld [vmem:[#allocation6 + $0x768] ss:$16 sps:$4 sm:$0xff]  }
 0x37f   : > { %5705 = vmatpush1.bf16.msra.mxu1 %v7887_v27  ;;  %v7982_v27 = vld [vmem:[#allocation6 + $0x78c] ss:$16 sps:$4 sm:$0xff]  }
 0x380   : > { %5706 = vmatprep.subr.bf16.mxu1 %v7895_v54  ;;  %v8004_v54 = vld [vmem:[#allocation9 + $0x40] ss:$8 sps:$4 sm:$0xff]  }
 0x383   : > { %5707 = vmatpush1.bf16.msra.mxu1 %v7893_v29  ;;  %v8009_v29 = vld [vmem:[#allocation9 + $0x54] ss:$8 sps:$4 sm:$0xff]  }
 0x384   : > { %5708 = vmatprep.subr.bf16.mxu1 %v7901_v30  ;;  %v7980_v30 = vld [vmem:[#allocation6 + $0x788] ss:$16 sps:$4 sm:$0xff]  }
 0x387   : > { %5709 = vmatpush1.bf16.msra.mxu1 %v7899_v32  ;;  %v7985_v32 = vld [vmem:[#allocation6 + $0x7ac] ss:$16 sps:$4 sm:$0xff]  }
 0x388   : > { %5710 = vmatprep.subr.bf16.mxu1 %v7907_v34  ;;  %v8007_v34 = vld [vmem:[#allocation9 + $0x50] ss:$8 sps:$4 sm:$0xff]  }
 0x38b   : > { %5711 = vmatpush1.bf16.msra.mxu1 %v7905_v35  ;;  %v8012_v35 = vld [vmem:[#allocation9 + $0x64] ss:$8 sps:$4 sm:$0xff]  }
 0x38c   : > { %5712 = vmatprep.subr.bf16.mxu1 %v7913_v38  ;;  %v7983_v38 = vld [vmem:[#allocation6 + $0x7a8] ss:$16 sps:$4 sm:$0xff]  }
 0x38f   : > { %5713 = vmatpush1.bf16.msra.mxu1 %v7911_v39  ;;  %v7988_v39 = vld [vmem:[#allocation6 + $0x7cc] ss:$16 sps:$4 sm:$0xff]  }
 0x390   : > { %5714 = vmatprep.subr.bf16.mxu1 %v7919_v40  ;;  %v8010_v40 = vld [vmem:[#allocation9 + $0x60] ss:$8 sps:$4 sm:$0xff]  }
 0x393   : > { %5715 = vmatpush1.bf16.msra.mxu1 %v7917_v41  ;;  %v8015_v41 = vld [vmem:[#allocation9 + $0x74] ss:$8 sps:$4 sm:$0xff]  }
 0x394   : > { %5725 = vmatprep.subr.bf16.mxu1 %v7925_v47  ;;  %v7986_v47 = vld [vmem:[#allocation6 + $0x7c8] ss:$16 sps:$4 sm:$0xff]  }
 0x396   : > { %5717 = vmatmul.mubr.bf16.vlgmr.msra.gmra.mrb[12].mxu1 %v8786_v14  ;;  %v7955_v14 = vld [vmem:[#allocation6 + $0x6ac] ss:$16 sps:$4 sm:$0xff]  }
 0x397   : > { %5726 = vmatpush1.bf16.msra.mxu1 %v7923_v42  ;;  %v7991_v42 = vld [vmem:[#allocation6 + $0x7ec] ss:$16 sps:$4 sm:$0xff]  }
 0x398   : > { %5727 = vmatprep.subr.bf16.mxu1 %v7931_v19  ;;  %v8013_v19 = vld [vmem:[#allocation9 + $0x70] ss:$8 sps:$4 sm:$0xff]  }
 0x39b   : > { %5728 = vmatpush1.bf16.msra.mxu1 %v7929_v58  ;;  %v8018_v58 = vld [vmem:[#allocation9 + $0x84] ss:$8 sps:$4 sm:$0xff]  }
 0x39c   : > { %5729 = vmatprep.subr.bf16.mxu1 %v7937_v52  ;;  %v7989_v52 = vld [vmem:[#allocation6 + $0x7e8] ss:$16 sps:$4 sm:$0xff]  }
 0x39f   : > { %5730 = vmatpush1.bf16.msra.mxu1 %v7935_v44  ;;  %v8016_v44 = vld [vmem:[#allocation9 + $0x80] ss:$8 sps:$4 sm:$0xff]  }
 0x3a0   : > { %5731 = vmatprep.subr.bf16.mxu1 %v7943_v45  ;;  %v8021_v45 = vld [vmem:[#allocation9 + $0x94] ss:$8 sps:$4 sm:$0xff]  }
 0x3a3   : > { %5732 = vmatpush1.bf16.msra.mxu1 %v7941_v36  ;;  %v8019_v36 = vld [vmem:[#allocation9 + $0x90] ss:$8 sps:$4 sm:$0xff]  }
 0x3a4   : > { %5733 = vmatprep.subr.bf16.mxu1 %v7949_v33  ;;  %v8024_v33 = vld [vmem:[#allocation9 + $0xa4] ss:$8 sps:$4 sm:$0xff]  }
 0x3a7   : > { %5734 = vmatpush1.bf16.msra.mxu1 %v7947_v46  ;;  %v8027_v46 = vld [vmem:[#allocation9 + $0xb4] ss:$8 sps:$4 sm:$0xff]  }
 0x3a8   : > { %5735 = vmatprep.subr.bf16.mxu1 %v7955_v14  ;;  %v8030_v14 = vld [vmem:[#allocation9 + $0xc4] ss:$8 sps:$4 sm:$0xff]  }
 0x3a9   : > { %v3849_v16 = vpop.f32.mrb[8].mxu1 }
 0x3aa   : > { %v7422_v55 = vadd.f32 %v3849_v16, %v922_v48  ;;  %v3851_v56 = vpop.f32.mrb[9].mxu1  ;;  %v8028_v48 = vld [vmem:[#allocation9 + $0xc0] ss:$8 sps:$4 sm:$0xff]  }
 0x3ab   : > { %v7423_v60 = vadd.f32 %v3851_v56, %v926_v43  ;;  %v3853_v63 = vpop.f32.mrb[10].mxu1  ;;  %5736 = vmatpush1.bf16.msra.mxu1 %v7953_v50  ;;  %v8033_v43 = vld [vmem:[#allocation9 + $0xd4] ss:$8 sps:$4 sm:$0xff]   ;;  %v8031_v50 = vld [vmem:[#allocation9 + $0xd0] ss:$8 sps:$4 sm:$0xff]  }
 0x3ac   : > { %v3862_v37 = vmul.f32 0.2, %v7422_v55  ;;  %v3854_v2 = vpop.f32.mrb[11].mxu1  ;;  %5737 = vmatprep.subr.bf16.mxu1 %v7961_v51  ;;  %v8036_v51 = vld [vmem:[#allocation9 + $0xe4] ss:$8 sps:$4 sm:$0xff]  }
 0x3ad   : > { %v3863_v21 = vmul.f32 0.2, %v7423_v60  ;;  %v8034_v16 = vld [vmem:[#allocation9 + $0xe0] ss:$8 sps:$4 sm:$0xff]   ;;  %v8037_v56 = vld [vmem:[#allocation9 + $0xf0] ss:$8 sps:$4 sm:$0xff]  }
 0x3ae   : > { %v3870_v4 = vmax.f32 %v7422_v55, %v3862_v37  ;;  %v8039_v55 = vld [vmem:[#allocation9 + $0xf4] ss:$8 sps:$4 sm:$0xff]   ;;  %v8088_v63 = vld [vmem:[#allocation12 + $0x40] sm:$0xff]   ;;  %v8090_v37 = vld [vmem:[#allocation12 + $0x48] sm:$0xff]  }
 0x3af   : > { %v3871_v5 = vmax.f32 %v7423_v60, %v3863_v21  ;;  %5738 = vmatpush1.bf16.msra.mxu1 %v7959_v1  ;;  %v8042_v60 = vld [vmem:[#allocation9 + $0x104] ss:$8 sps:$4 sm:$0xff]   ;;  %v8093_v21 = vld [vmem:[#allocation12 + $0x10] sm:$0xff]  }
 0x3b0   : > { %5739 = vmatprep.subr.bf16.mxu1 %v7967_v61  ;;  %v8797_v10 = vpack.c.bf16 %v3870_v4, %v3870_v4  ;;  %v8089_v1 = vld [vmem:[#allocation12] sm:$0xff]   ;;  %v8091_v2 = vld [vmem:[#allocation12 + $0x8] sm:$0xff]   ;;  %v8092_v61 = vld [vmem:[#allocation12 + $0x50] sm:$0xff]  }
 0x3b1   : > { %v3879_v31 = vpack.c.bf16 %v3871_v5, %v3871_v5  ;;  %v8094_v4 = vld [vmem:[#allocation12 + $0x58] sm:$0xff]  }
 0x3b2   : > { %v8095_v5 = vld [vmem:[#allocation12 + $0x18] sm:$0xff]  }
 0x3b3   : > { %5593 = vmatprep.mubr.bf16.mxu0 %v3879_v31  ;;  %5740 = vmatpush1.bf16.msra.mxu1 %v7965_v28  ;;  %v8096_v28 = vld [vmem:[#allocation12 + $0x60] sm:$0xff]  }
 0x3b4   : > { %5757 = vmatprep.mubr.bf16.mxu1 %v3879_v31  ;;  %5594 = vmatmul.mubr.bf16.vlgmr.msra.gmra.mrb[8].mxu0 %v8797_v10  ;;  %v8097_v31 = vld [vmem:[#allocation12 + $0x20] sm:$0xff]  }
 0x3b5   : > { %5741 = vmatprep.subr.bf16.mxu1 %v7970_v6  ;;  %6175 = vmatpush1.bf16.msra.mxu0 %v7992_v9  ;;  %v8098_v6 = vld [vmem:[#allocation12 + $0x68] sm:$0xff]   ;;  %v8801_v9 = vld [vmem:[#allocation7] sm:$0xf] }
 0x3b6   : > { %6176 = vmatprep.subr.bf16.mxu0 %v7997_v11  ;;  %v4145_v11 = vrot.slane %v8801_v9, %v8737_v8 }
 0x3b7   : > { %5742 = vmatpush1.bf16.msra.mxu1 %v7968_v22 }
 0x3b8   : > { %5743 = vmatprep.subr.bf16.mxu1 %v7973_v12 }
 0x3b9   : > { %6177 = vmatpush1.bf16.msra.mxu0 %v7995_v13 }
 0x3ba   : > { %6178 = vmatprep.subr.bf16.mxu0 %v8000_v15 }
 0x3bb   : > { %5744 = vmatpush1.bf16.msra.mxu1 %v7971_v17 }
 0x3bc   : > { %5745 = vmatprep.subr.bf16.mxu1 %v7976_v18 }
 0x3bd   : > { %6179 = vmatpush1.bf16.msra.mxu0 %v7998_v20 }
 0x3be   : > { %6180 = vmatprep.subr.bf16.mxu0 %v8003_v7 }
 0x3bf   : > { %5746 = vmatpush1.bf16.msra.mxu1 %v7974_v23 }
 0x3c0   : > { %5747 = vmatprep.subr.bf16.mxu1 %v7979_v24 }
 0x3c1   : > { %6181 = vmatpush1.bf16.msra.mxu0 %v8001_v25 }
 0x3c2   : > { %6182 = vmatprep.subr.bf16.mxu0 %v8006_v26  ;;  %v8040_v26 = vld [vmem:[#allocation9 + $0x100] ss:$8 sps:$4 sm:$0xff]  }
 0x3c3   : > { %5748 = vmatpush1.bf16.msra.mxu1 %v7977_v53 }
 0x3c4   : > { %5749 = vmatprep.subr.bf16.mxu1 %v7982_v27  ;;  %v8045_v27 = vld [vmem:[#allocation9 + $0x114] ss:$8 sps:$4 sm:$0xff]  }
 0x3c5   : > { %6183 = vmatpush1.bf16.msra.mxu0 %v8004_v54  ;;  %v8043_v54 = vld [vmem:[#allocation9 + $0x110] ss:$8 sps:$4 sm:$0xff]  }
 0x3c6   : > { %6184 = vmatprep.subr.bf16.mxu0 %v8009_v29  ;;  %v8048_v29 = vld [vmem:[#allocation9 + $0x124] ss:$8 sps:$4 sm:$0xff]  }
 0x3c7   : > { %5750 = vmatpush1.bf16.msra.mxu1 %v7980_v30  ;;  %v8046_v30 = vld [vmem:[#allocation9 + $0x120] ss:$8 sps:$4 sm:$0xff]  }
 0x3c8   : > { %5751 = vmatprep.subr.bf16.mxu1 %v7985_v32  ;;  %v8051_v32 = vld [vmem:[#allocation9 + $0x134] ss:$8 sps:$4 sm:$0xff]  }
 0x3c9   : > { %6185 = vmatpush1.bf16.msra.mxu0 %v8007_v34  ;;  %v8049_v34 = vld [vmem:[#allocation9 + $0x130] ss:$8 sps:$4 sm:$0xff]  }
 0x3ca   : > { %6186 = vmatprep.subr.bf16.mxu0 %v8012_v35  ;;  %v8054_v35 = vld [vmem:[#allocation9 + $0x144] ss:$8 sps:$4 sm:$0xff]  }
 0x3cb   : > { %5752 = vmatpush1.bf16.msra.mxu1 %v7983_v38  ;;  %v8052_v38 = vld [vmem:[#allocation9 + $0x140] ss:$8 sps:$4 sm:$0xff]  }
 0x3cc   : > { %5753 = vmatprep.subr.bf16.mxu1 %v7988_v39  ;;  %v8057_v39 = vld [vmem:[#allocation9 + $0x154] ss:$8 sps:$4 sm:$0xff]  }
 0x3cd   : > { %6187 = vmatpush1.bf16.msra.mxu0 %v8010_v40  ;;  %v8055_v40 = vld [vmem:[#allocation9 + $0x150] ss:$8 sps:$4 sm:$0xff]  }
 0x3ce   : > { %6188 = vmatprep.subr.bf16.mxu0 %v8015_v41  ;;  %v8060_v41 = vld [vmem:[#allocation9 + $0x164] ss:$8 sps:$4 sm:$0xff]  }
 0x3cf   : > { %5754 = vmatpush1.bf16.msra.mxu1 %v7986_v47  ;;  %v8058_v47 = vld [vmem:[#allocation9 + $0x160] ss:$8 sps:$4 sm:$0xff]  }
 0x3d0   : > { %5755 = vmatprep.subr.bf16.mxu1 %v7991_v42  ;;  %v4153_v42 = vrot.slane %v8801_v9, %v909_v62  ;;  %v8067_v62 = vld [vmem:[#allocation9 + $0x190] ss:$8 sps:$4 sm:$0xff]  }
 0x3d1   : > { %6189 = vmatpush1.bf16.msra.mxu0 %v8013_v19  ;;  %v8063_v19 = vld [vmem:[#allocation9 + $0x174] ss:$8 sps:$4 sm:$0xff]  }
 0x3d2   : > { %6190 = vmatprep.subr.bf16.mxu0 %v8018_v58 }
 0x3d3   : > { %5756 = vmatpush1.bf16.msra.mxu1 %v7989_v52 }
 0x3d4   : > { %7392 = vmatprep.subr.bf16.mxu1 %v8088_v63  ;;  %v4149_v63 = vrot.slane %v8801_v9, %v905_v59  ;;  %v8099_v59 = vld [vmem:[#allocation12 + $0x28] sm:$0xff]  }
 0x3d5   : > { %6191 = vmatpush1.bf16.msra.mxu0 %v8016_v44 }
 0x3d6   : > { %5758 = vmatmul.mubr.bf16.vlgmr.msra.gmra.mrb[12].mxu1 %v8797_v10  ;;  %6192 = vmatprep.subr.bf16.mxu0 %v8021_v45  ;;  %v4141_v10 = vrot.slane %v8801_v9, %v8732_v3  ;;  %v8101_v9 = vld [vmem:[#allocation12 + $0x30] sm:$0xff]  }
 0x3d7   : > { %7393 = vmatpush3.bf16.msra.mxu1 %v8089_v1  ;;  %v8081_v1 = vld [vmem:[#allocation9 + $0x1d4] ss:$8 sps:$4 sm:$0xff]  }
 0x3d8   : > { %7394 = vmatprep.subr.bf16.mxu1 %v8090_v37  ;;  %v8079_v37 = vld [vmem:[#allocation9 + $0x1d0] ss:$8 sps:$4 sm:$0xff]  }
 0x3d9   : > { %6193 = vmatpush1.bf16.msra.mxu0 %v8019_v36  ;;  %v8061_v36 = vld [vmem:[#allocation9 + $0x170] ss:$8 sps:$4 sm:$0xff]  }
 0x3da   : > { %6194 = vmatprep.subr.bf16.mxu0 %v8024_v33 }
 0x3db   : > { %7395 = vmatpush3.bf16.msra.mxu1 %v8091_v2 }
 0x3dc   : > { %7396 = vmatprep.subr.bf16.mxu1 %v8092_v61  ;;  %v8084_v61 = vld [vmem:[#allocation9 + $0x1e4] ss:$8 sps:$4 sm:$0xff]  }
 0x3dd   : > { %6195 = vmatpush1.bf16.msra.mxu0 %v8022_v0  ;;  %v8066_v0 = vld [vmem:[#allocation9 + $0x184] ss:$8 sps:$4 sm:$0xff]  }
 0x3de   : > { %6196 = vmatprep.subr.bf16.mxu0 %v8027_v46 }
 0x3df   : > { %7397 = vmatpush3.bf16.msra.mxu1 %v8093_v21  ;;  %v8082_v21 = vld [vmem:[#allocation9 + $0x1e0] ss:$8 sps:$4 sm:$0xff]  }
 0x3e0   : > { %7398 = vmatprep.subr.bf16.mxu1 %v8094_v4 }
 0x3e1   : > { %6197 = vmatpush1.bf16.msra.mxu0 %v8025_v49 }
 0x3e2   : > { %6198 = vmatprep.subr.bf16.mxu0 %v8030_v14  ;;  %v8064_v14 = vld [vmem:[#allocation9 + $0x180] ss:$8 sps:$4 sm:$0xff]  }
 0x3e3   : > { %7399 = vmatpush3.bf16.msra.mxu1 %v8095_v5  ;;  %v8087_v5 = vld [vmem:[#allocation9 + $0x1f4] ss:$8 sps:$4 sm:$0xff]  }
 0x3e4   : > { %7400 = vmatprep.subr.bf16.mxu1 %v8096_v28  ;;  %v8085_v28 = vld [vmem:[#allocation9 + $0x1f0] ss:$8 sps:$4 sm:$0xff]  }
 0x3e5   : > { %6199 = vmatpush1.bf16.msra.mxu0 %v8028_v48  ;;  %v8069_v48 = vld [vmem:[#allocation9 + $0x194] ss:$8 sps:$4 sm:$0xff]  }
 0x3e6   : > { %6200 = vmatprep.subr.bf16.mxu0 %v8033_v43 }
 0x3e7   : > { %7401 = vmatpush3.bf16.msra.mxu1 %v8097_v31 }
 0x3e8   : > { %7402 = vmatprep.subr.bf16.mxu1 %v8098_v6  ;;  %v8100_v6 = vld [vmem:[#allocation12 + $0x70] sm:$0xff]  }
 0x3e9   : > { %6201 = vmatpush1.bf16.msra.mxu0 %v8031_v50  ;;  %v8072_v50 = vld [vmem:[#allocation9 + $0x1a4] ss:$8 sps:$4 sm:$0xff]  }
 0x3ea   : > { %6202 = vmatprep.subr.bf16.mxu0 %v8036_v51  ;;  %v8070_v51 = vld [vmem:[#allocation9 + $0x1a0] ss:$8 sps:$4 sm:$0xff]  }
 0x3eb   : > { %7403 = vmatpush3.bf16.msra.mxu1 %v8099_v59 }
 0x3ec   : > { %7404 = vmatprep.subr.bf16.mxu1 %v8100_v6 }
 0x3ed   : > { %6203 = vmatpush1.bf16.msra.mxu0 %v8034_v16  ;;  %v8075_v16 = vld [vmem:[#allocation9 + $0x1b4] ss:$8 sps:$4 sm:$0xff]  }
 0x3ee   : > { %6204 = vmatprep.subr.bf16.mxu0 %v8039_v55  ;;  %v8073_v55 = vld [vmem:[#allocation9 + $0x1b0] ss:$8 sps:$4 sm:$0xff]  }
 0x3ef   : > { %7405 = vmatpush3.bf16.msra.mxu1 %v8101_v9 }
 0x3f1   : > { %6205 = vmatpush1.bf16.msra.mxu0 %v8037_v56  ;;  %v8078_v56 = vld [vmem:[#allocation9 + $0x1c4] ss:$8 sps:$4 sm:$0xff]  }
 0x3f2   : > { %6215 = vmatprep.subr.bf16.mxu0 %v8042_v60  ;;  %v8076_v60 = vld [vmem:[#allocation9 + $0x1c0] ss:$8 sps:$4 sm:$0xff]  }
 0x487   : > { %v5595_v22 = vpop.f32.mrb[8].mxu0 }
 0x488   : > { %v7424_v12 = vadd.f32 %v5595_v22, %v4141_v10  ;;  %v5597_v13 = vpop.f32.mrb[9].mxu0  ;;  %v8102_v10 = vld [vmem:[#allocation12 + $0x78] sm:$0xff]  }
 0x489   : > { %v7425_v15 = vadd.f32 %v5597_v13, %v4145_v11  ;;  %v5599_v17 = vpop.f32.mrb[10].mxu0  ;;  %v8103_v11 = vld [vmem:[#allocation12 + $0x38] sm:$0xff]   ;;  %7406 = vmatprep.subr.bf16.mxu1 %v8102_v10 }
 0x48a   : > { %v5766_v18 = vmul.f32 0.2, %v7424_v12  ;;  %v5600_v20 = vpop.f32.mrb[11].mxu0  ;;  %7407 = vmatpush3.bf16.msra.mxu1 %v8103_v11  ;;  %v5842_v22 = vld [vmem:[#allocation10] sm:$0x3] }
 0x48b   : > { %v5767_v7 = vmul.f32 0.2, %v7425_v15  ;;  %v5851_v13 = vrot.slane %v5842_v22, %v8737_v8 }
 0x48c   : > { %v5770_v23 = vmax.f32 %v7424_v12, %v5766_v18  ;;  %v5847_v12 = vrot.slane %v5842_v22, %v8732_v3 }
 0x48d   : > { %v5771_v24 = vmax.f32 %v7425_v15, %v5767_v7 }
 0x48e   : > { %v5774_v53 = vpack.c.bf16 %v5770_v23, %v5770_v23 }
 0x48f   : > { %v5775_v25 = vpack.c.bf16 %v5771_v24, %v5771_v24 }
 0x491   : > { %6206 = vmatprep.mubr.bf16.mxu0 %v5775_v25 }
 0x492   : > { %6207 = vmatmul.mubr.bf16.vlgmr.msra.gmra.mrb[12].mxu0 %v5774_v53 }
 0x493   : > { %6216 = vmatpush1.bf16.msra.mxu0 %v8040_v26 }
 0x494   : > { %6217 = vmatprep.subr.bf16.mxu0 %v8045_v27 }
 0x497   : > { %6218 = vmatpush1.bf16.msra.mxu0 %v8043_v54 }
 0x498   : > { %6219 = vmatprep.subr.bf16.mxu0 %v8048_v29 }
 0x49b   : > { %6220 = vmatpush1.bf16.msra.mxu0 %v8046_v30  ;;  %v7373_v30 = vld [vmem:[#allocation13] ss:$0 sm:$0xff] }
 0x49c   : > { %6221 = vmatprep.subr.bf16.mxu0 %v8051_v32 }
 0x49f   : > { %6222 = vmatpush1.bf16.msra.mxu0 %v8049_v34 }
 0x4a0   : > { %6223 = vmatprep.subr.bf16.mxu0 %v8054_v35 }
 0x4a3   : > { %6224 = vmatpush1.bf16.msra.mxu0 %v8052_v38 }
 0x4a4   : > { %6225 = vmatprep.subr.bf16.mxu0 %v8057_v39 }
 0x4a7   : > { %6226 = vmatpush1.bf16.msra.mxu0 %v8055_v40 }
 0x4a8   : > { %6227 = vmatprep.subr.bf16.mxu0 %v8060_v41 }
 0x4a9   : > { %v5759_v58 = vpop.f32.mrb[12].mxu1 }
 0x4aa   : > { %v5761_v52 = vpop.f32.mrb[13].mxu1  ;;  %v7426_v2 = vadd.f32 %v5759_v58, %v4149_v63 }
 0x4ab   : > { %v7427_v44 = vadd.f32 %v5761_v52, %v4153_v42  ;;  %6228 = vmatpush1.bf16.msra.mxu0 %v8058_v47  ;;  %v5763_v45 = vpop.f32.mrb[14].mxu1 }
 0x4ac   : > { %v5764_v33 = vpop.f32.mrb[15].mxu1  ;;  %6229 = vmatprep.subr.bf16.mxu0 %v8063_v19  ;;  %v5768_v4 = vmul.f32 0.2, %v7426_v2 }
 0x4ad   : > { %v5769_v46 = vmul.f32 0.2, %v7427_v44 }
 0x4ae   : > { %v5772_v31 = vmax.f32 %v7426_v2, %v5768_v4 }
 0x4af   : > { %v5773_v49 = vmax.f32 %v7427_v44, %v5769_v46  ;;  %6230 = vmatpush1.bf16.msra.mxu0 %v8061_v36 }
 0x4b0   : > { %6231 = vmatprep.subr.bf16.mxu0 %v8066_v0  ;;  %v5776_v57 = vpack.c.bf16 %v5772_v31, %v5772_v31 }
 0x4b1   : > { %v5777_v43 = vpack.c.bf16 %v5773_v49, %v5773_v49 }
 0x4b3   : > { %6232 = vmatpush1.bf16.msra.mxu0 %v8064_v14  ;;  %6247 = vmatprep.mubr.bf16.mxu0 %v5777_v43 }
 0x4b4   : > { %6233 = vmatprep.subr.bf16.mxu0 %v8069_v48 }
 0x4b7   : > { %6234 = vmatpush1.bf16.msra.mxu0 %v8067_v62 }
 0x4b8   : > { %6235 = vmatprep.subr.bf16.mxu0 %v8072_v50 }
 0x4bb   : > { %6236 = vmatpush1.bf16.msra.mxu0 %v8070_v51 }
 0x4bc   : > { %6237 = vmatprep.subr.bf16.mxu0 %v8075_v16 }
 0x4bf   : > { %6238 = vmatpush1.bf16.msra.mxu0 %v8073_v55 }
 0x4c0   : > { %6239 = vmatprep.subr.bf16.mxu0 %v8078_v56 }
 0x4c3   : > { %6240 = vmatpush1.bf16.msra.mxu0 %v8076_v60 }
 0x4c4   : > { %6241 = vmatprep.subr.bf16.mxu0 %v8081_v1 }
 0x4c7   : > { %6242 = vmatpush1.bf16.msra.mxu0 %v8079_v37 }
 0x4c8   : > { %6243 = vmatprep.subr.bf16.mxu0 %v8084_v61 }
 0x4cb   : > { %6244 = vmatpush1.bf16.msra.mxu0 %v8082_v21 }
 0x4cc   : > { %6245 = vmatprep.subr.bf16.mxu0 %v8087_v5 }
 0x4cf   : > { %6246 = vmatpush1.bf16.msra.mxu0 %v8085_v28 }
 0x4d2   : > { %6248 = vmatmul.mubr.bf16.vlgmr.msra.gmra.mrb[12].mxu0 %v5776_v57 }
 0x5a5   : > { %v6249_v15 = vpop.f32.mrb[12].mxu0 }
 0x5a6   : > { %v7428_v17 = vadd.f32 %v6249_v15, %v5847_v12  ;;  %v6251_v18 = vpop.f32.mrb[13].mxu0 }
 0x5a7   : > { %v7429_v20 = vadd.f32 %v6251_v18, %v5851_v13  ;;  %v6253_v7 = vpop.f32.mrb[14].mxu0 }
 0x5a8   : > { %v6256_v23 = vmul.f32 0.2, %v7428_v17  ;;  %v6254_v24 = vpop.f32.mrb[15].mxu0 }
 0x5a9   : > { %v6257_v25 = vmul.f32 0.2, %v7429_v20 }
 0x5aa   : > { %v6258_v26 = vmax.f32 %v7428_v17, %v6256_v23 }
 0x5ab   : > { %v6259_v53 = vmax.f32 %v7429_v20, %v6257_v25 }
 0x5ac   : > { %v6260_v54 = vpack.c.bf16 %v6258_v26, %v6258_v26 }
 0x5ad   : > { %v6261_v27 = vpack.c.bf16 %v6259_v53, %v6259_v53 }
 0x5af   : > { %6429 = vmatprep.mubr.bf16.mxu1 %v6261_v27 }
 0x5b0   : > { %6430 = vmatmul.mubr.bf16.vlgmr.msra.gmra.mrb[16].mxu1 %v6260_v54 }
 0x683   : > { %v7408_v29 = vpop.f32.mrb[16].mxu1 }
 0x684   : > { %v7409_v3 = vpop.f32.mrb[17].mxu1 }
 0x685   : > { %v7410_v32 = vadd.f32 %v7409_v3, %v7408_v29  ;;  %v7411_v8 = vpop.f32.mrb[18].mxu1 }
 0x686   : > { %v7412_v34 = vpop.f32.mrb[19].mxu1 }
 0x687   : > { %v6432_v35 = vadd.f32 %v7410_v32, %v7373_v30 }
 0x689   : > { %v6437_v38 = vsub.f32 0.0, %v6432_v35 }
 0x68b   : > { %v6438_v39 = vmul.f32 1.442695, %v6437_v38 }
 0x68d   : > { %8104 = vpow2.f32 %v6438_v39 }
 0x697   : > { %v8105_v40 = vpop.eup %8104 }
 0x698   : > { %v6440_v41 = vadd.f32 1.0, %v8105_v40 }
 0x69a   : > { %8106 = vrcp.f32 %v6440_v41 }
 0x6a4   : > { %v8107_v47 = vpop.eup %8106 }
 0x6a5   : > { %6442 = vst [vmem:[%s439_s17] sm:$0xff] %v8107_v47 }
 0x6a6 PF: > { %s24_s30 = sadd.s32 1, %s8361_s30  }
 0x6a7   : > { %p21_p13 = scmp.ge.s32.totalorder %s24_s30, 4  }
 0x6a9   :  { %23 = sbr.rel (!%p21_p13) target bundleno = 5 (0x5), region = 119 }
 0x6b0   :  { %6462 = vsyncpa [#allocation3], 1 }
 0x6b1   :  { %6464 = vsyncpa [#allocation3 + $0x1], 1 }
 0x6b2   :  { %6465 = vsyncpa [#allocation5], 1 }
 0x6b3   :  { %6466 = vsyncpa [#allocation8], 1 }
 0x6b4   :  { %6467 = vsyncpa [#allocation11], 1 }
 0x6b5   :  { %6468 = vsyncpa [#allocation14], 1 }

</bundles_post_ra>
